<compile_context>
chip_gen: v7x
topology: tpu7x:2x2x1
jax: 0.10.0
libtpu: 0.0.40
codegen_flags: <defaults>
</compile_context>

<pallas_src>
import math

import jax
import jax.numpy as jnp
from jax.experimental import pallas as pl
from jax.experimental.pallas import tpu as pltpu


# VMEM sizing: double-buffered output block + double-buffered int32 diff block
# kept under this budget; scoped limit raised/kept at 32 MiB (safe on v5e/v6e
# 128 MiB physical and within v7x's 32 MiB scoped / 64 MiB physical).
_VMEM_BLOCK_BUDGET = 24 * 1024 * 1024
_VMEM_LIMIT_BYTES = 32 * 1024 * 1024


def _round_up(x, m):
    return ((x + m - 1) // m) * m


def _eye_kernel(diff_ref, slb_ref):
    """Writes one (tm, n_cols) row-tile of [ I_N | 0 (| pad) ].

    diff_ref[r, c] = c - r is grid-invariant (constant index_map, fetched once
    per core).  Per step: one compare against the scalar row offset i*tm and one
    select — the minimum VALU work, fully hidden under the HBM writeback on
    every generation including v7x.
    """
    i = pl.program_id(0)
    tm = slb_ref.shape[0]
    one = jnp.array(1, slb_ref.dtype)
    zero = jnp.array(0, slb_ref.dtype)
    slb_ref[...] = jnp.where(diff_ref[...] == i * tm, one, zero)


def _choose_row_tile(N, n_cols, dtype, row_tile):
    """Pick (tm, grid): balanced, >=2 steps when possible, VMEM-budgeted."""
    itemsize = jnp.dtype(dtype).itemsize
    sub = 16 if itemsize < 4 else 8          # bf16 packs 16 sublanes per vreg
    if N <= sub:
        return N, 1                           # single full-height block (full-dim rule)
    # VMEM cap: 2x output block (itemsize) + 2x int32 diff block (4 B) per row.
    per_row_bytes = n_cols * (itemsize + 4)
    tm_cap = max(sub, (_VMEM_BLOCK_BUDGET // (2 * per_row_bytes)) // sub * sub)
    # Aim for >= 2 grid steps, even count so v7x's two TensorCores get balanced
    # row ranges (e.g. N=675 -> 344/331 instead of 512/163).
    grid = max(2, pl.cdiv(N, min(row_tile, tm_cap)))
    if grid % 2:
        grid += 1
    tm = min(_round_up(pl.cdiv(N, grid), sub), tm_cap)
    tm = max(tm, sub)
    grid = pl.cdiv(N, tm)                     # ragged N: last partial tile masked
    return tm, grid


def _identity_lane_dense(N, n_cols, *, dtype, row_tile=512):
    """Builds the (N, n_cols) dense [ I_N | 0 ] tensor on-chip, lane-dense.

    n_cols >= N + 1.  Columns >= N are zero (row < N < col), so padding columns
    need no extra masking.  The ragged-N last row-tile relies on Pallas masking
    out-of-bounds rows on writeback (spurious 1.0s are computed in the padded
    row region but never stored) — re-verify if the out_spec is ever changed to
    column tiling / aliasing / manual DMA.
    """
    tm, grid = _choose_row_tile(N, n_cols, dtype, row_tile)

    # Grid-invariant index pattern, computed once in plain JAX (cheap XLA iota).
    rows = jax.lax.broadcasted_iota(jnp.int32, (tm, n_cols), 0)
    cols = jax.lax.broadcasted_iota(jnp.int32, (tm, n_cols), 1)
    diff = cols - rows

    return pl.pallas_call(
        _eye_kernel,
        out_shape=jax.ShapeDtypeStruct((N, n_cols), dtype),
        grid=(grid,),
        # Last dims equal the full array dims (allowed even when not %128).
        in_specs=[pl.BlockSpec((tm, n_cols), lambda i: (0, 0))],
        out_specs=pl.BlockSpec((tm, n_cols), lambda i: (i, 0)),
        compiler_params=pltpu.CompilerParams(
            dimension_semantics=("parallel",),   # v7x: shard rows over 2 TCs
            vmem_limit_bytes=_VMEM_LIMIT_BYTES,
        ),
    )(diff)


def dp_flatten_flat(lb, ub, *, dtype=jnp.bfloat16, row_tile=512):
    """Lane-dense performance path for downstream Pallas consumers.

    Returns (lb [B, N], ub [B, N], slb [N, round_up(N+1, 128)], logical_cols=N+1).
    slb is bf16 by default (values are exactly {0, 1}, cast is exact) and its
    last dim is padded to a 128-lane multiple so every store / downstream load
    is aligned and unmasked; columns >= N+1 are zero.  Consumers should read
    the logical [:, :N+1] window.
    """
    B = lb.shape[0]
    N = math.prod(lb.shape[1:])
    # Flatten is metadata-only: no kernel, no HBM traffic.
    lb2 = lb.reshape(B, N)
    ub2 = ub.reshape(B, N)
    n_cols = _round_up(N + 1, 128)
    slb2 = _identity_lane_dense(N, n_cols, dtype=dtype, row_tile=row_tile)
    return lb2, ub2, slb2, N + 1


def dp_flatten(lb, ub, *, row_tile=512):
    """Forward pass of DPFlatten with PyTorch-matching output shapes/dtype.

    Returns (lb, ub, slb, sub, kernel_size, stride, padding).  slb is float32
    with exact shape (N, N+1, 1, 1), written directly by the kernel (a padded
    slab + slice would cost an extra HBM copy).  `sub` aliases the same array
    as `slb`, mirroring `x.sub = x.slb`.
    """
    B = lb.shape[0]
    N = math.prod(lb.shape[1:])
    lb2 = lb.reshape(B, N)
    ub2 = ub.reshape(B, N)
    slb2 = _identity_lane_dense(N, N + 1, dtype=jnp.float32, row_tile=row_tile)

    lb_out = lb2[:, :, None, None]       # [B, N, 1, 1]
    ub_out = ub2[:, :, None, None]       # [B, N, 1, 1]
    slb_out = slb2[:, :, None, None]     # [N, N+1, 1, 1]
    sub_out = slb_out                    # x.sub = x.slb (same tensor)
    kernel_size, stride, padding = 1, 1, 0
    return lb_out, ub_out, slb_out, sub_out, kernel_size, stride, padding


if __name__ == "__main__":
    key = jax.random.PRNGKey(0)
    k1, k2 = jax.random.split(key)

    # --- main case: B=2, C=4, H=16, W=16 -> N = 1024 ---------------------
    B, C, H, W = 2, 4, 16, 16
    N = C * H * W

    lb = jax.random.normal(k1, (B, C, H, W), dtype=jnp.float32)
    ub = lb + jnp.abs(jax.random.normal(k2, (B, C, H, W), dtype=jnp.float32))

    lb_o, ub_o, slb_o, sub_o, ks, st, pad = dp_flatten(lb, ub)
    jax.block_until_ready((lb_o, ub_o, slb_o, sub_o))

    # Reference (plain JAX mirror of the PyTorch module).
    ref_lb = lb.reshape(B, N)[:, :, None, None]
    ref_ub = ub.reshape(B, N)[:, :, None, None]
    ref_slb = jnp.concatenate(
        [jnp.eye(N, dtype=jnp.float32),
         jnp.zeros((N, 1), dtype=jnp.float32)], axis=1)[:, :, None, None]

    assert lb_o.shape == (B, N, 1, 1) and ub_o.shape == (B, N, 1, 1)
    assert slb_o.shape == (N, N + 1, 1, 1) and sub_o.shape == (N, N + 1, 1, 1)
    assert slb_o.dtype == jnp.float32
    assert jnp.array_equal(lb_o, ref_lb)
    assert jnp.array_equal(ub_o, ref_ub)
    assert jnp.array_equal(slb_o, ref_slb)
    assert jnp.array_equal(sub_o, ref_slb)
    assert (ks, st, pad) == (1, 1, 0)

    # --- lane-dense / bf16 / 128-aligned performance path ----------------
    lb2, ub2, slb2, logical_cols = dp_flatten_flat(lb, ub)
    jax.block_until_ready(slb2)
    assert logical_cols == N + 1
    assert slb2.shape == (N, _round_up(N + 1, 128))
    assert slb2.dtype == jnp.bfloat16
    assert jnp.array_equal(slb2[:, :N + 1].astype(jnp.float32),
                           ref_slb[..., 0, 0])
    assert not bool(jnp.any(slb2[:, N + 1:]))     # padded columns are zero
    assert jnp.array_equal(lb2, lb.reshape(B, N))
    assert jnp.array_equal(ub2, ub.reshape(B, N))

    # --- ragged case: N not a multiple of the row tile (partial last tile) --
    Cr, Hr, Wr = 3, 15, 15          # N = 675, not a multiple of 512 or 8
    Nr = Cr * Hr * Wr
    lb_r = jax.random.normal(k1, (B, Cr, Hr, Wr), dtype=jnp.float32)
    ub_r = lb_r + 1.0
    lb_ro, ub_ro, slb_ro, sub_ro, _, _, _ = dp_flatten(lb_r, ub_r)
    jax.block_until_ready((lb_ro, ub_ro, slb_ro))

    ref_slb_r = jnp.concatenate(
        [jnp.eye(Nr, dtype=jnp.float32),
         jnp.zeros((Nr, 1), dtype=jnp.float32)], axis=1)[:, :, None, None]
    assert slb_ro.shape == (Nr, Nr + 1, 1, 1)
    assert jnp.array_equal(lb_ro, lb_r.reshape(B, Nr)[:, :, None, None])
    assert jnp.array_equal(ub_ro, ub_r.reshape(B, Nr)[:, :, None, None])
    assert jnp.array_equal(slb_ro, ref_slb_r)
    assert jnp.array_equal(sub_ro, ref_slb_r)

    print("KERNEL_OK")
</pallas_src>

<mosaic_0001>
module attributes {stable_mosaic.version = 11 : i64} {
  func.func @_eye_kernel(%arg0: i32, %arg1: memref<512x1025xi32, #tpu.memory_space<vmem>>, %arg2: memref<512x1025xf32, #tpu.memory_space<vmem>>) attributes {dimension_semantics = [#tpu.dimension_semantics<parallel>], iteration_bounds = array<i64: 2>, scalar_prefetch = 0 : i64, scratch_operands = 0 : i64, tpu.core_type = #tpu.core_type<tc>, window_params = [{pipeline_mode = #tpu.pipeline_mode<synchronous>, transform_indices = @transform_0, window_bounds = array<i64: 512, 1025>}, {transform_indices = @transform_1, window_bounds = array<i64: 512, 1025>}]} {
    %c0 = arith.constant 0 : index
    %c0_0 = arith.constant 0 : index
    %0 = vector.load %arg1[%c0, %c0_0] : memref<512x1025xi32, #tpu.memory_space<vmem>>, vector<512x1025xi32>
    %c512_i32 = arith.constant 512 : i32
    %1 = arith.muli %arg0, %c512_i32 : i32
    %2 = vector.broadcast %1 : i32 to vector<512x1025xi32>
    %3 = arith.cmpi eq, %0, %2 : vector<512x1025xi32>
    %cst = arith.constant 1.000000e+00 : f32
    %cst_1 = arith.constant 0.000000e+00 : f32
    %4 = vector.broadcast %cst : f32 to vector<512x1025xf32>
    %5 = vector.broadcast %cst_1 : f32 to vector<512x1025xf32>
    %6 = arith.select %3, %4, %5 : vector<512x1025xi1>, vector<512x1025xf32>
    %c0_2 = arith.constant 0 : index
    %c0_3 = arith.constant 0 : index
    %7 = vector.load %arg2[%c0_2, %c0_3] : memref<512x1025xf32, #tpu.memory_space<vmem>>, vector<512x1025xf32>
    tpu.vector_store %arg2[%c0_2, %c0_3], %6 {strides = array<i32>} : memref<512x1025xf32, #tpu.memory_space<vmem>>, vector<512x1025xf32>,
    return
  }
  func.func @transform_0(%arg0: i32) -> (i32, i32) {
    %c0_i32 = arith.constant 0 : i32
    %c0_i32_0 = arith.constant 0 : i32
    %c0_i32_1 = arith.constant 0 : i32
    return %c0_i32, %c0_i32_0 : i32, i32
  }
  func.func @transform_1(%arg0: i32) -> (i32, i32) {
    %c0_i32 = arith.constant 0 : i32
    %c0_i32_0 = arith.constant 0 : i32
    return %arg0, %c0_i32 : i32, i32
  }
}

</mosaic_0001>

<bundles_post_ra>
// kernel: tpu_custom_call.1
= control target key start
LH: loop header
LB: loop body
LE: loop exit
PB: predicated region body
PF: predicated region fallthrough
CT: control target
= control target key end

     0   :  { %s2491_s6 = smov 0   ;;  %s6029_s0 = inlined_call_operand.vmem [shape: s32[512,1025], index: 0, kind: input, shape index: {}]   ;;  %s6030_s1 = inlined_call_operand.vmem [shape: f32[1024,1025], index: 1, kind: output, shape index: {}]  }
   0x1 LB: > { %s2453_s7 = sadd.s32 4294967295, %s2478_s6   ;;  %p2456_p0 = scmp.ge.s32.totalorder %s2478_s6, 1  ;;  %s2478_s6 = sphi %s2491_s6, %s11_s6  }
   0x2   : > { %p77_p1 = scmp.lt.s32.totalorder %s2478_s6, 3 }
   0x4   : > { %p78_p2 = pnand %p2456_p0, %p77_p1 }
   0x5   : > { %s2457_s8 = sshll.u32 (!%p78_p2), %s2453_s7, 6  ;;  %v100_v0 = vld [vmem:[%s6029_s0] sm:$0xff] (!%p78_p2)  ;;  %s2459_s11 = sshll.u32 (!%p78_p2), %s2453_s7, 9  ;;  %v101_v1 = vld [vmem:[%s6029_s0 + $0x8] sm:$0xff] (!%p78_p2)  ;;  %v102_v2 = vld [vmem:[%s6029_s0 + $0x10] sm:$0xff] (!%p78_p2)  ;;  %vm1838_vm0 = vcmask (!%p78_p2), 7168  }
   0x6   : > { %81 = sbr.rel (%p78_p2) target bundleno = 305 (0x131), region = 24  ;;  %p94_p3 = scmp.lt.s32.totalorder (!%p78_p2), %s2457_s8, 127  ;;  %v2508_v3 = vstv (!%p78_p2), %s2459_s11  ;;  %v103_v4 = vld [vmem:[%s6029_s0 + $0x18] sm:$0xff] (!%p78_p2)  ;;  %v104_v5 = vld [vmem:[%s6029_s0 + $0x20] sm:$0xff] (!%p78_p2)  ;;  %v105_v6 = vld [vmem:[%s6029_s0 + $0x28] sm:$0xff] (!%p78_p2)  ;;  %v2480_v10 = vmov (!%p78_p2), 0.0  }
   0x7   : > { %vm678_vm1 = vcmp.eq.s32.totalorder (!%p78_p2), %v100_v0, %v2508_v3  ;;  %vm679_vm2 = vcmp.eq.s32.totalorder (!%p78_p2), %v101_v1, %v2508_v3  ;;  %vm680_vm3 = vcmp.eq.s32.totalorder (!%p78_p2), %v102_v2, %v2508_v3  ;;  %vm681_vm4 = vcmp.eq.s32.totalorder (!%p78_p2), %v103_v4, %v2508_v3  ;;  %v106_v7 = vld [vmem:[%s6029_s0 + $0x30] sm:$0xff] (!%p78_p2)  ;;  %v107_v8 = vld [vmem:[%s6029_s0 + $0x38] sm:$0xff] (!%p78_p2)  ;;  %v108_v9 = vld [vmem:[%s6029_s0 + $0x40] sm:$0xff] (!%p78_p2) }
   0x8   : > { %v1254_v11 = vsel (!%p78_p2), %vm678_vm1, 1.0, %v2480_v10  ;;  %v1255_v12 = vsel (!%p78_p2), %vm679_vm2, 1.0, %v2480_v10  ;;  %v1256_v13 = vsel (!%p78_p2), %vm680_vm3, 1.0, %v2480_v10  ;;  %v1257_v14 = vsel (!%p78_p2), %vm681_vm4, 1.0, %v2480_v10  ;;  %v109_v15 = vld [vmem:[%s6029_s0 + $0x48] sm:$0xff] (!%p78_p2)  ;;  %v110_v16 = vld [vmem:[%s6029_s0 + $0x50] sm:$0xff] (!%p78_p2) }
   0x9   : > { %vm682_vm5 = vcmp.eq.s32.totalorder (!%p78_p2), %v104_v5, %v2508_v3  ;;  %vm683_vm6 = vcmp.eq.s32.totalorder (!%p78_p2), %v105_v6, %v2508_v3  ;;  %vm684_vm7 = vcmp.eq.s32.totalorder (!%p78_p2), %v106_v7, %v2508_v3  ;;  %vm685_vm8 = vcmp.eq.s32.totalorder (!%p78_p2), %v107_v8, %v2508_v3  ;;  %v111_v17 = vld [vmem:[%s6029_s0 + $0x58] sm:$0xff] (!%p78_p2)  ;;  %v112_v18 = vld [vmem:[%s6029_s0 + $0x60] sm:$0xff] (!%p78_p2)  ;;  %v113_v23 = vld [vmem:[%s6029_s0 + $0x68] sm:$0xff] (!%p78_p2) }
   0xa   : > { %v1258_v19 = vsel (!%p78_p2), %vm682_vm5, 1.0, %v2480_v10  ;;  %v1259_v20 = vsel (!%p78_p2), %vm683_vm6, 1.0, %v2480_v10  ;;  %v1260_v21 = vsel (!%p78_p2), %vm684_vm7, 1.0, %v2480_v10  ;;  %v1261_v22 = vsel (!%p78_p2), %vm685_vm8, 1.0, %v2480_v10  ;;  %v114_v24 = vld [vmem:[%s6029_s0 + $0x70] sm:$0xff] (!%p78_p2)  ;;  %v115_v25 = vld [vmem:[%s6029_s0 + $0x78] sm:$0xff] (!%p78_p2) }
   0xb   : > { %vm686_vm9 = vcmp.eq.s32.totalorder (!%p78_p2), %v108_v9, %v2508_v3  ;;  %vm687_vm10 = vcmp.eq.s32.totalorder (!%p78_p2), %v109_v15, %v2508_v3  ;;  %vm688_vm11 = vcmp.eq.s32.totalorder (!%p78_p2), %v110_v16, %v2508_v3  ;;  %vm689_vm12 = vcmp.eq.s32.totalorder (!%p78_p2), %v111_v17, %v2508_v3  ;;  %v116_v26 = vld [vmem:[%s6029_s0 + $0x80] sm:$0xff] (!%p78_p2)  ;;  %v117_v31 = vld [vmem:[%s6029_s0 + $0x88] sm:$0xff] (!%p78_p2)  ;;  %v118_v32 = vld [vmem:[%s6029_s0 + $0x90] sm:$0xff] (!%p78_p2) }
   0xc   : > { %v1262_v27 = vsel (!%p78_p2), %vm686_vm9, 1.0, %v2480_v10  ;;  %v1263_v28 = vsel (!%p78_p2), %vm687_vm10, 1.0, %v2480_v10  ;;  %v1264_v29 = vsel (!%p78_p2), %vm688_vm11, 1.0, %v2480_v10  ;;  %v1265_v30 = vsel (!%p78_p2), %vm689_vm12, 1.0, %v2480_v10  ;;  %v119_v33 = vld [vmem:[%s6029_s0 + $0x98] sm:$0xff] (!%p78_p2)  ;;  %v120_v34 = vld [vmem:[%s6029_s0 + $0xa0] sm:$0xff] (!%p78_p2) }
   0xd   : > { %s6032_s8 = smov (!%p94_p3, %s2457_s8), 127  ;;  %vm690_vm13 = vcmp.eq.s32.totalorder %v112_v18, %v2508_v3  ;;  %vm691_vm14 = vcmp.eq.s32.totalorder %v113_v23, %v2508_v3  ;;  %vm692_vm15 = vcmp.eq.s32.totalorder %v114_v24, %v2508_v3  ;;  %vm693_vm1 = vcmp.eq.s32.totalorder %v115_v25, %v2508_v3  ;;  %v121_v35 = vld [vmem:[%s6029_s0 + $0xa8] sm:$0xff]  ;;  %v122_v40 = vld [vmem:[%s6029_s0 + $0xb0] sm:$0xff]  ;;  %v123_v41 = vld [vmem:[%s6029_s0 + $0xb8] sm:$0xff] }
   0xe   : > { %s2462_s9 = smul.u32 72, %s6032_s8  ;;  %v1266_v36 = vsel %vm690_vm13, 1.0, %v2480_v10  ;;  %v1267_v37 = vsel %vm691_vm14, 1.0, %v2480_v10  ;;  %v1268_v38 = vsel %vm692_vm15, 1.0, %v2480_v10  ;;  %v1269_v39 = vsel %vm693_vm1, 1.0, %v2480_v10  ;;  %v124_v42 = vld [vmem:[%s6029_s0 + $0xc0] sm:$0xff] }
   0xf   : > { %vm694_vm2 = vcmp.eq.s32.totalorder %v116_v26, %v2508_v3  ;;  %vm695_vm3 = vcmp.eq.s32.totalorder %v117_v31, %v2508_v3  ;;  %vm696_vm4 = vcmp.eq.s32.totalorder %v118_v32, %v2508_v3  ;;  %vm697_vm5 = vcmp.eq.s32.totalorder %v119_v33, %v2508_v3  ;;  %v125_v43 = vld [vmem:[%s6029_s0 + $0xc8] sm:$0xff]  ;;  %v126_v48 = vld [vmem:[%s6029_s0 + $0xd0] sm:$0xff]  ;;  %v127_v49 = vld [vmem:[%s6029_s0 + $0xd8] sm:$0xff] }
  0x10   : > { %s2575_s19 = scalar_lea.vmem %s6030_s1, %s2462_s9  ;;  %v1270_v44 = vsel %vm694_vm2, 1.0, %v2480_v10  ;;  %v1271_v45 = vsel %vm695_vm3, 1.0, %v2480_v10  ;;  %v1272_v46 = vsel %vm696_vm4, 1.0, %v2480_v10  ;;  %v1273_v47 = vsel %vm697_vm5, 1.0, %v2480_v10  ;;  %v128_v50 = vld [vmem:[%s6029_s0 + $0xe0] sm:$0xff]  ;;  %v129_v51 = vld [vmem:[%s6029_s0 + $0xe8] sm:$0xff] }
  0x11   : > { %1830 = vst [vmem:[%s2575_s19] sm:$0xff] %v1254_v11  ;;  %1831 = vst [vmem:[%s2575_s19 + $0x8] sm:$0xff] %v1255_v12  ;;  %vm698_vm6 = vcmp.eq.s32.totalorder %v120_v34, %v2508_v3  ;;  %vm699_vm7 = vcmp.eq.s32.totalorder %v121_v35, %v2508_v3  ;;  %vm700_vm8 = vcmp.eq.s32.totalorder %v122_v40, %v2508_v3  ;;  %v130_v56 = vld [vmem:[%s6029_s0 + $0xf0] sm:$0xff]  ;;  %v131_v57 = vld [vmem:[%s6029_s0 + $0xf8] sm:$0xff] }
  0x12   : > { %1832 = vst [vmem:[%s2575_s19 + $0x10] sm:$0xff] %v1256_v13  ;;  %1833 = vst [vmem:[%s2575_s19 + $0x18] sm:$0xff] %v1257_v14  ;;  %vm701_vm9 = vcmp.eq.s32.totalorder %v123_v41, %v2508_v3  ;;  %v1274_v52 = vsel %vm698_vm6, 1.0, %v2480_v10  ;;  %v1275_v53 = vsel %vm699_vm7, 1.0, %v2480_v10  ;;  %v1276_v54 = vsel %vm700_vm8, 1.0, %v2480_v10  ;;  %v132_v58 = vld [vmem:[%s6029_s0 + $0x100] sm:$0xff] }
  0x13   : > { %1834 = vst [vmem:[%s2575_s19 + $0x20] sm:$0xff] %v1258_v19  ;;  %1835 = vst [vmem:[%s2575_s19 + $0x28] sm:$0xff] %v1259_v20  ;;  %v1277_v55 = vsel %vm701_vm9, 1.0, %v2480_v10  ;;  %vm702_vm10 = vcmp.eq.s32.totalorder %v124_v42, %v2508_v3  ;;  %vm703_vm11 = vcmp.eq.s32.totalorder %v125_v43, %v2508_v3  ;;  %vm704_vm12 = vcmp.eq.s32.totalorder %v126_v48, %v2508_v3  ;;  %v133_v59 = vld [vmem:[%s6029_s0 + $0x108] sm:$0xff]  ;;  %v134_v0 = vld [vmem:[%s6029_s0 + $0x110] sm:$0xff] }
  0x14   : > { %1836 = vst [vmem:[%s2575_s19 + $0x30] sm:$0xff] %v1260_v21  ;;  %1837 = vst [vmem:[%s2575_s19 + $0x38] sm:$0xff] %v1261_v22  ;;  %vm705_vm13 = vcmp.eq.s32.totalorder %v127_v49, %v2508_v3  ;;  %v1278_v60 = vsel %vm702_vm10, 1.0, %v2480_v10  ;;  %v1279_v61 = vsel %vm703_vm11, 1.0, %v2480_v10  ;;  %v1280_v62 = vsel %vm704_vm12, 1.0, %v2480_v10  ;;  %v135_v1 = vld [vmem:[%s6029_s0 + $0x118] sm:$0xff] }
  0x15   : > { %1839 = vst.msk [vmem:[%s2575_s19 + $0x40] sm:$0xff] %vm1838_vm0, %v1262_v27  ;;  %1840 = vst [vmem:[%s2575_s19 + $0x48] sm:$0xff] %v1263_v28  ;;  %v1281_v63 = vsel %vm705_vm13, 1.0, %v2480_v10  ;;  %vm706_vm14 = vcmp.eq.s32.totalorder %v128_v50, %v2508_v3  ;;  %vm707_vm15 = vcmp.eq.s32.totalorder %v129_v51, %v2508_v3  ;;  %vm708_vm1 = vcmp.eq.s32.totalorder %v130_v56, %v2508_v3  ;;  %v136_v2 = vld [vmem:[%s6029_s0 + $0x120] sm:$0xff]  ;;  %v137_v4 = vld [vmem:[%s6029_s0 + $0x128] sm:$0xff] }
  0x16   : > { %1841 = vst [vmem:[%s2575_s19 + $0x50] sm:$0xff] %v1264_v29  ;;  %1842 = vst [vmem:[%s2575_s19 + $0x58] sm:$0xff] %v1265_v30  ;;  %vm709_vm2 = vcmp.eq.s32.totalorder %v131_v57, %v2508_v3  ;;  %v1282_v5 = vsel %vm706_vm14, 1.0, %v2480_v10  ;;  %v1283_v6 = vsel %vm707_vm15, 1.0, %v2480_v10  ;;  %v1284_v7 = vsel %vm708_vm1, 1.0, %v2480_v10  ;;  %v138_v9 = vld [vmem:[%s6029_s0 + $0x130] sm:$0xff] }
  0x17   : > { %1843 = vst [vmem:[%s2575_s19 + $0x60] sm:$0xff] %v1266_v36  ;;  %1844 = vst [vmem:[%s2575_s19 + $0x68] sm:$0xff] %v1267_v37  ;;  %v1285_v8 = vsel %vm709_vm2, 1.0, %v2480_v10  ;;  %v139_v11 = vld [vmem:[%s6029_s0 + $0x138] sm:$0xff]  ;;  %vm710_vm3 = vcmp.eq.s32.totalorder %v132_v58, %v2508_v3  ;;  %vm711_vm4 = vcmp.eq.s32.totalorder %v133_v59, %v2508_v3  ;;  %vm712_vm5 = vcmp.eq.s32.totalorder %v134_v0, %v2508_v3  ;;  %v140_v12 = vld [vmem:[%s6029_s0 + $0x140] sm:$0xff] }
  0x18   : > { %1845 = vst [vmem:[%s2575_s19 + $0x70] sm:$0xff] %v1268_v38  ;;  %1846 = vst [vmem:[%s2575_s19 + $0x78] sm:$0xff] %v1269_v39  ;;  %vm713_vm6 = vcmp.eq.s32.totalorder %v135_v1, %v2508_v3  ;;  %v141_v13 = vld [vmem:[%s6029_s0 + $0x148] sm:$0xff]  ;;  %v1286_v14 = vsel %vm710_vm3, 1.0, %v2480_v10  ;;  %v1287_v15 = vsel %vm711_vm4, 1.0, %v2480_v10  ;;  %v1288_v16 = vsel %vm712_vm5, 1.0, %v2480_v10 }
  0x19   : > { %1847 = vst [vmem:[%s2575_s19 + $0x80] sm:$0xff] %v1270_v44  ;;  %1848 = vst.msk [vmem:[%s2575_s19 + $0x88] sm:$0xff] %vm1838_vm0, %v1271_v45  ;;  %v1289_v17 = vsel %vm713_vm6, 1.0, %v2480_v10  ;;  %v142_v18 = vld [vmem:[%s6029_s0 + $0x150] sm:$0xff]  ;;  %v143_v19 = vld [vmem:[%s6029_s0 + $0x158] sm:$0xff]  ;;  %vm714_vm7 = vcmp.eq.s32.totalorder %v136_v2, %v2508_v3  ;;  %vm715_vm8 = vcmp.eq.s32.totalorder %v137_v4, %v2508_v3  ;;  %vm716_vm9 = vcmp.eq.s32.totalorder %v138_v9, %v2508_v3 }
  0x1a   : > { %1849 = vst [vmem:[%s2575_s19 + $0x90] sm:$0xff] %v1272_v46  ;;  %1850 = vst [vmem:[%s2575_s19 + $0x98] sm:$0xff] %v1273_v47  ;;  %vm717_vm10 = vcmp.eq.s32.totalorder %v139_v11, %v2508_v3  ;;  %v144_v20 = vld [vmem:[%s6029_s0 + $0x160] sm:$0xff]  ;;  %v145_v21 = vld [vmem:[%s6029_s0 + $0x168] sm:$0xff]  ;;  %v1290_v22 = vsel %vm714_vm7, 1.0, %v2480_v10  ;;  %v1291_v23 = vsel %vm715_vm8, 1.0, %v2480_v10  ;;  %vm718_vm11 = vcmp.eq.s32.totalorder %v140_v12, %v2508_v3 }
  0x1b   : > { %1851 = vst [vmem:[%s2575_s19 + $0xa0] sm:$0xff] %v1274_v52  ;;  %1852 = vst [vmem:[%s2575_s19 + $0xa8] sm:$0xff] %v1275_v53  ;;  %v1292_v24 = vsel %vm716_vm9, 1.0, %v2480_v10  ;;  %v1293_v25 = vsel %vm717_vm10, 1.0, %v2480_v10  ;;  %v146_v26 = vld [vmem:[%s6029_s0 + $0x170] sm:$0xff]  ;;  %v147_v27 = vld [vmem:[%s6029_s0 + $0x178] sm:$0xff]  ;;  %vm719_vm12 = vcmp.eq.s32.totalorder %v141_v13, %v2508_v3  ;;  %vm720_vm13 = vcmp.eq.s32.totalorder %v142_v18, %v2508_v3 }
  0x1c   : > { %1853 = vst [vmem:[%s2575_s19 + $0xb0] sm:$0xff] %v1276_v54  ;;  %1854 = vst [vmem:[%s2575_s19 + $0xb8] sm:$0xff] %v1277_v55  ;;  %vm721_vm14 = vcmp.eq.s32.totalorder %v143_v19, %v2508_v3  ;;  %v148_v28 = vld [vmem:[%s6029_s0 + $0x180] sm:$0xff]  ;;  %v149_v29 = vld [vmem:[%s6029_s0 + $0x188] sm:$0xff]  ;;  %v1294_v30 = vsel %vm718_vm11, 1.0, %v2480_v10  ;;  %v1295_v31 = vsel %vm719_vm12, 1.0, %v2480_v10  ;;  %vm722_vm15 = vcmp.eq.s32.totalorder %v144_v20, %v2508_v3 }
  0x1d   : > { %1855 = vst [vmem:[%s2575_s19 + $0xc0] sm:$0xff] %v1278_v60  ;;  %1856 = vst [vmem:[%s2575_s19 + $0xc8] sm:$0xff] %v1279_v61  ;;  %v1296_v32 = vsel %vm720_vm13, 1.0, %v2480_v10  ;;  %v1297_v33 = vsel %vm721_vm14, 1.0, %v2480_v10  ;;  %v150_v34 = vld [vmem:[%s6029_s0 + $0x190] sm:$0xff]  ;;  %v151_v35 = vld [vmem:[%s6029_s0 + $0x198] sm:$0xff]  ;;  %vm723_vm1 = vcmp.eq.s32.totalorder %v145_v21, %v2508_v3  ;;  %vm724_vm2 = vcmp.eq.s32.totalorder %v146_v26, %v2508_v3 }
  0x1e   : > { %1857 = vst.msk [vmem:[%s2575_s19 + $0xd0] sm:$0xff] %vm1838_vm0, %v1280_v62  ;;  %1858 = vst [vmem:[%s2575_s19 + $0xd8] sm:$0xff] %v1281_v63  ;;  %vm725_vm3 = vcmp.eq.s32.totalorder %v147_v27, %v2508_v3  ;;  %v152_v36 = vld [vmem:[%s6029_s0 + $0x1a0] sm:$0xff]  ;;  %v153_v37 = vld [vmem:[%s6029_s0 + $0x1a8] sm:$0xff]  ;;  %v1298_v38 = vsel %vm722_vm15, 1.0, %v2480_v10  ;;  %v1299_v39 = vsel %vm723_vm1, 1.0, %v2480_v10  ;;  %vm726_vm4 = vcmp.eq.s32.totalorder %v148_v28, %v2508_v3 }
  0x1f   : > { %1859 = vst [vmem:[%s2575_s19 + $0xe0] sm:$0xff] %v1282_v5  ;;  %1860 = vst [vmem:[%s2575_s19 + $0xe8] sm:$0xff] %v1283_v6  ;;  %v1300_v40 = vsel %vm724_vm2, 1.0, %v2480_v10  ;;  %v1301_v41 = vsel %vm725_vm3, 1.0, %v2480_v10  ;;  %v154_v42 = vld [vmem:[%s6029_s0 + $0x1b0] sm:$0xff]  ;;  %v155_v43 = vld [vmem:[%s6029_s0 + $0x1b8] sm:$0xff]  ;;  %vm727_vm5 = vcmp.eq.s32.totalorder %v149_v29, %v2508_v3  ;;  %vm728_vm6 = vcmp.eq.s32.totalorder %v150_v34, %v2508_v3 }
  0x20   : > { %1861 = vst [vmem:[%s2575_s19 + $0xf0] sm:$0xff] %v1284_v7  ;;  %1862 = vst [vmem:[%s2575_s19 + $0xf8] sm:$0xff] %v1285_v8  ;;  %vm729_vm7 = vcmp.eq.s32.totalorder %v151_v35, %v2508_v3  ;;  %v156_v44 = vld [vmem:[%s6029_s0 + $0x1c0] sm:$0xff]  ;;  %v157_v45 = vld [vmem:[%s6029_s0 + $0x1c8] sm:$0xff]  ;;  %v1302_v46 = vsel %vm726_vm4, 1.0, %v2480_v10  ;;  %v1303_v47 = vsel %vm727_vm5, 1.0, %v2480_v10  ;;  %vm730_vm8 = vcmp.eq.s32.totalorder %v152_v36, %v2508_v3 }
  0x21   : > { %1863 = vst [vmem:[%s2575_s19 + $0x100] sm:$0xff] %v1286_v14  ;;  %1864 = vst [vmem:[%s2575_s19 + $0x108] sm:$0xff] %v1287_v15  ;;  %v1304_v48 = vsel %vm728_vm6, 1.0, %v2480_v10  ;;  %v1305_v49 = vsel %vm729_vm7, 1.0, %v2480_v10  ;;  %v158_v50 = vld [vmem:[%s6029_s0 + $0x1d0] sm:$0xff]  ;;  %v159_v51 = vld [vmem:[%s6029_s0 + $0x1d8] sm:$0xff]  ;;  %vm731_vm9 = vcmp.eq.s32.totalorder %v153_v37, %v2508_v3  ;;  %vm732_vm10 = vcmp.eq.s32.totalorder %v154_v42, %v2508_v3 }
  0x22   : > { %1865 = vst [vmem:[%s2575_s19 + $0x110] sm:$0xff] %v1288_v16  ;;  %1866 = vst.msk [vmem:[%s2575_s19 + $0x118] sm:$0xff] %vm1838_vm0, %v1289_v17  ;;  %vm733_vm11 = vcmp.eq.s32.totalorder %v155_v43, %v2508_v3  ;;  %v160_v52 = vld [vmem:[%s6029_s0 + $0x1e0] sm:$0xff]  ;;  %v161_v53 = vld [vmem:[%s6029_s0 + $0x1e8] sm:$0xff]  ;;  %v1306_v54 = vsel %vm730_vm8, 1.0, %v2480_v10  ;;  %v1307_v55 = vsel %vm731_vm9, 1.0, %v2480_v10  ;;  %vm734_vm12 = vcmp.eq.s32.totalorder %v156_v44, %v2508_v3 }
  0x23   : > { %1867 = vst [vmem:[%s2575_s19 + $0x120] sm:$0xff] %v1290_v22  ;;  %1868 = vst [vmem:[%s2575_s19 + $0x128] sm:$0xff] %v1291_v23  ;;  %v1308_v56 = vsel %vm732_vm10, 1.0, %v2480_v10  ;;  %v1309_v57 = vsel %vm733_vm11, 1.0, %v2480_v10  ;;  %v162_v58 = vld [vmem:[%s6029_s0 + $0x1f0] sm:$0xff]  ;;  %v163_v59 = vld [vmem:[%s6029_s0 + $0x1f8] sm:$0xff]  ;;  %vm735_vm13 = vcmp.eq.s32.totalorder %v157_v45, %v2508_v3  ;;  %vm736_vm14 = vcmp.eq.s32.totalorder %v158_v50, %v2508_v3 }
  0x24   : > { %1869 = vst [vmem:[%s2575_s19 + $0x130] sm:$0xff] %v1292_v24  ;;  %1870 = vst [vmem:[%s2575_s19 + $0x138] sm:$0xff] %v1293_v25  ;;  %vm737_vm15 = vcmp.eq.s32.totalorder %v159_v51, %v2508_v3  ;;  %v164_v60 = vld [vmem:[%s6029_s0 + $0x200] sm:$0xff]  ;;  %v165_v61 = vld [vmem:[%s6029_s0 + $0x208] sm:$0xff]  ;;  %v1310_v62 = vsel %vm734_vm12, 1.0, %v2480_v10  ;;  %v1311_v63 = vsel %vm735_vm13, 1.0, %v2480_v10  ;;  %vm738_vm1 = vcmp.eq.s32.totalorder %v160_v52, %v2508_v3 }
  0x25   : > { %1871 = vst [vmem:[%s2575_s19 + $0x140] sm:$0xff] %v1294_v30  ;;  %1872 = vst [vmem:[%s2575_s19 + $0x148] sm:$0xff] %v1295_v31  ;;  %v1312_v0 = vsel %vm736_vm14, 1.0, %v2480_v10  ;;  %v1313_v1 = vsel %vm737_vm15, 1.0, %v2480_v10  ;;  %v166_v2 = vld [vmem:[%s6029_s0 + $0x210] sm:$0xff]  ;;  %v167_v4 = vld [vmem:[%s6029_s0 + $0x218] sm:$0xff]  ;;  %vm739_vm2 = vcmp.eq.s32.totalorder %v161_v53, %v2508_v3  ;;  %vm740_vm3 = vcmp.eq.s32.totalorder %v162_v58, %v2508_v3 }
  0x26   : > { %1873 = vst [vmem:[%s2575_s19 + $0x150] sm:$0xff] %v1296_v32  ;;  %1874 = vst [vmem:[%s2575_s19 + $0x158] sm:$0xff] %v1297_v33  ;;  %vm741_vm4 = vcmp.eq.s32.totalorder %v163_v59, %v2508_v3  ;;  %v168_v5 = vld [vmem:[%s6029_s0 + $0x220] sm:$0xff]  ;;  %v169_v6 = vld [vmem:[%s6029_s0 + $0x228] sm:$0xff]  ;;  %v1314_v7 = vsel %vm738_vm1, 1.0, %v2480_v10  ;;  %v1315_v8 = vsel %vm739_vm2, 1.0, %v2480_v10  ;;  %vm742_vm5 = vcmp.eq.s32.totalorder %v164_v60, %v2508_v3 }
  0x27   : > { %1875 = vst.msk [vmem:[%s2575_s19 + $0x160] sm:$0xff] %vm1838_vm0, %v1298_v38  ;;  %1876 = vst [vmem:[%s2575_s19 + $0x168] sm:$0xff] %v1299_v39  ;;  %v1316_v9 = vsel %vm740_vm3, 1.0, %v2480_v10  ;;  %v1317_v11 = vsel %vm741_vm4, 1.0, %v2480_v10  ;;  %v170_v12 = vld [vmem:[%s6029_s0 + $0x230] sm:$0xff]  ;;  %v171_v13 = vld [vmem:[%s6029_s0 + $0x238] sm:$0xff]  ;;  %vm743_vm6 = vcmp.eq.s32.totalorder %v165_v61, %v2508_v3  ;;  %vm744_vm7 = vcmp.eq.s32.totalorder %v166_v2, %v2508_v3 }
  0x28   : > { %1877 = vst [vmem:[%s2575_s19 + $0x170] sm:$0xff] %v1300_v40  ;;  %1878 = vst [vmem:[%s2575_s19 + $0x178] sm:$0xff] %v1301_v41  ;;  %vm745_vm8 = vcmp.eq.s32.totalorder %v167_v4, %v2508_v3  ;;  %v172_v14 = vld [vmem:[%s6029_s0 + $0x240] sm:$0xff]  ;;  %v173_v15 = vld [vmem:[%s6029_s0 + $0x248] sm:$0xff]  ;;  %v1318_v16 = vsel %vm742_vm5, 1.0, %v2480_v10  ;;  %v1319_v17 = vsel %vm743_vm6, 1.0, %v2480_v10  ;;  %vm746_vm9 = vcmp.eq.s32.totalorder %v168_v5, %v2508_v3 }
  0x29   : > { %1879 = vst [vmem:[%s2575_s19 + $0x180] sm:$0xff] %v1302_v46  ;;  %1880 = vst [vmem:[%s2575_s19 + $0x188] sm:$0xff] %v1303_v47  ;;  %v1320_v18 = vsel %vm744_vm7, 1.0, %v2480_v10  ;;  %v1321_v19 = vsel %vm745_vm8, 1.0, %v2480_v10  ;;  %v174_v20 = vld [vmem:[%s6029_s0 + $0x250] sm:$0xff]  ;;  %v175_v21 = vld [vmem:[%s6029_s0 + $0x258] sm:$0xff]  ;;  %vm747_vm10 = vcmp.eq.s32.totalorder %v169_v6, %v2508_v3  ;;  %vm748_vm11 = vcmp.eq.s32.totalorder %v170_v12, %v2508_v3 }
  0x2a   : > { %1881 = vst [vmem:[%s2575_s19 + $0x190] sm:$0xff] %v1304_v48  ;;  %1882 = vst [vmem:[%s2575_s19 + $0x198] sm:$0xff] %v1305_v49  ;;  %vm749_vm12 = vcmp.eq.s32.totalorder %v171_v13, %v2508_v3  ;;  %v176_v22 = vld [vmem:[%s6029_s0 + $0x260] sm:$0xff]  ;;  %v177_v23 = vld [vmem:[%s6029_s0 + $0x268] sm:$0xff]  ;;  %v1322_v24 = vsel %vm746_vm9, 1.0, %v2480_v10  ;;  %v1323_v25 = vsel %vm747_vm10, 1.0, %v2480_v10  ;;  %vm750_vm13 = vcmp.eq.s32.totalorder %v172_v14, %v2508_v3 }
  0x2b   : > { %1883 = vst [vmem:[%s2575_s19 + $0x1a0] sm:$0xff] %v1306_v54  ;;  %1884 = vst.msk [vmem:[%s2575_s19 + $0x1a8] sm:$0xff] %vm1838_vm0, %v1307_v55  ;;  %v1324_v26 = vsel %vm748_vm11, 1.0, %v2480_v10  ;;  %v1325_v27 = vsel %vm749_vm12, 1.0, %v2480_v10  ;;  %v178_v28 = vld [vmem:[%s6029_s0 + $0x270] sm:$0xff]  ;;  %v179_v29 = vld [vmem:[%s6029_s0 + $0x278] sm:$0xff]  ;;  %vm751_vm14 = vcmp.eq.s32.totalorder %v173_v15, %v2508_v3  ;;  %vm752_vm15 = vcmp.eq.s32.totalorder %v174_v20, %v2508_v3 }
  0x2c   : > { %1885 = vst [vmem:[%s2575_s19 + $0x1b0] sm:$0xff] %v1308_v56  ;;  %1886 = vst [vmem:[%s2575_s19 + $0x1b8] sm:$0xff] %v1309_v57  ;;  %vm753_vm1 = vcmp.eq.s32.totalorder %v175_v21, %v2508_v3  ;;  %v180_v30 = vld [vmem:[%s6029_s0 + $0x280] sm:$0xff]  ;;  %v181_v31 = vld [vmem:[%s6029_s0 + $0x288] sm:$0xff]  ;;  %v1326_v32 = vsel %vm750_vm13, 1.0, %v2480_v10  ;;  %v1327_v33 = vsel %vm751_vm14, 1.0, %v2480_v10  ;;  %vm754_vm2 = vcmp.eq.s32.totalorder %v176_v22, %v2508_v3 }
  0x2d   : > { %1887 = vst [vmem:[%s2575_s19 + $0x1c0] sm:$0xff] %v1310_v62  ;;  %1888 = vst [vmem:[%s2575_s19 + $0x1c8] sm:$0xff] %v1311_v63  ;;  %v1328_v34 = vsel %vm752_vm15, 1.0, %v2480_v10  ;;  %v1329_v35 = vsel %vm753_vm1, 1.0, %v2480_v10  ;;  %v182_v36 = vld [vmem:[%s6029_s0 + $0x290] sm:$0xff]  ;;  %v183_v37 = vld [vmem:[%s6029_s0 + $0x298] sm:$0xff]  ;;  %vm755_vm3 = vcmp.eq.s32.totalorder %v177_v23, %v2508_v3  ;;  %vm756_vm4 = vcmp.eq.s32.totalorder %v178_v28, %v2508_v3 }
  0x2e   : > { %1889 = vst [vmem:[%s2575_s19 + $0x1d0] sm:$0xff] %v1312_v0  ;;  %1890 = vst [vmem:[%s2575_s19 + $0x1d8] sm:$0xff] %v1313_v1  ;;  %vm757_vm5 = vcmp.eq.s32.totalorder %v179_v29, %v2508_v3  ;;  %v184_v38 = vld [vmem:[%s6029_s0 + $0x2a0] sm:$0xff]  ;;  %v185_v39 = vld [vmem:[%s6029_s0 + $0x2a8] sm:$0xff]  ;;  %v1330_v40 = vsel %vm754_vm2, 1.0, %v2480_v10  ;;  %v1331_v41 = vsel %vm755_vm3, 1.0, %v2480_v10  ;;  %vm758_vm6 = vcmp.eq.s32.totalorder %v180_v30, %v2508_v3 }
  0x2f   : > { %1891 = vst [vmem:[%s2575_s19 + $0x1e0] sm:$0xff] %v1314_v7  ;;  %1892 = vst [vmem:[%s2575_s19 + $0x1e8] sm:$0xff] %v1315_v8  ;;  %v1332_v42 = vsel %vm756_vm4, 1.0, %v2480_v10  ;;  %v1333_v43 = vsel %vm757_vm5, 1.0, %v2480_v10  ;;  %v186_v44 = vld [vmem:[%s6029_s0 + $0x2b0] sm:$0xff]  ;;  %v187_v45 = vld [vmem:[%s6029_s0 + $0x2b8] sm:$0xff]  ;;  %vm759_vm7 = vcmp.eq.s32.totalorder %v181_v31, %v2508_v3  ;;  %vm760_vm8 = vcmp.eq.s32.totalorder %v182_v36, %v2508_v3 }
  0x30   : > { %1893 = vst.msk [vmem:[%s2575_s19 + $0x1f0] sm:$0xff] %vm1838_vm0, %v1316_v9  ;;  %1894 = vst [vmem:[%s2575_s19 + $0x1f8] sm:$0xff] %v1317_v11  ;;  %vm761_vm9 = vcmp.eq.s32.totalorder %v183_v37, %v2508_v3  ;;  %v188_v46 = vld [vmem:[%s6029_s0 + $0x2c0] sm:$0xff]  ;;  %v189_v47 = vld [vmem:[%s6029_s0 + $0x2c8] sm:$0xff]  ;;  %v1334_v48 = vsel %vm758_vm6, 1.0, %v2480_v10  ;;  %v1335_v49 = vsel %vm759_vm7, 1.0, %v2480_v10  ;;  %vm762_vm10 = vcmp.eq.s32.totalorder %v184_v38, %v2508_v3 }
  0x31   : > { %1895 = vst [vmem:[%s2575_s19 + $0x200] sm:$0xff] %v1318_v16  ;;  %1896 = vst [vmem:[%s2575_s19 + $0x208] sm:$0xff] %v1319_v17  ;;  %v1336_v50 = vsel %vm760_vm8, 1.0, %v2480_v10  ;;  %v1337_v51 = vsel %vm761_vm9, 1.0, %v2480_v10  ;;  %v190_v52 = vld [vmem:[%s6029_s0 + $0x2d0] sm:$0xff]  ;;  %v191_v53 = vld [vmem:[%s6029_s0 + $0x2d8] sm:$0xff]  ;;  %vm763_vm11 = vcmp.eq.s32.totalorder %v185_v39, %v2508_v3  ;;  %vm764_vm12 = vcmp.eq.s32.totalorder %v186_v44, %v2508_v3 }
  0x32   : > { %1897 = vst [vmem:[%s2575_s19 + $0x210] sm:$0xff] %v1320_v18  ;;  %1898 = vst [vmem:[%s2575_s19 + $0x218] sm:$0xff] %v1321_v19  ;;  %vm765_vm13 = vcmp.eq.s32.totalorder %v187_v45, %v2508_v3  ;;  %v192_v54 = vld [vmem:[%s6029_s0 + $0x2e0] sm:$0xff]  ;;  %v193_v55 = vld [vmem:[%s6029_s0 + $0x2e8] sm:$0xff]  ;;  %v1338_v56 = vsel %vm762_vm10, 1.0, %v2480_v10  ;;  %v1339_v57 = vsel %vm763_vm11, 1.0, %v2480_v10  ;;  %vm766_vm14 = vcmp.eq.s32.totalorder %v188_v46, %v2508_v3 }
  0x33   : > { %1899 = vst [vmem:[%s2575_s19 + $0x220] sm:$0xff] %v1322_v24  ;;  %1900 = vst [vmem:[%s2575_s19 + $0x228] sm:$0xff] %v1323_v25  ;;  %v1340_v58 = vsel %vm764_vm12, 1.0, %v2480_v10  ;;  %v1341_v59 = vsel %vm765_vm13, 1.0, %v2480_v10  ;;  %v194_v60 = vld [vmem:[%s6029_s0 + $0x2f0] sm:$0xff]  ;;  %v195_v61 = vld [vmem:[%s6029_s0 + $0x2f8] sm:$0xff]  ;;  %vm767_vm15 = vcmp.eq.s32.totalorder %v189_v47, %v2508_v3  ;;  %vm768_vm1 = vcmp.eq.s32.totalorder %v190_v52, %v2508_v3 }
  0x34   : > { %1901 = vst [vmem:[%s2575_s19 + $0x230] sm:$0xff] %v1324_v26  ;;  %1902 = vst.msk [vmem:[%s2575_s19 + $0x238] sm:$0xff] %vm1838_vm0, %v1325_v27  ;;  %vm769_vm2 = vcmp.eq.s32.totalorder %v191_v53, %v2508_v3  ;;  %v196_v62 = vld [vmem:[%s6029_s0 + $0x300] sm:$0xff]  ;;  %v197_v63 = vld [vmem:[%s6029_s0 + $0x308] sm:$0xff]  ;;  %v1342_v0 = vsel %vm766_vm14, 1.0, %v2480_v10  ;;  %v1343_v1 = vsel %vm767_vm15, 1.0, %v2480_v10  ;;  %vm770_vm3 = vcmp.eq.s32.totalorder %v192_v54, %v2508_v3 }
  0x35   : > { %1903 = vst [vmem:[%s2575_s19 + $0x240] sm:$0xff] %v1326_v32  ;;  %1904 = vst [vmem:[%s2575_s19 + $0x248] sm:$0xff] %v1327_v33  ;;  %v1344_v2 = vsel %vm768_vm1, 1.0, %v2480_v10  ;;  %v1345_v4 = vsel %vm769_vm2, 1.0, %v2480_v10  ;;  %v198_v5 = vld [vmem:[%s6029_s0 + $0x310] sm:$0xff]  ;;  %v199_v6 = vld [vmem:[%s6029_s0 + $0x318] sm:$0xff]  ;;  %vm771_vm4 = vcmp.eq.s32.totalorder %v193_v55, %v2508_v3  ;;  %vm772_vm5 = vcmp.eq.s32.totalorder %v194_v60, %v2508_v3 }
  0x36   : > { %1905 = vst [vmem:[%s2575_s19 + $0x250] sm:$0xff] %v1328_v34  ;;  %1906 = vst [vmem:[%s2575_s19 + $0x258] sm:$0xff] %v1329_v35  ;;  %vm773_vm6 = vcmp.eq.s32.totalorder %v195_v61, %v2508_v3  ;;  %v200_v7 = vld [vmem:[%s6029_s0 + $0x320] sm:$0xff]  ;;  %v201_v8 = vld [vmem:[%s6029_s0 + $0x328] sm:$0xff]  ;;  %v1346_v9 = vsel %vm770_vm3, 1.0, %v2480_v10  ;;  %v1347_v11 = vsel %vm771_vm4, 1.0, %v2480_v10  ;;  %vm774_vm7 = vcmp.eq.s32.totalorder %v196_v62, %v2508_v3 }
  0x37   : > { %1907 = vst [vmem:[%s2575_s19 + $0x260] sm:$0xff] %v1330_v40  ;;  %1908 = vst [vmem:[%s2575_s19 + $0x268] sm:$0xff] %v1331_v41  ;;  %v1348_v12 = vsel %vm772_vm5, 1.0, %v2480_v10  ;;  %v1349_v13 = vsel %vm773_vm6, 1.0, %v2480_v10  ;;  %v202_v14 = vld [vmem:[%s6029_s0 + $0x330] sm:$0xff]  ;;  %v203_v15 = vld [vmem:[%s6029_s0 + $0x338] sm:$0xff]  ;;  %vm775_vm8 = vcmp.eq.s32.totalorder %v197_v63, %v2508_v3  ;;  %vm776_vm9 = vcmp.eq.s32.totalorder %v198_v5, %v2508_v3 }
  0x38   : > { %1909 = vst [vmem:[%s2575_s19 + $0x270] sm:$0xff] %v1332_v42  ;;  %1910 = vst [vmem:[%s2575_s19 + $0x278] sm:$0xff] %v1333_v43  ;;  %vm777_vm10 = vcmp.eq.s32.totalorder %v199_v6, %v2508_v3  ;;  %v204_v16 = vld [vmem:[%s6029_s0 + $0x340] sm:$0xff]  ;;  %v205_v17 = vld [vmem:[%s6029_s0 + $0x348] sm:$0xff]  ;;  %v1350_v18 = vsel %vm774_vm7, 1.0, %v2480_v10  ;;  %v1351_v19 = vsel %vm775_vm8, 1.0, %v2480_v10  ;;  %vm778_vm11 = vcmp.eq.s32.totalorder %v200_v7, %v2508_v3 }
  0x39   : > { %1911 = vst.msk [vmem:[%s2575_s19 + $0x280] sm:$0xff] %vm1838_vm0, %v1334_v48  ;;  %1912 = vst [vmem:[%s2575_s19 + $0x288] sm:$0xff] %v1335_v49  ;;  %v1352_v20 = vsel %vm776_vm9, 1.0, %v2480_v10  ;;  %v1353_v21 = vsel %vm777_vm10, 1.0, %v2480_v10  ;;  %v206_v22 = vld [vmem:[%s6029_s0 + $0x350] sm:$0xff]  ;;  %v207_v23 = vld [vmem:[%s6029_s0 + $0x358] sm:$0xff]  ;;  %vm779_vm12 = vcmp.eq.s32.totalorder %v201_v8, %v2508_v3  ;;  %vm780_vm13 = vcmp.eq.s32.totalorder %v202_v14, %v2508_v3 }
  0x3a   : > { %1913 = vst [vmem:[%s2575_s19 + $0x290] sm:$0xff] %v1336_v50  ;;  %1914 = vst [vmem:[%s2575_s19 + $0x298] sm:$0xff] %v1337_v51  ;;  %vm781_vm14 = vcmp.eq.s32.totalorder %v203_v15, %v2508_v3  ;;  %v208_v24 = vld [vmem:[%s6029_s0 + $0x360] sm:$0xff]  ;;  %v209_v25 = vld [vmem:[%s6029_s0 + $0x368] sm:$0xff]  ;;  %v1354_v26 = vsel %vm778_vm11, 1.0, %v2480_v10  ;;  %v1355_v27 = vsel %vm779_vm12, 1.0, %v2480_v10  ;;  %vm782_vm15 = vcmp.eq.s32.totalorder %v204_v16, %v2508_v3 }
  0x3b   : > { %1915 = vst [vmem:[%s2575_s19 + $0x2a0] sm:$0xff] %v1338_v56  ;;  %1916 = vst [vmem:[%s2575_s19 + $0x2a8] sm:$0xff] %v1339_v57  ;;  %v1356_v28 = vsel %vm780_vm13, 1.0, %v2480_v10  ;;  %v1357_v29 = vsel %vm781_vm14, 1.0, %v2480_v10  ;;  %v210_v30 = vld [vmem:[%s6029_s0 + $0x370] sm:$0xff]  ;;  %v211_v31 = vld [vmem:[%s6029_s0 + $0x378] sm:$0xff]  ;;  %vm783_vm1 = vcmp.eq.s32.totalorder %v205_v17, %v2508_v3  ;;  %vm784_vm2 = vcmp.eq.s32.totalorder %v206_v22, %v2508_v3 }
  0x3c   : > { %1917 = vst [vmem:[%s2575_s19 + $0x2b0] sm:$0xff] %v1340_v58  ;;  %1918 = vst [vmem:[%s2575_s19 + $0x2b8] sm:$0xff] %v1341_v59  ;;  %vm785_vm3 = vcmp.eq.s32.totalorder %v207_v23, %v2508_v3  ;;  %v212_v32 = vld [vmem:[%s6029_s0 + $0x380] sm:$0xff]  ;;  %v213_v33 = vld [vmem:[%s6029_s0 + $0x388] sm:$0xff]  ;;  %v1358_v34 = vsel %vm782_vm15, 1.0, %v2480_v10  ;;  %v1359_v35 = vsel %vm783_vm1, 1.0, %v2480_v10  ;;  %vm786_vm4 = vcmp.eq.s32.totalorder %v208_v24, %v2508_v3 }
  0x3d   : > { %1919 = vst [vmem:[%s2575_s19 + $0x2c0] sm:$0xff] %v1342_v0  ;;  %1920 = vst.msk [vmem:[%s2575_s19 + $0x2c8] sm:$0xff] %vm1838_vm0, %v1343_v1  ;;  %v1360_v36 = vsel %vm784_vm2, 1.0, %v2480_v10  ;;  %v1361_v37 = vsel %vm785_vm3, 1.0, %v2480_v10  ;;  %v214_v38 = vld [vmem:[%s6029_s0 + $0x390] sm:$0xff]  ;;  %v215_v39 = vld [vmem:[%s6029_s0 + $0x398] sm:$0xff]  ;;  %vm787_vm5 = vcmp.eq.s32.totalorder %v209_v25, %v2508_v3  ;;  %vm788_vm6 = vcmp.eq.s32.totalorder %v210_v30, %v2508_v3 }
  0x3e   : > { %1921 = vst [vmem:[%s2575_s19 + $0x2d0] sm:$0xff] %v1344_v2  ;;  %1922 = vst [vmem:[%s2575_s19 + $0x2d8] sm:$0xff] %v1345_v4  ;;  %vm789_vm7 = vcmp.eq.s32.totalorder %v211_v31, %v2508_v3  ;;  %v216_v40 = vld [vmem:[%s6029_s0 + $0x3a0] sm:$0xff]  ;;  %v217_v41 = vld [vmem:[%s6029_s0 + $0x3a8] sm:$0xff]  ;;  %v1362_v42 = vsel %vm786_vm4, 1.0, %v2480_v10  ;;  %v1363_v43 = vsel %vm787_vm5, 1.0, %v2480_v10  ;;  %vm790_vm8 = vcmp.eq.s32.totalorder %v212_v32, %v2508_v3 }
  0x3f   : > { %1923 = vst [vmem:[%s2575_s19 + $0x2e0] sm:$0xff] %v1346_v9  ;;  %1924 = vst [vmem:[%s2575_s19 + $0x2e8] sm:$0xff] %v1347_v11  ;;  %v1364_v44 = vsel %vm788_vm6, 1.0, %v2480_v10  ;;  %v1365_v45 = vsel %vm789_vm7, 1.0, %v2480_v10  ;;  %v218_v46 = vld [vmem:[%s6029_s0 + $0x3b0] sm:$0xff]  ;;  %v219_v47 = vld [vmem:[%s6029_s0 + $0x3b8] sm:$0xff]  ;;  %vm791_vm9 = vcmp.eq.s32.totalorder %v213_v33, %v2508_v3  ;;  %vm792_vm10 = vcmp.eq.s32.totalorder %v214_v38, %v2508_v3 }
  0x40   : > { %1925 = vst [vmem:[%s2575_s19 + $0x2f0] sm:$0xff] %v1348_v12  ;;  %1926 = vst [vmem:[%s2575_s19 + $0x2f8] sm:$0xff] %v1349_v13  ;;  %vm793_vm11 = vcmp.eq.s32.totalorder %v215_v39, %v2508_v3  ;;  %v220_v48 = vld [vmem:[%s6029_s0 + $0x3c0] sm:$0xff]  ;;  %v221_v49 = vld [vmem:[%s6029_s0 + $0x3c8] sm:$0xff]  ;;  %v1366_v50 = vsel %vm790_vm8, 1.0, %v2480_v10  ;;  %v1367_v51 = vsel %vm791_vm9, 1.0, %v2480_v10  ;;  %vm794_vm12 = vcmp.eq.s32.totalorder %v216_v40, %v2508_v3 }
  0x41   : > { %1927 = vst [vmem:[%s2575_s19 + $0x300] sm:$0xff] %v1350_v18  ;;  %1928 = vst [vmem:[%s2575_s19 + $0x308] sm:$0xff] %v1351_v19  ;;  %v1368_v52 = vsel %vm792_vm10, 1.0, %v2480_v10  ;;  %v1369_v53 = vsel %vm793_vm11, 1.0, %v2480_v10  ;;  %v222_v54 = vld [vmem:[%s6029_s0 + $0x3d0] sm:$0xff]  ;;  %v223_v55 = vld [vmem:[%s6029_s0 + $0x3d8] sm:$0xff]  ;;  %vm795_vm13 = vcmp.eq.s32.totalorder %v217_v41, %v2508_v3  ;;  %vm796_vm14 = vcmp.eq.s32.totalorder %v218_v46, %v2508_v3 }
  0x42   : > { %1929 = vst.msk [vmem:[%s2575_s19 + $0x310] sm:$0xff] %vm1838_vm0, %v1352_v20  ;;  %1930 = vst [vmem:[%s2575_s19 + $0x318] sm:$0xff] %v1353_v21  ;;  %vm797_vm15 = vcmp.eq.s32.totalorder %v219_v47, %v2508_v3  ;;  %v224_v56 = vld [vmem:[%s6029_s0 + $0x3e0] sm:$0xff]  ;;  %v225_v57 = vld [vmem:[%s6029_s0 + $0x3e8] sm:$0xff]  ;;  %v1370_v58 = vsel %vm794_vm12, 1.0, %v2480_v10  ;;  %v1371_v59 = vsel %vm795_vm13, 1.0, %v2480_v10  ;;  %vm798_vm1 = vcmp.eq.s32.totalorder %v220_v48, %v2508_v3 }
  0x43   : > { %1931 = vst [vmem:[%s2575_s19 + $0x320] sm:$0xff] %v1354_v26  ;;  %1932 = vst [vmem:[%s2575_s19 + $0x328] sm:$0xff] %v1355_v27  ;;  %v1372_v60 = vsel %vm796_vm14, 1.0, %v2480_v10  ;;  %v1373_v61 = vsel %vm797_vm15, 1.0, %v2480_v10  ;;  %v226_v62 = vld [vmem:[%s6029_s0 + $0x3f0] sm:$0xff]  ;;  %v227_v63 = vld [vmem:[%s6029_s0 + $0x3f8] sm:$0xff]  ;;  %vm799_vm2 = vcmp.eq.s32.totalorder %v221_v49, %v2508_v3  ;;  %vm800_vm3 = vcmp.eq.s32.totalorder %v222_v54, %v2508_v3 }
  0x44   : > { %1933 = vst [vmem:[%s2575_s19 + $0x330] sm:$0xff] %v1356_v28  ;;  %1934 = vst [vmem:[%s2575_s19 + $0x338] sm:$0xff] %v1357_v29  ;;  %vm801_vm4 = vcmp.eq.s32.totalorder %v223_v55, %v2508_v3  ;;  %v228_v0 = vld [vmem:[%s6029_s0 + $0x400] sm:$0xff]  ;;  %v229_v1 = vld [vmem:[%s6029_s0 + $0x408] sm:$0xff]  ;;  %v1374_v2 = vsel %vm798_vm1, 1.0, %v2480_v10  ;;  %v1375_v4 = vsel %vm799_vm2, 1.0, %v2480_v10  ;;  %vm802_vm5 = vcmp.eq.s32.totalorder %v224_v56, %v2508_v3 }
  0x45   : > { %1935 = vst [vmem:[%s2575_s19 + $0x340] sm:$0xff] %v1358_v34  ;;  %1936 = vst [vmem:[%s2575_s19 + $0x348] sm:$0xff] %v1359_v35  ;;  %v1376_v5 = vsel %vm800_vm3, 1.0, %v2480_v10  ;;  %v1377_v6 = vsel %vm801_vm4, 1.0, %v2480_v10  ;;  %v230_v7 = vld [vmem:[%s6029_s0 + $0x410] sm:$0xff]  ;;  %v231_v8 = vld [vmem:[%s6029_s0 + $0x418] sm:$0xff]  ;;  %vm803_vm6 = vcmp.eq.s32.totalorder %v225_v57, %v2508_v3  ;;  %vm804_vm7 = vcmp.eq.s32.totalorder %v226_v62, %v2508_v3 }
  0x46   : > { %1937 = vst [vmem:[%s2575_s19 + $0x350] sm:$0xff] %v1360_v36  ;;  %1938 = vst.msk [vmem:[%s2575_s19 + $0x358] sm:$0xff] %vm1838_vm0, %v1361_v37  ;;  %vm805_vm8 = vcmp.eq.s32.totalorder %v227_v63, %v2508_v3  ;;  %v232_v9 = vld [vmem:[%s6029_s0 + $0x420] sm:$0xff]  ;;  %v233_v11 = vld [vmem:[%s6029_s0 + $0x428] sm:$0xff]  ;;  %v1378_v12 = vsel %vm802_vm5, 1.0, %v2480_v10  ;;  %v1379_v13 = vsel %vm803_vm6, 1.0, %v2480_v10  ;;  %vm806_vm9 = vcmp.eq.s32.totalorder %v228_v0, %v2508_v3 }
  0x47   : > { %1939 = vst [vmem:[%s2575_s19 + $0x360] sm:$0xff] %v1362_v42  ;;  %1940 = vst [vmem:[%s2575_s19 + $0x368] sm:$0xff] %v1363_v43  ;;  %v1380_v14 = vsel %vm804_vm7, 1.0, %v2480_v10  ;;  %v1381_v15 = vsel %vm805_vm8, 1.0, %v2480_v10  ;;  %v234_v16 = vld [vmem:[%s6029_s0 + $0x430] sm:$0xff]  ;;  %v235_v17 = vld [vmem:[%s6029_s0 + $0x438] sm:$0xff]  ;;  %vm807_vm10 = vcmp.eq.s32.totalorder %v229_v1, %v2508_v3  ;;  %vm808_vm11 = vcmp.eq.s32.totalorder %v230_v7, %v2508_v3 }
  0x48   : > { %1941 = vst [vmem:[%s2575_s19 + $0x370] sm:$0xff] %v1364_v44  ;;  %1942 = vst [vmem:[%s2575_s19 + $0x378] sm:$0xff] %v1365_v45  ;;  %vm809_vm12 = vcmp.eq.s32.totalorder %v231_v8, %v2508_v3  ;;  %v236_v18 = vld [vmem:[%s6029_s0 + $0x440] sm:$0xff]  ;;  %v237_v19 = vld [vmem:[%s6029_s0 + $0x448] sm:$0xff]  ;;  %v1382_v20 = vsel %vm806_vm9, 1.0, %v2480_v10  ;;  %v1383_v21 = vsel %vm807_vm10, 1.0, %v2480_v10  ;;  %vm810_vm13 = vcmp.eq.s32.totalorder %v232_v9, %v2508_v3 }
  0x49   : > { %1943 = vst [vmem:[%s2575_s19 + $0x380] sm:$0xff] %v1366_v50  ;;  %1944 = vst [vmem:[%s2575_s19 + $0x388] sm:$0xff] %v1367_v51  ;;  %v1384_v22 = vsel %vm808_vm11, 1.0, %v2480_v10  ;;  %v1385_v23 = vsel %vm809_vm12, 1.0, %v2480_v10  ;;  %v238_v24 = vld [vmem:[%s6029_s0 + $0x450] sm:$0xff]  ;;  %v239_v25 = vld [vmem:[%s6029_s0 + $0x458] sm:$0xff]  ;;  %vm811_vm14 = vcmp.eq.s32.totalorder %v233_v11, %v2508_v3  ;;  %vm812_vm15 = vcmp.eq.s32.totalorder %v234_v16, %v2508_v3 }
  0x4a   : > { %1945 = vst [vmem:[%s2575_s19 + $0x390] sm:$0xff] %v1368_v52  ;;  %1946 = vst [vmem:[%s2575_s19 + $0x398] sm:$0xff] %v1369_v53  ;;  %vm813_vm1 = vcmp.eq.s32.totalorder %v235_v17, %v2508_v3  ;;  %v240_v26 = vld [vmem:[%s6029_s0 + $0x460] sm:$0xff]  ;;  %v241_v27 = vld [vmem:[%s6029_s0 + $0x468] sm:$0xff]  ;;  %v1386_v28 = vsel %vm810_vm13, 1.0, %v2480_v10  ;;  %v1387_v29 = vsel %vm811_vm14, 1.0, %v2480_v10  ;;  %vm814_vm2 = vcmp.eq.s32.totalorder %v236_v18, %v2508_v3 }
  0x4b   : > { %1947 = vst.msk [vmem:[%s2575_s19 + $0x3a0] sm:$0xff] %vm1838_vm0, %v1370_v58  ;;  %1948 = vst [vmem:[%s2575_s19 + $0x3a8] sm:$0xff] %v1371_v59  ;;  %v1388_v30 = vsel %vm812_vm15, 1.0, %v2480_v10  ;;  %v1389_v31 = vsel %vm813_vm1, 1.0, %v2480_v10  ;;  %v242_v32 = vld [vmem:[%s6029_s0 + $0x470] sm:$0xff]  ;;  %v243_v33 = vld [vmem:[%s6029_s0 + $0x478] sm:$0xff]  ;;  %vm815_vm3 = vcmp.eq.s32.totalorder %v237_v19, %v2508_v3  ;;  %vm816_vm4 = vcmp.eq.s32.totalorder %v238_v24, %v2508_v3 }
  0x4c   : > { %1949 = vst [vmem:[%s2575_s19 + $0x3b0] sm:$0xff] %v1372_v60  ;;  %1950 = vst [vmem:[%s2575_s19 + $0x3b8] sm:$0xff] %v1373_v61  ;;  %vm817_vm5 = vcmp.eq.s32.totalorder %v239_v25, %v2508_v3  ;;  %v244_v34 = vld [vmem:[%s6029_s0 + $0x480] sm:$0xff]  ;;  %v245_v35 = vld [vmem:[%s6029_s0 + $0x488] sm:$0xff]  ;;  %v1390_v36 = vsel %vm814_vm2, 1.0, %v2480_v10  ;;  %v1391_v37 = vsel %vm815_vm3, 1.0, %v2480_v10  ;;  %vm818_vm6 = vcmp.eq.s32.totalorder %v240_v26, %v2508_v3 }
  0x4d   : > { %1951 = vst [vmem:[%s2575_s19 + $0x3c0] sm:$0xff] %v1374_v2  ;;  %1952 = vst [vmem:[%s2575_s19 + $0x3c8] sm:$0xff] %v1375_v4  ;;  %v1392_v38 = vsel %vm816_vm4, 1.0, %v2480_v10  ;;  %v1393_v39 = vsel %vm817_vm5, 1.0, %v2480_v10  ;;  %v246_v40 = vld [vmem:[%s6029_s0 + $0x490] sm:$0xff]  ;;  %v247_v41 = vld [vmem:[%s6029_s0 + $0x498] sm:$0xff]  ;;  %vm819_vm7 = vcmp.eq.s32.totalorder %v241_v27, %v2508_v3  ;;  %vm820_vm8 = vcmp.eq.s32.totalorder %v242_v32, %v2508_v3 }
  0x4e   : > { %1953 = vst [vmem:[%s2575_s19 + $0x3d0] sm:$0xff] %v1376_v5  ;;  %1954 = vst [vmem:[%s2575_s19 + $0x3d8] sm:$0xff] %v1377_v6  ;;  %vm821_vm9 = vcmp.eq.s32.totalorder %v243_v33, %v2508_v3  ;;  %v248_v42 = vld [vmem:[%s6029_s0 + $0x4a0] sm:$0xff]  ;;  %v249_v43 = vld [vmem:[%s6029_s0 + $0x4a8] sm:$0xff]  ;;  %v1394_v44 = vsel %vm818_vm6, 1.0, %v2480_v10  ;;  %v1395_v45 = vsel %vm819_vm7, 1.0, %v2480_v10  ;;  %vm822_vm10 = vcmp.eq.s32.totalorder %v244_v34, %v2508_v3 }
  0x4f   : > { %1955 = vst [vmem:[%s2575_s19 + $0x3e0] sm:$0xff] %v1378_v12  ;;  %1956 = vst.msk [vmem:[%s2575_s19 + $0x3e8] sm:$0xff] %vm1838_vm0, %v1379_v13  ;;  %v1396_v46 = vsel %vm820_vm8, 1.0, %v2480_v10  ;;  %v1397_v47 = vsel %vm821_vm9, 1.0, %v2480_v10  ;;  %v250_v48 = vld [vmem:[%s6029_s0 + $0x4b0] sm:$0xff]  ;;  %v251_v49 = vld [vmem:[%s6029_s0 + $0x4b8] sm:$0xff]  ;;  %vm823_vm11 = vcmp.eq.s32.totalorder %v245_v35, %v2508_v3  ;;  %vm824_vm12 = vcmp.eq.s32.totalorder %v246_v40, %v2508_v3 }
  0x50   : > { %1957 = vst [vmem:[%s2575_s19 + $0x3f0] sm:$0xff] %v1380_v14  ;;  %1958 = vst [vmem:[%s2575_s19 + $0x3f8] sm:$0xff] %v1381_v15  ;;  %vm825_vm13 = vcmp.eq.s32.totalorder %v247_v41, %v2508_v3  ;;  %v252_v50 = vld [vmem:[%s6029_s0 + $0x4c0] sm:$0xff]  ;;  %v253_v51 = vld [vmem:[%s6029_s0 + $0x4c8] sm:$0xff]  ;;  %v1398_v52 = vsel %vm822_vm10, 1.0, %v2480_v10  ;;  %v1399_v53 = vsel %vm823_vm11, 1.0, %v2480_v10  ;;  %vm826_vm14 = vcmp.eq.s32.totalorder %v248_v42, %v2508_v3 }
  0x51   : > { %1959 = vst [vmem:[%s2575_s19 + $0x400] sm:$0xff] %v1382_v20  ;;  %1960 = vst [vmem:[%s2575_s19 + $0x408] sm:$0xff] %v1383_v21  ;;  %v1400_v54 = vsel %vm824_vm12, 1.0, %v2480_v10  ;;  %v1401_v55 = vsel %vm825_vm13, 1.0, %v2480_v10  ;;  %v254_v56 = vld [vmem:[%s6029_s0 + $0x4d0] sm:$0xff]  ;;  %v255_v57 = vld [vmem:[%s6029_s0 + $0x4d8] sm:$0xff]  ;;  %vm827_vm15 = vcmp.eq.s32.totalorder %v249_v43, %v2508_v3  ;;  %vm828_vm1 = vcmp.eq.s32.totalorder %v250_v48, %v2508_v3 }
  0x52   : > { %1961 = vst [vmem:[%s2575_s19 + $0x410] sm:$0xff] %v1384_v22  ;;  %1962 = vst [vmem:[%s2575_s19 + $0x418] sm:$0xff] %v1385_v23  ;;  %vm829_vm2 = vcmp.eq.s32.totalorder %v251_v49, %v2508_v3  ;;  %v256_v58 = vld [vmem:[%s6029_s0 + $0x4e0] sm:$0xff]  ;;  %v257_v59 = vld [vmem:[%s6029_s0 + $0x4e8] sm:$0xff]  ;;  %v1402_v60 = vsel %vm826_vm14, 1.0, %v2480_v10  ;;  %v1403_v61 = vsel %vm827_vm15, 1.0, %v2480_v10  ;;  %vm830_vm3 = vcmp.eq.s32.totalorder %v252_v50, %v2508_v3 }
  0x53   : > { %1963 = vst [vmem:[%s2575_s19 + $0x420] sm:$0xff] %v1386_v28  ;;  %1964 = vst [vmem:[%s2575_s19 + $0x428] sm:$0xff] %v1387_v29  ;;  %v1404_v62 = vsel %vm828_vm1, 1.0, %v2480_v10  ;;  %v1405_v63 = vsel %vm829_vm2, 1.0, %v2480_v10  ;;  %v258_v0 = vld [vmem:[%s6029_s0 + $0x4f0] sm:$0xff]  ;;  %v259_v1 = vld [vmem:[%s6029_s0 + $0x4f8] sm:$0xff]  ;;  %vm831_vm4 = vcmp.eq.s32.totalorder %v253_v51, %v2508_v3  ;;  %vm832_vm5 = vcmp.eq.s32.totalorder %v254_v56, %v2508_v3 }
  0x54   : > { %1965 = vst.msk [vmem:[%s2575_s19 + $0x430] sm:$0xff] %vm1838_vm0, %v1388_v30  ;;  %1966 = vst [vmem:[%s2575_s19 + $0x438] sm:$0xff] %v1389_v31  ;;  %vm833_vm6 = vcmp.eq.s32.totalorder %v255_v57, %v2508_v3  ;;  %v260_v2 = vld [vmem:[%s6029_s0 + $0x500] sm:$0xff]  ;;  %v261_v4 = vld [vmem:[%s6029_s0 + $0x508] sm:$0xff]  ;;  %v1406_v5 = vsel %vm830_vm3, 1.0, %v2480_v10  ;;  %v1407_v6 = vsel %vm831_vm4, 1.0, %v2480_v10  ;;  %vm834_vm7 = vcmp.eq.s32.totalorder %v256_v58, %v2508_v3 }
  0x55   : > { %1967 = vst [vmem:[%s2575_s19 + $0x440] sm:$0xff] %v1390_v36  ;;  %1968 = vst [vmem:[%s2575_s19 + $0x448] sm:$0xff] %v1391_v37  ;;  %v1408_v7 = vsel %vm832_vm5, 1.0, %v2480_v10  ;;  %v1409_v8 = vsel %vm833_vm6, 1.0, %v2480_v10  ;;  %v262_v9 = vld [vmem:[%s6029_s0 + $0x510] sm:$0xff]  ;;  %v263_v11 = vld [vmem:[%s6029_s0 + $0x518] sm:$0xff]  ;;  %vm835_vm8 = vcmp.eq.s32.totalorder %v257_v59, %v2508_v3  ;;  %vm836_vm9 = vcmp.eq.s32.totalorder %v258_v0, %v2508_v3 }
  0x56   : > { %1969 = vst [vmem:[%s2575_s19 + $0x450] sm:$0xff] %v1392_v38  ;;  %1970 = vst [vmem:[%s2575_s19 + $0x458] sm:$0xff] %v1393_v39  ;;  %vm837_vm10 = vcmp.eq.s32.totalorder %v259_v1, %v2508_v3  ;;  %v264_v12 = vld [vmem:[%s6029_s0 + $0x520] sm:$0xff]  ;;  %v265_v13 = vld [vmem:[%s6029_s0 + $0x528] sm:$0xff]  ;;  %v1410_v14 = vsel %vm834_vm7, 1.0, %v2480_v10  ;;  %v1411_v15 = vsel %vm835_vm8, 1.0, %v2480_v10  ;;  %vm838_vm11 = vcmp.eq.s32.totalorder %v260_v2, %v2508_v3 }
  0x57   : > { %1971 = vst [vmem:[%s2575_s19 + $0x460] sm:$0xff] %v1394_v44  ;;  %1972 = vst [vmem:[%s2575_s19 + $0x468] sm:$0xff] %v1395_v45  ;;  %v1412_v16 = vsel %vm836_vm9, 1.0, %v2480_v10  ;;  %v1413_v17 = vsel %vm837_vm10, 1.0, %v2480_v10  ;;  %v266_v18 = vld [vmem:[%s6029_s0 + $0x530] sm:$0xff]  ;;  %v267_v19 = vld [vmem:[%s6029_s0 + $0x538] sm:$0xff]  ;;  %vm839_vm12 = vcmp.eq.s32.totalorder %v261_v4, %v2508_v3  ;;  %vm840_vm13 = vcmp.eq.s32.totalorder %v262_v9, %v2508_v3 }
  0x58   : > { %1973 = vst [vmem:[%s2575_s19 + $0x470] sm:$0xff] %v1396_v46  ;;  %1974 = vst.msk [vmem:[%s2575_s19 + $0x478] sm:$0xff] %vm1838_vm0, %v1397_v47  ;;  %vm841_vm14 = vcmp.eq.s32.totalorder %v263_v11, %v2508_v3  ;;  %v268_v20 = vld [vmem:[%s6029_s0 + $0x540] sm:$0xff]  ;;  %v269_v21 = vld [vmem:[%s6029_s0 + $0x548] sm:$0xff]  ;;  %v1414_v22 = vsel %vm838_vm11, 1.0, %v2480_v10  ;;  %v1415_v23 = vsel %vm839_vm12, 1.0, %v2480_v10  ;;  %vm842_vm15 = vcmp.eq.s32.totalorder %v264_v12, %v2508_v3 }
  0x59   : > { %1975 = vst [vmem:[%s2575_s19 + $0x480] sm:$0xff] %v1398_v52  ;;  %1976 = vst [vmem:[%s2575_s19 + $0x488] sm:$0xff] %v1399_v53  ;;  %v1416_v24 = vsel %vm840_vm13, 1.0, %v2480_v10  ;;  %v1417_v25 = vsel %vm841_vm14, 1.0, %v2480_v10  ;;  %v270_v26 = vld [vmem:[%s6029_s0 + $0x550] sm:$0xff]  ;;  %v271_v27 = vld [vmem:[%s6029_s0 + $0x558] sm:$0xff]  ;;  %vm843_vm1 = vcmp.eq.s32.totalorder %v265_v13, %v2508_v3  ;;  %vm844_vm2 = vcmp.eq.s32.totalorder %v266_v18, %v2508_v3 }
  0x5a   : > { %1977 = vst [vmem:[%s2575_s19 + $0x490] sm:$0xff] %v1400_v54  ;;  %1978 = vst [vmem:[%s2575_s19 + $0x498] sm:$0xff] %v1401_v55  ;;  %vm845_vm3 = vcmp.eq.s32.totalorder %v267_v19, %v2508_v3  ;;  %v272_v28 = vld [vmem:[%s6029_s0 + $0x560] sm:$0xff]  ;;  %v273_v29 = vld [vmem:[%s6029_s0 + $0x568] sm:$0xff]  ;;  %v1418_v30 = vsel %vm842_vm15, 1.0, %v2480_v10  ;;  %v1419_v31 = vsel %vm843_vm1, 1.0, %v2480_v10  ;;  %vm846_vm4 = vcmp.eq.s32.totalorder %v268_v20, %v2508_v3 }
  0x5b   : > { %1979 = vst [vmem:[%s2575_s19 + $0x4a0] sm:$0xff] %v1402_v60  ;;  %1980 = vst [vmem:[%s2575_s19 + $0x4a8] sm:$0xff] %v1403_v61  ;;  %v1420_v32 = vsel %vm844_vm2, 1.0, %v2480_v10  ;;  %v1421_v33 = vsel %vm845_vm3, 1.0, %v2480_v10  ;;  %v274_v34 = vld [vmem:[%s6029_s0 + $0x570] sm:$0xff]  ;;  %v275_v35 = vld [vmem:[%s6029_s0 + $0x578] sm:$0xff]  ;;  %vm847_vm5 = vcmp.eq.s32.totalorder %v269_v21, %v2508_v3  ;;  %vm848_vm6 = vcmp.eq.s32.totalorder %v270_v26, %v2508_v3 }
  0x5c   : > { %1981 = vst [vmem:[%s2575_s19 + $0x4b0] sm:$0xff] %v1404_v62  ;;  %1982 = vst [vmem:[%s2575_s19 + $0x4b8] sm:$0xff] %v1405_v63  ;;  %vm849_vm7 = vcmp.eq.s32.totalorder %v271_v27, %v2508_v3  ;;  %v276_v36 = vld [vmem:[%s6029_s0 + $0x580] sm:$0xff]  ;;  %v277_v37 = vld [vmem:[%s6029_s0 + $0x588] sm:$0xff]  ;;  %v1422_v38 = vsel %vm846_vm4, 1.0, %v2480_v10  ;;  %v1423_v39 = vsel %vm847_vm5, 1.0, %v2480_v10  ;;  %vm850_vm8 = vcmp.eq.s32.totalorder %v272_v28, %v2508_v3 }
  0x5d   : > { %1983 = vst.msk [vmem:[%s2575_s19 + $0x4c0] sm:$0xff] %vm1838_vm0, %v1406_v5  ;;  %1984 = vst [vmem:[%s2575_s19 + $0x4c8] sm:$0xff] %v1407_v6  ;;  %v1424_v40 = vsel %vm848_vm6, 1.0, %v2480_v10  ;;  %v1425_v41 = vsel %vm849_vm7, 1.0, %v2480_v10  ;;  %v278_v42 = vld [vmem:[%s6029_s0 + $0x590] sm:$0xff]  ;;  %v279_v43 = vld [vmem:[%s6029_s0 + $0x598] sm:$0xff]  ;;  %vm851_vm9 = vcmp.eq.s32.totalorder %v273_v29, %v2508_v3  ;;  %vm852_vm10 = vcmp.eq.s32.totalorder %v274_v34, %v2508_v3 }
  0x5e   : > { %1985 = vst [vmem:[%s2575_s19 + $0x4d0] sm:$0xff] %v1408_v7  ;;  %1986 = vst [vmem:[%s2575_s19 + $0x4d8] sm:$0xff] %v1409_v8  ;;  %vm853_vm11 = vcmp.eq.s32.totalorder %v275_v35, %v2508_v3  ;;  %v280_v44 = vld [vmem:[%s6029_s0 + $0x5a0] sm:$0xff]  ;;  %v281_v45 = vld [vmem:[%s6029_s0 + $0x5a8] sm:$0xff]  ;;  %v1426_v46 = vsel %vm850_vm8, 1.0, %v2480_v10  ;;  %v1427_v47 = vsel %vm851_vm9, 1.0, %v2480_v10  ;;  %vm854_vm12 = vcmp.eq.s32.totalorder %v276_v36, %v2508_v3 }
  0x5f   : > { %1987 = vst [vmem:[%s2575_s19 + $0x4e0] sm:$0xff] %v1410_v14  ;;  %1988 = vst [vmem:[%s2575_s19 + $0x4e8] sm:$0xff] %v1411_v15  ;;  %v1428_v48 = vsel %vm852_vm10, 1.0, %v2480_v10  ;;  %v1429_v49 = vsel %vm853_vm11, 1.0, %v2480_v10  ;;  %v282_v50 = vld [vmem:[%s6029_s0 + $0x5b0] sm:$0xff]  ;;  %v283_v51 = vld [vmem:[%s6029_s0 + $0x5b8] sm:$0xff]  ;;  %vm855_vm13 = vcmp.eq.s32.totalorder %v277_v37, %v2508_v3  ;;  %vm856_vm14 = vcmp.eq.s32.totalorder %v278_v42, %v2508_v3 }
  0x60   : > { %1989 = vst [vmem:[%s2575_s19 + $0x4f0] sm:$0xff] %v1412_v16  ;;  %1990 = vst [vmem:[%s2575_s19 + $0x4f8] sm:$0xff] %v1413_v17  ;;  %vm857_vm15 = vcmp.eq.s32.totalorder %v279_v43, %v2508_v3  ;;  %v284_v52 = vld [vmem:[%s6029_s0 + $0x5c0] sm:$0xff]  ;;  %v285_v53 = vld [vmem:[%s6029_s0 + $0x5c8] sm:$0xff]  ;;  %v1430_v54 = vsel %vm854_vm12, 1.0, %v2480_v10  ;;  %v1431_v55 = vsel %vm855_vm13, 1.0, %v2480_v10  ;;  %vm858_vm1 = vcmp.eq.s32.totalorder %v280_v44, %v2508_v3 }
  0x61   : > { %1991 = vst [vmem:[%s2575_s19 + $0x500] sm:$0xff] %v1414_v22  ;;  %1992 = vst.msk [vmem:[%s2575_s19 + $0x508] sm:$0xff] %vm1838_vm0, %v1415_v23  ;;  %v1432_v56 = vsel %vm856_vm14, 1.0, %v2480_v10  ;;  %v1433_v57 = vsel %vm857_vm15, 1.0, %v2480_v10  ;;  %v286_v58 = vld [vmem:[%s6029_s0 + $0x5d0] sm:$0xff]  ;;  %v287_v59 = vld [vmem:[%s6029_s0 + $0x5d8] sm:$0xff]  ;;  %vm859_vm2 = vcmp.eq.s32.totalorder %v281_v45, %v2508_v3  ;;  %vm860_vm3 = vcmp.eq.s32.totalorder %v282_v50, %v2508_v3 }
  0x62   : > { %1993 = vst [vmem:[%s2575_s19 + $0x510] sm:$0xff] %v1416_v24  ;;  %1994 = vst [vmem:[%s2575_s19 + $0x518] sm:$0xff] %v1417_v25  ;;  %vm861_vm4 = vcmp.eq.s32.totalorder %v283_v51, %v2508_v3  ;;  %v288_v60 = vld [vmem:[%s6029_s0 + $0x5e0] sm:$0xff]  ;;  %v289_v61 = vld [vmem:[%s6029_s0 + $0x5e8] sm:$0xff]  ;;  %v1434_v62 = vsel %vm858_vm1, 1.0, %v2480_v10  ;;  %v1435_v63 = vsel %vm859_vm2, 1.0, %v2480_v10  ;;  %vm862_vm5 = vcmp.eq.s32.totalorder %v284_v52, %v2508_v3 }
  0x63   : > { %1995 = vst [vmem:[%s2575_s19 + $0x520] sm:$0xff] %v1418_v30  ;;  %1996 = vst [vmem:[%s2575_s19 + $0x528] sm:$0xff] %v1419_v31  ;;  %v1436_v0 = vsel %vm860_vm3, 1.0, %v2480_v10  ;;  %v1437_v1 = vsel %vm861_vm4, 1.0, %v2480_v10  ;;  %v290_v2 = vld [vmem:[%s6029_s0 + $0x5f0] sm:$0xff]  ;;  %v291_v4 = vld [vmem:[%s6029_s0 + $0x5f8] sm:$0xff]  ;;  %vm863_vm6 = vcmp.eq.s32.totalorder %v285_v53, %v2508_v3  ;;  %vm864_vm7 = vcmp.eq.s32.totalorder %v286_v58, %v2508_v3 }
  0x64   : > { %1997 = vst [vmem:[%s2575_s19 + $0x530] sm:$0xff] %v1420_v32  ;;  %1998 = vst [vmem:[%s2575_s19 + $0x538] sm:$0xff] %v1421_v33  ;;  %vm865_vm8 = vcmp.eq.s32.totalorder %v287_v59, %v2508_v3  ;;  %v292_v5 = vld [vmem:[%s6029_s0 + $0x600] sm:$0xff]  ;;  %v293_v6 = vld [vmem:[%s6029_s0 + $0x608] sm:$0xff]  ;;  %v1438_v7 = vsel %vm862_vm5, 1.0, %v2480_v10  ;;  %v1439_v8 = vsel %vm863_vm6, 1.0, %v2480_v10  ;;  %vm866_vm9 = vcmp.eq.s32.totalorder %v288_v60, %v2508_v3 }
  0x65   : > { %1999 = vst [vmem:[%s2575_s19 + $0x540] sm:$0xff] %v1422_v38  ;;  %2000 = vst [vmem:[%s2575_s19 + $0x548] sm:$0xff] %v1423_v39  ;;  %v1440_v9 = vsel %vm864_vm7, 1.0, %v2480_v10  ;;  %v1441_v11 = vsel %vm865_vm8, 1.0, %v2480_v10  ;;  %v294_v12 = vld [vmem:[%s6029_s0 + $0x610] sm:$0xff]  ;;  %v295_v13 = vld [vmem:[%s6029_s0 + $0x618] sm:$0xff]  ;;  %vm867_vm10 = vcmp.eq.s32.totalorder %v289_v61, %v2508_v3  ;;  %vm868_vm11 = vcmp.eq.s32.totalorder %v290_v2, %v2508_v3 }
  0x66   : > { %2001 = vst.msk [vmem:[%s2575_s19 + $0x550] sm:$0xff] %vm1838_vm0, %v1424_v40  ;;  %2002 = vst [vmem:[%s2575_s19 + $0x558] sm:$0xff] %v1425_v41  ;;  %vm869_vm12 = vcmp.eq.s32.totalorder %v291_v4, %v2508_v3  ;;  %v296_v14 = vld [vmem:[%s6029_s0 + $0x620] sm:$0xff]  ;;  %v297_v15 = vld [vmem:[%s6029_s0 + $0x628] sm:$0xff]  ;;  %v1442_v16 = vsel %vm866_vm9, 1.0, %v2480_v10  ;;  %v1443_v17 = vsel %vm867_vm10, 1.0, %v2480_v10  ;;  %vm870_vm13 = vcmp.eq.s32.totalorder %v292_v5, %v2508_v3 }
  0x67   : > { %2003 = vst [vmem:[%s2575_s19 + $0x560] sm:$0xff] %v1426_v46  ;;  %2004 = vst [vmem:[%s2575_s19 + $0x568] sm:$0xff] %v1427_v47  ;;  %v1444_v18 = vsel %vm868_vm11, 1.0, %v2480_v10  ;;  %v1445_v19 = vsel %vm869_vm12, 1.0, %v2480_v10  ;;  %v298_v20 = vld [vmem:[%s6029_s0 + $0x630] sm:$0xff]  ;;  %v299_v21 = vld [vmem:[%s6029_s0 + $0x638] sm:$0xff]  ;;  %vm871_vm14 = vcmp.eq.s32.totalorder %v293_v6, %v2508_v3  ;;  %vm872_vm15 = vcmp.eq.s32.totalorder %v294_v12, %v2508_v3 }
  0x68   : > { %2005 = vst [vmem:[%s2575_s19 + $0x570] sm:$0xff] %v1428_v48  ;;  %2006 = vst [vmem:[%s2575_s19 + $0x578] sm:$0xff] %v1429_v49  ;;  %vm873_vm1 = vcmp.eq.s32.totalorder %v295_v13, %v2508_v3  ;;  %v300_v22 = vld [vmem:[%s6029_s0 + $0x640] sm:$0xff]  ;;  %v301_v23 = vld [vmem:[%s6029_s0 + $0x648] sm:$0xff]  ;;  %v1446_v24 = vsel %vm870_vm13, 1.0, %v2480_v10  ;;  %v1447_v25 = vsel %vm871_vm14, 1.0, %v2480_v10  ;;  %vm874_vm2 = vcmp.eq.s32.totalorder %v296_v14, %v2508_v3 }
  0x69   : > { %2007 = vst [vmem:[%s2575_s19 + $0x580] sm:$0xff] %v1430_v54  ;;  %2008 = vst [vmem:[%s2575_s19 + $0x588] sm:$0xff] %v1431_v55  ;;  %v1448_v26 = vsel %vm872_vm15, 1.0, %v2480_v10  ;;  %v1449_v27 = vsel %vm873_vm1, 1.0, %v2480_v10  ;;  %v302_v28 = vld [vmem:[%s6029_s0 + $0x650] sm:$0xff]  ;;  %v303_v29 = vld [vmem:[%s6029_s0 + $0x658] sm:$0xff]  ;;  %vm875_vm3 = vcmp.eq.s32.totalorder %v297_v15, %v2508_v3  ;;  %vm876_vm4 = vcmp.eq.s32.totalorder %v298_v20, %v2508_v3 }
  0x6a   : > { %2009 = vst [vmem:[%s2575_s19 + $0x590] sm:$0xff] %v1432_v56  ;;  %2010 = vst.msk [vmem:[%s2575_s19 + $0x598] sm:$0xff] %vm1838_vm0, %v1433_v57  ;;  %vm877_vm5 = vcmp.eq.s32.totalorder %v299_v21, %v2508_v3  ;;  %v304_v30 = vld [vmem:[%s6029_s0 + $0x660] sm:$0xff]  ;;  %v305_v31 = vld [vmem:[%s6029_s0 + $0x668] sm:$0xff]  ;;  %v1450_v32 = vsel %vm874_vm2, 1.0, %v2480_v10  ;;  %v1451_v33 = vsel %vm875_vm3, 1.0, %v2480_v10  ;;  %vm878_vm6 = vcmp.eq.s32.totalorder %v300_v22, %v2508_v3 }
  0x6b   : > { %2011 = vst [vmem:[%s2575_s19 + $0x5a0] sm:$0xff] %v1434_v62  ;;  %2012 = vst [vmem:[%s2575_s19 + $0x5a8] sm:$0xff] %v1435_v63  ;;  %v1452_v34 = vsel %vm876_vm4, 1.0, %v2480_v10  ;;  %v1453_v35 = vsel %vm877_vm5, 1.0, %v2480_v10  ;;  %v306_v36 = vld [vmem:[%s6029_s0 + $0x670] sm:$0xff]  ;;  %v307_v37 = vld [vmem:[%s6029_s0 + $0x678] sm:$0xff]  ;;  %vm879_vm7 = vcmp.eq.s32.totalorder %v301_v23, %v2508_v3  ;;  %vm880_vm8 = vcmp.eq.s32.totalorder %v302_v28, %v2508_v3 }
  0x6c   : > { %2013 = vst [vmem:[%s2575_s19 + $0x5b0] sm:$0xff] %v1436_v0  ;;  %2014 = vst [vmem:[%s2575_s19 + $0x5b8] sm:$0xff] %v1437_v1  ;;  %vm881_vm9 = vcmp.eq.s32.totalorder %v303_v29, %v2508_v3  ;;  %v308_v38 = vld [vmem:[%s6029_s0 + $0x680] sm:$0xff]  ;;  %v309_v39 = vld [vmem:[%s6029_s0 + $0x688] sm:$0xff]  ;;  %v1454_v40 = vsel %vm878_vm6, 1.0, %v2480_v10  ;;  %v1455_v41 = vsel %vm879_vm7, 1.0, %v2480_v10  ;;  %vm882_vm10 = vcmp.eq.s32.totalorder %v304_v30, %v2508_v3 }
  0x6d   : > { %2015 = vst [vmem:[%s2575_s19 + $0x5c0] sm:$0xff] %v1438_v7  ;;  %2016 = vst [vmem:[%s2575_s19 + $0x5c8] sm:$0xff] %v1439_v8  ;;  %v1456_v42 = vsel %vm880_vm8, 1.0, %v2480_v10  ;;  %v1457_v43 = vsel %vm881_vm9, 1.0, %v2480_v10  ;;  %v310_v44 = vld [vmem:[%s6029_s0 + $0x690] sm:$0xff]  ;;  %v311_v45 = vld [vmem:[%s6029_s0 + $0x698] sm:$0xff]  ;;  %vm883_vm11 = vcmp.eq.s32.totalorder %v305_v31, %v2508_v3  ;;  %vm884_vm12 = vcmp.eq.s32.totalorder %v306_v36, %v2508_v3 }
  0x6e   : > { %2017 = vst [vmem:[%s2575_s19 + $0x5d0] sm:$0xff] %v1440_v9  ;;  %2018 = vst [vmem:[%s2575_s19 + $0x5d8] sm:$0xff] %v1441_v11  ;;  %vm885_vm13 = vcmp.eq.s32.totalorder %v307_v37, %v2508_v3  ;;  %v312_v46 = vld [vmem:[%s6029_s0 + $0x6a0] sm:$0xff]  ;;  %v313_v47 = vld [vmem:[%s6029_s0 + $0x6a8] sm:$0xff]  ;;  %v1458_v48 = vsel %vm882_vm10, 1.0, %v2480_v10  ;;  %v1459_v49 = vsel %vm883_vm11, 1.0, %v2480_v10  ;;  %vm886_vm14 = vcmp.eq.s32.totalorder %v308_v38, %v2508_v3 }
  0x6f   : > { %2019 = vst.msk [vmem:[%s2575_s19 + $0x5e0] sm:$0xff] %vm1838_vm0, %v1442_v16  ;;  %2020 = vst [vmem:[%s2575_s19 + $0x5e8] sm:$0xff] %v1443_v17  ;;  %v1460_v50 = vsel %vm884_vm12, 1.0, %v2480_v10  ;;  %v1461_v51 = vsel %vm885_vm13, 1.0, %v2480_v10  ;;  %v314_v52 = vld [vmem:[%s6029_s0 + $0x6b0] sm:$0xff]  ;;  %v315_v53 = vld [vmem:[%s6029_s0 + $0x6b8] sm:$0xff]  ;;  %vm887_vm15 = vcmp.eq.s32.totalorder %v309_v39, %v2508_v3  ;;  %vm888_vm1 = vcmp.eq.s32.totalorder %v310_v44, %v2508_v3 }
  0x70   : > { %2021 = vst [vmem:[%s2575_s19 + $0x5f0] sm:$0xff] %v1444_v18  ;;  %2022 = vst [vmem:[%s2575_s19 + $0x5f8] sm:$0xff] %v1445_v19  ;;  %vm889_vm2 = vcmp.eq.s32.totalorder %v311_v45, %v2508_v3  ;;  %v316_v54 = vld [vmem:[%s6029_s0 + $0x6c0] sm:$0xff]  ;;  %v317_v55 = vld [vmem:[%s6029_s0 + $0x6c8] sm:$0xff]  ;;  %v1462_v56 = vsel %vm886_vm14, 1.0, %v2480_v10  ;;  %v1463_v57 = vsel %vm887_vm15, 1.0, %v2480_v10  ;;  %vm890_vm3 = vcmp.eq.s32.totalorder %v312_v46, %v2508_v3 }
  0x71   : > { %2023 = vst [vmem:[%s2575_s19 + $0x600] sm:$0xff] %v1446_v24  ;;  %2024 = vst [vmem:[%s2575_s19 + $0x608] sm:$0xff] %v1447_v25  ;;  %v1464_v58 = vsel %vm888_vm1, 1.0, %v2480_v10  ;;  %v1465_v59 = vsel %vm889_vm2, 1.0, %v2480_v10  ;;  %v318_v60 = vld [vmem:[%s6029_s0 + $0x6d0] sm:$0xff]  ;;  %v319_v61 = vld [vmem:[%s6029_s0 + $0x6d8] sm:$0xff]  ;;  %vm891_vm4 = vcmp.eq.s32.totalorder %v313_v47, %v2508_v3  ;;  %vm892_vm5 = vcmp.eq.s32.totalorder %v314_v52, %v2508_v3 }
  0x72   : > { %2025 = vst [vmem:[%s2575_s19 + $0x610] sm:$0xff] %v1448_v26  ;;  %2026 = vst [vmem:[%s2575_s19 + $0x618] sm:$0xff] %v1449_v27  ;;  %vm893_vm6 = vcmp.eq.s32.totalorder %v315_v53, %v2508_v3  ;;  %v320_v62 = vld [vmem:[%s6029_s0 + $0x6e0] sm:$0xff]  ;;  %v321_v63 = vld [vmem:[%s6029_s0 + $0x6e8] sm:$0xff]  ;;  %v1466_v0 = vsel %vm890_vm3, 1.0, %v2480_v10  ;;  %v1467_v1 = vsel %vm891_vm4, 1.0, %v2480_v10  ;;  %vm894_vm7 = vcmp.eq.s32.totalorder %v316_v54, %v2508_v3 }
  0x73   : > { %2027 = vst [vmem:[%s2575_s19 + $0x620] sm:$0xff] %v1450_v32  ;;  %2028 = vst.msk [vmem:[%s2575_s19 + $0x628] sm:$0xff] %vm1838_vm0, %v1451_v33  ;;  %v1468_v2 = vsel %vm892_vm5, 1.0, %v2480_v10  ;;  %v1469_v4 = vsel %vm893_vm6, 1.0, %v2480_v10  ;;  %v322_v5 = vld [vmem:[%s6029_s0 + $0x6f0] sm:$0xff]  ;;  %v323_v6 = vld [vmem:[%s6029_s0 + $0x6f8] sm:$0xff]  ;;  %vm895_vm8 = vcmp.eq.s32.totalorder %v317_v55, %v2508_v3  ;;  %vm896_vm9 = vcmp.eq.s32.totalorder %v318_v60, %v2508_v3 }
  0x74   : > { %2029 = vst [vmem:[%s2575_s19 + $0x630] sm:$0xff] %v1452_v34  ;;  %2030 = vst [vmem:[%s2575_s19 + $0x638] sm:$0xff] %v1453_v35  ;;  %vm897_vm10 = vcmp.eq.s32.totalorder %v319_v61, %v2508_v3  ;;  %v324_v7 = vld [vmem:[%s6029_s0 + $0x700] sm:$0xff]  ;;  %v325_v8 = vld [vmem:[%s6029_s0 + $0x708] sm:$0xff]  ;;  %v1470_v9 = vsel %vm894_vm7, 1.0, %v2480_v10  ;;  %v1471_v11 = vsel %vm895_vm8, 1.0, %v2480_v10  ;;  %vm898_vm11 = vcmp.eq.s32.totalorder %v320_v62, %v2508_v3 }
  0x75   : > { %2031 = vst [vmem:[%s2575_s19 + $0x640] sm:$0xff] %v1454_v40  ;;  %2032 = vst [vmem:[%s2575_s19 + $0x648] sm:$0xff] %v1455_v41  ;;  %v1472_v12 = vsel %vm896_vm9, 1.0, %v2480_v10  ;;  %v1473_v13 = vsel %vm897_vm10, 1.0, %v2480_v10  ;;  %v326_v14 = vld [vmem:[%s6029_s0 + $0x710] sm:$0xff]  ;;  %v327_v15 = vld [vmem:[%s6029_s0 + $0x718] sm:$0xff]  ;;  %vm899_vm12 = vcmp.eq.s32.totalorder %v321_v63, %v2508_v3  ;;  %vm900_vm13 = vcmp.eq.s32.totalorder %v322_v5, %v2508_v3 }
  0x76   : > { %2033 = vst [vmem:[%s2575_s19 + $0x650] sm:$0xff] %v1456_v42  ;;  %2034 = vst [vmem:[%s2575_s19 + $0x658] sm:$0xff] %v1457_v43  ;;  %vm901_vm14 = vcmp.eq.s32.totalorder %v323_v6, %v2508_v3  ;;  %v328_v16 = vld [vmem:[%s6029_s0 + $0x720] sm:$0xff]  ;;  %v329_v17 = vld [vmem:[%s6029_s0 + $0x728] sm:$0xff]  ;;  %v1474_v18 = vsel %vm898_vm11, 1.0, %v2480_v10  ;;  %v1475_v19 = vsel %vm899_vm12, 1.0, %v2480_v10  ;;  %vm902_vm15 = vcmp.eq.s32.totalorder %v324_v7, %v2508_v3 }
  0x77   : > { %2035 = vst [vmem:[%s2575_s19 + $0x660] sm:$0xff] %v1458_v48  ;;  %2036 = vst [vmem:[%s2575_s19 + $0x668] sm:$0xff] %v1459_v49  ;;  %v1476_v20 = vsel %vm900_vm13, 1.0, %v2480_v10  ;;  %v1477_v21 = vsel %vm901_vm14, 1.0, %v2480_v10  ;;  %v330_v22 = vld [vmem:[%s6029_s0 + $0x730] sm:$0xff]  ;;  %v331_v23 = vld [vmem:[%s6029_s0 + $0x738] sm:$0xff]  ;;  %vm903_vm1 = vcmp.eq.s32.totalorder %v325_v8, %v2508_v3  ;;  %vm904_vm2 = vcmp.eq.s32.totalorder %v326_v14, %v2508_v3 }
  0x78   : > { %2037 = vst.msk [vmem:[%s2575_s19 + $0x670] sm:$0xff] %vm1838_vm0, %v1460_v50  ;;  %2038 = vst [vmem:[%s2575_s19 + $0x678] sm:$0xff] %v1461_v51  ;;  %vm905_vm3 = vcmp.eq.s32.totalorder %v327_v15, %v2508_v3  ;;  %v332_v24 = vld [vmem:[%s6029_s0 + $0x740] sm:$0xff]  ;;  %v333_v25 = vld [vmem:[%s6029_s0 + $0x748] sm:$0xff]  ;;  %v1478_v26 = vsel %vm902_vm15, 1.0, %v2480_v10  ;;  %v1479_v27 = vsel %vm903_vm1, 1.0, %v2480_v10  ;;  %vm906_vm4 = vcmp.eq.s32.totalorder %v328_v16, %v2508_v3 }
  0x79   : > { %2039 = vst [vmem:[%s2575_s19 + $0x680] sm:$0xff] %v1462_v56  ;;  %2040 = vst [vmem:[%s2575_s19 + $0x688] sm:$0xff] %v1463_v57  ;;  %v1480_v28 = vsel %vm904_vm2, 1.0, %v2480_v10  ;;  %v1481_v29 = vsel %vm905_vm3, 1.0, %v2480_v10  ;;  %v334_v30 = vld [vmem:[%s6029_s0 + $0x750] sm:$0xff]  ;;  %v335_v31 = vld [vmem:[%s6029_s0 + $0x758] sm:$0xff]  ;;  %vm907_vm5 = vcmp.eq.s32.totalorder %v329_v17, %v2508_v3  ;;  %vm908_vm6 = vcmp.eq.s32.totalorder %v330_v22, %v2508_v3 }
  0x7a   : > { %2041 = vst [vmem:[%s2575_s19 + $0x690] sm:$0xff] %v1464_v58  ;;  %2042 = vst [vmem:[%s2575_s19 + $0x698] sm:$0xff] %v1465_v59  ;;  %vm909_vm7 = vcmp.eq.s32.totalorder %v331_v23, %v2508_v3  ;;  %v336_v32 = vld [vmem:[%s6029_s0 + $0x760] sm:$0xff]  ;;  %v337_v33 = vld [vmem:[%s6029_s0 + $0x768] sm:$0xff]  ;;  %v1482_v34 = vsel %vm906_vm4, 1.0, %v2480_v10  ;;  %v1483_v35 = vsel %vm907_vm5, 1.0, %v2480_v10  ;;  %vm910_vm8 = vcmp.eq.s32.totalorder %v332_v24, %v2508_v3 }
  0x7b   : > { %2043 = vst [vmem:[%s2575_s19 + $0x6a0] sm:$0xff] %v1466_v0  ;;  %2044 = vst [vmem:[%s2575_s19 + $0x6a8] sm:$0xff] %v1467_v1  ;;  %v1484_v36 = vsel %vm908_vm6, 1.0, %v2480_v10  ;;  %v1485_v37 = vsel %vm909_vm7, 1.0, %v2480_v10  ;;  %v338_v38 = vld [vmem:[%s6029_s0 + $0x770] sm:$0xff]  ;;  %v339_v39 = vld [vmem:[%s6029_s0 + $0x778] sm:$0xff]  ;;  %vm911_vm9 = vcmp.eq.s32.totalorder %v333_v25, %v2508_v3  ;;  %vm912_vm10 = vcmp.eq.s32.totalorder %v334_v30, %v2508_v3 }
  0x7c   : > { %2045 = vst [vmem:[%s2575_s19 + $0x6b0] sm:$0xff] %v1468_v2  ;;  %2046 = vst.msk [vmem:[%s2575_s19 + $0x6b8] sm:$0xff] %vm1838_vm0, %v1469_v4  ;;  %vm913_vm11 = vcmp.eq.s32.totalorder %v335_v31, %v2508_v3  ;;  %v340_v40 = vld [vmem:[%s6029_s0 + $0x780] sm:$0xff]  ;;  %v341_v41 = vld [vmem:[%s6029_s0 + $0x788] sm:$0xff]  ;;  %v1486_v42 = vsel %vm910_vm8, 1.0, %v2480_v10  ;;  %v1487_v43 = vsel %vm911_vm9, 1.0, %v2480_v10  ;;  %vm914_vm12 = vcmp.eq.s32.totalorder %v336_v32, %v2508_v3 }
  0x7d   : > { %2047 = vst [vmem:[%s2575_s19 + $0x6c0] sm:$0xff] %v1470_v9  ;;  %2048 = vst [vmem:[%s2575_s19 + $0x6c8] sm:$0xff] %v1471_v11  ;;  %v1488_v44 = vsel %vm912_vm10, 1.0, %v2480_v10  ;;  %v1489_v45 = vsel %vm913_vm11, 1.0, %v2480_v10  ;;  %v342_v46 = vld [vmem:[%s6029_s0 + $0x790] sm:$0xff]  ;;  %v343_v47 = vld [vmem:[%s6029_s0 + $0x798] sm:$0xff]  ;;  %vm915_vm13 = vcmp.eq.s32.totalorder %v337_v33, %v2508_v3  ;;  %vm916_vm14 = vcmp.eq.s32.totalorder %v338_v38, %v2508_v3 }
  0x7e   : > { %2049 = vst [vmem:[%s2575_s19 + $0x6d0] sm:$0xff] %v1472_v12  ;;  %2050 = vst [vmem:[%s2575_s19 + $0x6d8] sm:$0xff] %v1473_v13  ;;  %vm917_vm15 = vcmp.eq.s32.totalorder %v339_v39, %v2508_v3  ;;  %v344_v48 = vld [vmem:[%s6029_s0 + $0x7a0] sm:$0xff]  ;;  %v345_v49 = vld [vmem:[%s6029_s0 + $0x7a8] sm:$0xff]  ;;  %v1490_v50 = vsel %vm914_vm12, 1.0, %v2480_v10  ;;  %v1491_v51 = vsel %vm915_vm13, 1.0, %v2480_v10  ;;  %vm918_vm1 = vcmp.eq.s32.totalorder %v340_v40, %v2508_v3 }
  0x7f   : > { %2051 = vst [vmem:[%s2575_s19 + $0x6e0] sm:$0xff] %v1474_v18  ;;  %2052 = vst [vmem:[%s2575_s19 + $0x6e8] sm:$0xff] %v1475_v19  ;;  %v1492_v52 = vsel %vm916_vm14, 1.0, %v2480_v10  ;;  %v1493_v53 = vsel %vm917_vm15, 1.0, %v2480_v10  ;;  %v346_v54 = vld [vmem:[%s6029_s0 + $0x7b0] sm:$0xff]  ;;  %v347_v55 = vld [vmem:[%s6029_s0 + $0x7b8] sm:$0xff]  ;;  %vm919_vm2 = vcmp.eq.s32.totalorder %v341_v41, %v2508_v3  ;;  %vm920_vm3 = vcmp.eq.s32.totalorder %v342_v46, %v2508_v3 }
  0x80   : > { %2053 = vst [vmem:[%s2575_s19 + $0x6f0] sm:$0xff] %v1476_v20  ;;  %2054 = vst [vmem:[%s2575_s19 + $0x6f8] sm:$0xff] %v1477_v21  ;;  %vm921_vm4 = vcmp.eq.s32.totalorder %v343_v47, %v2508_v3  ;;  %v348_v56 = vld [vmem:[%s6029_s0 + $0x7c0] sm:$0xff]  ;;  %v349_v57 = vld [vmem:[%s6029_s0 + $0x7c8] sm:$0xff]  ;;  %v1494_v58 = vsel %vm918_vm1, 1.0, %v2480_v10  ;;  %v1495_v59 = vsel %vm919_vm2, 1.0, %v2480_v10  ;;  %vm922_vm5 = vcmp.eq.s32.totalorder %v344_v48, %v2508_v3 }
  0x81   : > { %2055 = vst.msk [vmem:[%s2575_s19 + $0x700] sm:$0xff] %vm1838_vm0, %v1478_v26  ;;  %2056 = vst [vmem:[%s2575_s19 + $0x708] sm:$0xff] %v1479_v27  ;;  %v1496_v60 = vsel %vm920_vm3, 1.0, %v2480_v10  ;;  %v1497_v61 = vsel %vm921_vm4, 1.0, %v2480_v10  ;;  %v350_v62 = vld [vmem:[%s6029_s0 + $0x7d0] sm:$0xff]  ;;  %v351_v63 = vld [vmem:[%s6029_s0 + $0x7d8] sm:$0xff]  ;;  %vm923_vm6 = vcmp.eq.s32.totalorder %v345_v49, %v2508_v3  ;;  %vm924_vm7 = vcmp.eq.s32.totalorder %v346_v54, %v2508_v3 }
  0x82   : > { %2057 = vst [vmem:[%s2575_s19 + $0x710] sm:$0xff] %v1480_v28  ;;  %2058 = vst [vmem:[%s2575_s19 + $0x718] sm:$0xff] %v1481_v29  ;;  %vm925_vm8 = vcmp.eq.s32.totalorder %v347_v55, %v2508_v3  ;;  %v352_v0 = vld [vmem:[%s6029_s0 + $0x7e0] sm:$0xff]  ;;  %v353_v1 = vld [vmem:[%s6029_s0 + $0x7e8] sm:$0xff]  ;;  %v1498_v2 = vsel %vm922_vm5, 1.0, %v2480_v10  ;;  %v1499_v4 = vsel %vm923_vm6, 1.0, %v2480_v10  ;;  %vm926_vm9 = vcmp.eq.s32.totalorder %v348_v56, %v2508_v3 }
  0x83   : > { %2059 = vst [vmem:[%s2575_s19 + $0x720] sm:$0xff] %v1482_v34  ;;  %2060 = vst [vmem:[%s2575_s19 + $0x728] sm:$0xff] %v1483_v35  ;;  %v1500_v5 = vsel %vm924_vm7, 1.0, %v2480_v10  ;;  %v1501_v6 = vsel %vm925_vm8, 1.0, %v2480_v10  ;;  %v354_v7 = vld [vmem:[%s6029_s0 + $0x7f0] sm:$0xff]  ;;  %v355_v8 = vld [vmem:[%s6029_s0 + $0x7f8] sm:$0xff]  ;;  %vm927_vm10 = vcmp.eq.s32.totalorder %v349_v57, %v2508_v3  ;;  %vm928_vm11 = vcmp.eq.s32.totalorder %v350_v62, %v2508_v3 }
  0x84   : > { %2061 = vst [vmem:[%s2575_s19 + $0x730] sm:$0xff] %v1484_v36  ;;  %2062 = vst [vmem:[%s2575_s19 + $0x738] sm:$0xff] %v1485_v37  ;;  %vm929_vm12 = vcmp.eq.s32.totalorder %v351_v63, %v2508_v3  ;;  %v356_v9 = vld [vmem:[%s6029_s0 + $0x800] sm:$0xff]  ;;  %v357_v11 = vld [vmem:[%s6029_s0 + $0x808] sm:$0xff]  ;;  %v1502_v12 = vsel %vm926_vm9, 1.0, %v2480_v10  ;;  %v1503_v13 = vsel %vm927_vm10, 1.0, %v2480_v10  ;;  %vm930_vm13 = vcmp.eq.s32.totalorder %v352_v0, %v2508_v3 }
  0x85   : > { %2063 = vst [vmem:[%s2575_s19 + $0x740] sm:$0xff] %v1486_v42  ;;  %2064 = vst.msk [vmem:[%s2575_s19 + $0x748] sm:$0xff] %vm1838_vm0, %v1487_v43  ;;  %v1504_v14 = vsel %vm928_vm11, 1.0, %v2480_v10  ;;  %v1505_v15 = vsel %vm929_vm12, 1.0, %v2480_v10  ;;  %v358_v16 = vld [vmem:[%s6029_s0 + $0x810] sm:$0xff]  ;;  %v359_v17 = vld [vmem:[%s6029_s0 + $0x818] sm:$0xff]  ;;  %vm931_vm14 = vcmp.eq.s32.totalorder %v353_v1, %v2508_v3  ;;  %vm932_vm15 = vcmp.eq.s32.totalorder %v354_v7, %v2508_v3 }
  0x86   : > { %2065 = vst [vmem:[%s2575_s19 + $0x750] sm:$0xff] %v1488_v44  ;;  %2066 = vst [vmem:[%s2575_s19 + $0x758] sm:$0xff] %v1489_v45  ;;  %vm933_vm1 = vcmp.eq.s32.totalorder %v355_v8, %v2508_v3  ;;  %v360_v18 = vld [vmem:[%s6029_s0 + $0x820] sm:$0xff]  ;;  %v361_v19 = vld [vmem:[%s6029_s0 + $0x828] sm:$0xff]  ;;  %v1506_v20 = vsel %vm930_vm13, 1.0, %v2480_v10  ;;  %v1507_v21 = vsel %vm931_vm14, 1.0, %v2480_v10  ;;  %vm934_vm2 = vcmp.eq.s32.totalorder %v356_v9, %v2508_v3 }
  0x87   : > { %2067 = vst [vmem:[%s2575_s19 + $0x760] sm:$0xff] %v1490_v50  ;;  %2068 = vst [vmem:[%s2575_s19 + $0x768] sm:$0xff] %v1491_v51  ;;  %v1508_v22 = vsel %vm932_vm15, 1.0, %v2480_v10  ;;  %v1509_v23 = vsel %vm933_vm1, 1.0, %v2480_v10  ;;  %v362_v24 = vld [vmem:[%s6029_s0 + $0x830] sm:$0xff]  ;;  %v363_v25 = vld [vmem:[%s6029_s0 + $0x838] sm:$0xff]  ;;  %vm935_vm3 = vcmp.eq.s32.totalorder %v357_v11, %v2508_v3  ;;  %vm936_vm4 = vcmp.eq.s32.totalorder %v358_v16, %v2508_v3 }
  0x88   : > { %2069 = vst [vmem:[%s2575_s19 + $0x770] sm:$0xff] %v1492_v52  ;;  %2070 = vst [vmem:[%s2575_s19 + $0x778] sm:$0xff] %v1493_v53  ;;  %vm937_vm5 = vcmp.eq.s32.totalorder %v359_v17, %v2508_v3  ;;  %v364_v26 = vld [vmem:[%s6029_s0 + $0x840] sm:$0xff]  ;;  %v365_v27 = vld [vmem:[%s6029_s0 + $0x848] sm:$0xff]  ;;  %v1510_v28 = vsel %vm934_vm2, 1.0, %v2480_v10  ;;  %v1511_v29 = vsel %vm935_vm3, 1.0, %v2480_v10  ;;  %vm938_vm6 = vcmp.eq.s32.totalorder %v360_v18, %v2508_v3 }
  0x89   : > { %2071 = vst [vmem:[%s2575_s19 + $0x780] sm:$0xff] %v1494_v58  ;;  %2072 = vst [vmem:[%s2575_s19 + $0x788] sm:$0xff] %v1495_v59  ;;  %v1512_v30 = vsel %vm936_vm4, 1.0, %v2480_v10  ;;  %v1513_v31 = vsel %vm937_vm5, 1.0, %v2480_v10  ;;  %v366_v32 = vld [vmem:[%s6029_s0 + $0x850] sm:$0xff]  ;;  %v367_v33 = vld [vmem:[%s6029_s0 + $0x858] sm:$0xff]  ;;  %vm939_vm7 = vcmp.eq.s32.totalorder %v361_v19, %v2508_v3  ;;  %vm940_vm8 = vcmp.eq.s32.totalorder %v362_v24, %v2508_v3 }
  0x8a   : > { %2073 = vst.msk [vmem:[%s2575_s19 + $0x790] sm:$0xff] %vm1838_vm0, %v1496_v60  ;;  %2074 = vst [vmem:[%s2575_s19 + $0x798] sm:$0xff] %v1497_v61  ;;  %vm941_vm9 = vcmp.eq.s32.totalorder %v363_v25, %v2508_v3  ;;  %v368_v34 = vld [vmem:[%s6029_s0 + $0x860] sm:$0xff]  ;;  %v369_v35 = vld [vmem:[%s6029_s0 + $0x868] sm:$0xff]  ;;  %v1514_v36 = vsel %vm938_vm6, 1.0, %v2480_v10  ;;  %v1515_v37 = vsel %vm939_vm7, 1.0, %v2480_v10  ;;  %vm942_vm10 = vcmp.eq.s32.totalorder %v364_v26, %v2508_v3 }
  0x8b   : > { %2075 = vst [vmem:[%s2575_s19 + $0x7a0] sm:$0xff] %v1498_v2  ;;  %2076 = vst [vmem:[%s2575_s19 + $0x7a8] sm:$0xff] %v1499_v4  ;;  %v1516_v38 = vsel %vm940_vm8, 1.0, %v2480_v10  ;;  %v1517_v39 = vsel %vm941_vm9, 1.0, %v2480_v10  ;;  %v370_v40 = vld [vmem:[%s6029_s0 + $0x870] sm:$0xff]  ;;  %v371_v41 = vld [vmem:[%s6029_s0 + $0x878] sm:$0xff]  ;;  %vm943_vm11 = vcmp.eq.s32.totalorder %v365_v27, %v2508_v3  ;;  %vm944_vm12 = vcmp.eq.s32.totalorder %v366_v32, %v2508_v3 }
  0x8c   : > { %2077 = vst [vmem:[%s2575_s19 + $0x7b0] sm:$0xff] %v1500_v5  ;;  %2078 = vst [vmem:[%s2575_s19 + $0x7b8] sm:$0xff] %v1501_v6  ;;  %vm945_vm13 = vcmp.eq.s32.totalorder %v367_v33, %v2508_v3  ;;  %v372_v42 = vld [vmem:[%s6029_s0 + $0x880] sm:$0xff]  ;;  %v373_v43 = vld [vmem:[%s6029_s0 + $0x888] sm:$0xff]  ;;  %v1518_v44 = vsel %vm942_vm10, 1.0, %v2480_v10  ;;  %v1519_v45 = vsel %vm943_vm11, 1.0, %v2480_v10  ;;  %vm946_vm14 = vcmp.eq.s32.totalorder %v368_v34, %v2508_v3 }
  0x8d   : > { %2079 = vst [vmem:[%s2575_s19 + $0x7c0] sm:$0xff] %v1502_v12  ;;  %2080 = vst [vmem:[%s2575_s19 + $0x7c8] sm:$0xff] %v1503_v13  ;;  %v1520_v46 = vsel %vm944_vm12, 1.0, %v2480_v10  ;;  %v1521_v47 = vsel %vm945_vm13, 1.0, %v2480_v10  ;;  %v374_v48 = vld [vmem:[%s6029_s0 + $0x890] sm:$0xff]  ;;  %v375_v49 = vld [vmem:[%s6029_s0 + $0x898] sm:$0xff]  ;;  %vm947_vm15 = vcmp.eq.s32.totalorder %v369_v35, %v2508_v3  ;;  %vm948_vm1 = vcmp.eq.s32.totalorder %v370_v40, %v2508_v3 }
  0x8e   : > { %2081 = vst [vmem:[%s2575_s19 + $0x7d0] sm:$0xff] %v1504_v14  ;;  %2082 = vst.msk [vmem:[%s2575_s19 + $0x7d8] sm:$0xff] %vm1838_vm0, %v1505_v15  ;;  %vm949_vm2 = vcmp.eq.s32.totalorder %v371_v41, %v2508_v3  ;;  %v376_v50 = vld [vmem:[%s6029_s0 + $0x8a0] sm:$0xff]  ;;  %v377_v51 = vld [vmem:[%s6029_s0 + $0x8a8] sm:$0xff]  ;;  %v1522_v52 = vsel %vm946_vm14, 1.0, %v2480_v10  ;;  %v1523_v53 = vsel %vm947_vm15, 1.0, %v2480_v10  ;;  %vm950_vm3 = vcmp.eq.s32.totalorder %v372_v42, %v2508_v3 }
  0x8f   : > { %2083 = vst [vmem:[%s2575_s19 + $0x7e0] sm:$0xff] %v1506_v20  ;;  %2084 = vst [vmem:[%s2575_s19 + $0x7e8] sm:$0xff] %v1507_v21  ;;  %v1524_v54 = vsel %vm948_vm1, 1.0, %v2480_v10  ;;  %v1525_v55 = vsel %vm949_vm2, 1.0, %v2480_v10  ;;  %v378_v56 = vld [vmem:[%s6029_s0 + $0x8b0] sm:$0xff]  ;;  %v379_v57 = vld [vmem:[%s6029_s0 + $0x8b8] sm:$0xff]  ;;  %vm951_vm4 = vcmp.eq.s32.totalorder %v373_v43, %v2508_v3  ;;  %vm952_vm5 = vcmp.eq.s32.totalorder %v374_v48, %v2508_v3 }
  0x90   : > { %2085 = vst [vmem:[%s2575_s19 + $0x7f0] sm:$0xff] %v1508_v22  ;;  %2086 = vst [vmem:[%s2575_s19 + $0x7f8] sm:$0xff] %v1509_v23  ;;  %vm953_vm6 = vcmp.eq.s32.totalorder %v375_v49, %v2508_v3  ;;  %v380_v58 = vld [vmem:[%s6029_s0 + $0x8c0] sm:$0xff]  ;;  %v381_v59 = vld [vmem:[%s6029_s0 + $0x8c8] sm:$0xff]  ;;  %v1526_v60 = vsel %vm950_vm3, 1.0, %v2480_v10  ;;  %v1527_v61 = vsel %vm951_vm4, 1.0, %v2480_v10  ;;  %vm954_vm7 = vcmp.eq.s32.totalorder %v376_v50, %v2508_v3 }
  0x91   : > { %2087 = vst [vmem:[%s2575_s19 + $0x800] sm:$0xff] %v1510_v28  ;;  %2088 = vst [vmem:[%s2575_s19 + $0x808] sm:$0xff] %v1511_v29  ;;  %v1528_v62 = vsel %vm952_vm5, 1.0, %v2480_v10  ;;  %v1529_v63 = vsel %vm953_vm6, 1.0, %v2480_v10  ;;  %v382_v0 = vld [vmem:[%s6029_s0 + $0x8d0] sm:$0xff]  ;;  %v383_v1 = vld [vmem:[%s6029_s0 + $0x8d8] sm:$0xff]  ;;  %vm955_vm8 = vcmp.eq.s32.totalorder %v377_v51, %v2508_v3  ;;  %vm956_vm9 = vcmp.eq.s32.totalorder %v378_v56, %v2508_v3 }
  0x92   : > { %2089 = vst [vmem:[%s2575_s19 + $0x810] sm:$0xff] %v1512_v30  ;;  %2090 = vst [vmem:[%s2575_s19 + $0x818] sm:$0xff] %v1513_v31  ;;  %vm957_vm10 = vcmp.eq.s32.totalorder %v379_v57, %v2508_v3  ;;  %v384_v2 = vld [vmem:[%s6029_s0 + $0x8e0] sm:$0xff]  ;;  %v385_v4 = vld [vmem:[%s6029_s0 + $0x8e8] sm:$0xff]  ;;  %v1530_v5 = vsel %vm954_vm7, 1.0, %v2480_v10  ;;  %v1531_v6 = vsel %vm955_vm8, 1.0, %v2480_v10  ;;  %vm958_vm11 = vcmp.eq.s32.totalorder %v380_v58, %v2508_v3 }
  0x93   : > { %2091 = vst.msk [vmem:[%s2575_s19 + $0x820] sm:$0xff] %vm1838_vm0, %v1514_v36  ;;  %2092 = vst [vmem:[%s2575_s19 + $0x828] sm:$0xff] %v1515_v37  ;;  %v1532_v7 = vsel %vm956_vm9, 1.0, %v2480_v10  ;;  %v1533_v8 = vsel %vm957_vm10, 1.0, %v2480_v10  ;;  %v386_v9 = vld [vmem:[%s6029_s0 + $0x8f0] sm:$0xff]  ;;  %v387_v11 = vld [vmem:[%s6029_s0 + $0x8f8] sm:$0xff]  ;;  %vm959_vm12 = vcmp.eq.s32.totalorder %v381_v59, %v2508_v3  ;;  %vm960_vm13 = vcmp.eq.s32.totalorder %v382_v0, %v2508_v3 }
  0x94   : > { %2093 = vst [vmem:[%s2575_s19 + $0x830] sm:$0xff] %v1516_v38  ;;  %2094 = vst [vmem:[%s2575_s19 + $0x838] sm:$0xff] %v1517_v39  ;;  %vm961_vm14 = vcmp.eq.s32.totalorder %v383_v1, %v2508_v3  ;;  %v388_v12 = vld [vmem:[%s6029_s0 + $0x900] sm:$0xff]  ;;  %v389_v13 = vld [vmem:[%s6029_s0 + $0x908] sm:$0xff]  ;;  %v1534_v14 = vsel %vm958_vm11, 1.0, %v2480_v10  ;;  %v1535_v15 = vsel %vm959_vm12, 1.0, %v2480_v10  ;;  %vm962_vm15 = vcmp.eq.s32.totalorder %v384_v2, %v2508_v3 }
  0x95   : > { %2095 = vst [vmem:[%s2575_s19 + $0x840] sm:$0xff] %v1518_v44  ;;  %2096 = vst [vmem:[%s2575_s19 + $0x848] sm:$0xff] %v1519_v45  ;;  %v1536_v16 = vsel %vm960_vm13, 1.0, %v2480_v10  ;;  %v1537_v17 = vsel %vm961_vm14, 1.0, %v2480_v10  ;;  %v390_v18 = vld [vmem:[%s6029_s0 + $0x910] sm:$0xff]  ;;  %v391_v19 = vld [vmem:[%s6029_s0 + $0x918] sm:$0xff]  ;;  %vm963_vm1 = vcmp.eq.s32.totalorder %v385_v4, %v2508_v3  ;;  %vm964_vm2 = vcmp.eq.s32.totalorder %v386_v9, %v2508_v3 }
  0x96   : > { %2097 = vst [vmem:[%s2575_s19 + $0x850] sm:$0xff] %v1520_v46  ;;  %2098 = vst [vmem:[%s2575_s19 + $0x858] sm:$0xff] %v1521_v47  ;;  %vm965_vm3 = vcmp.eq.s32.totalorder %v387_v11, %v2508_v3  ;;  %v392_v20 = vld [vmem:[%s6029_s0 + $0x920] sm:$0xff]  ;;  %v393_v21 = vld [vmem:[%s6029_s0 + $0x928] sm:$0xff]  ;;  %v1538_v22 = vsel %vm962_vm15, 1.0, %v2480_v10  ;;  %v1539_v23 = vsel %vm963_vm1, 1.0, %v2480_v10  ;;  %vm966_vm4 = vcmp.eq.s32.totalorder %v388_v12, %v2508_v3 }
  0x97   : > { %2099 = vst [vmem:[%s2575_s19 + $0x860] sm:$0xff] %v1522_v52  ;;  %2100 = vst.msk [vmem:[%s2575_s19 + $0x868] sm:$0xff] %vm1838_vm0, %v1523_v53  ;;  %v1540_v24 = vsel %vm964_vm2, 1.0, %v2480_v10  ;;  %v1541_v25 = vsel %vm965_vm3, 1.0, %v2480_v10  ;;  %v394_v26 = vld [vmem:[%s6029_s0 + $0x930] sm:$0xff]  ;;  %v395_v27 = vld [vmem:[%s6029_s0 + $0x938] sm:$0xff]  ;;  %vm967_vm5 = vcmp.eq.s32.totalorder %v389_v13, %v2508_v3  ;;  %vm968_vm6 = vcmp.eq.s32.totalorder %v390_v18, %v2508_v3 }
  0x98   : > { %2101 = vst [vmem:[%s2575_s19 + $0x870] sm:$0xff] %v1524_v54  ;;  %2102 = vst [vmem:[%s2575_s19 + $0x878] sm:$0xff] %v1525_v55  ;;  %vm969_vm7 = vcmp.eq.s32.totalorder %v391_v19, %v2508_v3  ;;  %v396_v28 = vld [vmem:[%s6029_s0 + $0x940] sm:$0xff]  ;;  %v397_v29 = vld [vmem:[%s6029_s0 + $0x948] sm:$0xff]  ;;  %v1542_v30 = vsel %vm966_vm4, 1.0, %v2480_v10  ;;  %v1543_v31 = vsel %vm967_vm5, 1.0, %v2480_v10  ;;  %vm970_vm8 = vcmp.eq.s32.totalorder %v392_v20, %v2508_v3 }
  0x99   : > { %2103 = vst [vmem:[%s2575_s19 + $0x880] sm:$0xff] %v1526_v60  ;;  %2104 = vst [vmem:[%s2575_s19 + $0x888] sm:$0xff] %v1527_v61  ;;  %v1544_v32 = vsel %vm968_vm6, 1.0, %v2480_v10  ;;  %v1545_v33 = vsel %vm969_vm7, 1.0, %v2480_v10  ;;  %v398_v34 = vld [vmem:[%s6029_s0 + $0x950] sm:$0xff]  ;;  %v399_v35 = vld [vmem:[%s6029_s0 + $0x958] sm:$0xff]  ;;  %vm971_vm9 = vcmp.eq.s32.totalorder %v393_v21, %v2508_v3  ;;  %vm972_vm10 = vcmp.eq.s32.totalorder %v394_v26, %v2508_v3 }
  0x9a   : > { %2105 = vst [vmem:[%s2575_s19 + $0x890] sm:$0xff] %v1528_v62  ;;  %2106 = vst [vmem:[%s2575_s19 + $0x898] sm:$0xff] %v1529_v63  ;;  %vm973_vm11 = vcmp.eq.s32.totalorder %v395_v27, %v2508_v3  ;;  %v400_v36 = vld [vmem:[%s6029_s0 + $0x960] sm:$0xff]  ;;  %v401_v37 = vld [vmem:[%s6029_s0 + $0x968] sm:$0xff]  ;;  %v1546_v38 = vsel %vm970_vm8, 1.0, %v2480_v10  ;;  %v1547_v39 = vsel %vm971_vm9, 1.0, %v2480_v10  ;;  %vm974_vm12 = vcmp.eq.s32.totalorder %v396_v28, %v2508_v3 }
  0x9b   : > { %2107 = vst [vmem:[%s2575_s19 + $0x8a0] sm:$0xff] %v1530_v5  ;;  %2108 = vst [vmem:[%s2575_s19 + $0x8a8] sm:$0xff] %v1531_v6  ;;  %v1548_v40 = vsel %vm972_vm10, 1.0, %v2480_v10  ;;  %v1549_v41 = vsel %vm973_vm11, 1.0, %v2480_v10  ;;  %v402_v42 = vld [vmem:[%s6029_s0 + $0x970] sm:$0xff]  ;;  %v403_v43 = vld [vmem:[%s6029_s0 + $0x978] sm:$0xff]  ;;  %vm975_vm13 = vcmp.eq.s32.totalorder %v397_v29, %v2508_v3  ;;  %vm976_vm14 = vcmp.eq.s32.totalorder %v398_v34, %v2508_v3 }
  0x9c   : > { %2109 = vst.msk [vmem:[%s2575_s19 + $0x8b0] sm:$0xff] %vm1838_vm0, %v1532_v7  ;;  %2110 = vst [vmem:[%s2575_s19 + $0x8b8] sm:$0xff] %v1533_v8  ;;  %vm977_vm15 = vcmp.eq.s32.totalorder %v399_v35, %v2508_v3  ;;  %v404_v44 = vld [vmem:[%s6029_s0 + $0x980] sm:$0xff]  ;;  %v405_v45 = vld [vmem:[%s6029_s0 + $0x988] sm:$0xff]  ;;  %v1550_v46 = vsel %vm974_vm12, 1.0, %v2480_v10  ;;  %v1551_v47 = vsel %vm975_vm13, 1.0, %v2480_v10  ;;  %vm978_vm1 = vcmp.eq.s32.totalorder %v400_v36, %v2508_v3 }
  0x9d   : > { %2111 = vst [vmem:[%s2575_s19 + $0x8c0] sm:$0xff] %v1534_v14  ;;  %2112 = vst [vmem:[%s2575_s19 + $0x8c8] sm:$0xff] %v1535_v15  ;;  %v1552_v48 = vsel %vm976_vm14, 1.0, %v2480_v10  ;;  %v1553_v49 = vsel %vm977_vm15, 1.0, %v2480_v10  ;;  %v406_v50 = vld [vmem:[%s6029_s0 + $0x990] sm:$0xff]  ;;  %v407_v51 = vld [vmem:[%s6029_s0 + $0x998] sm:$0xff]  ;;  %vm979_vm2 = vcmp.eq.s32.totalorder %v401_v37, %v2508_v3  ;;  %vm980_vm3 = vcmp.eq.s32.totalorder %v402_v42, %v2508_v3 }
  0x9e   : > { %2113 = vst [vmem:[%s2575_s19 + $0x8d0] sm:$0xff] %v1536_v16  ;;  %2114 = vst [vmem:[%s2575_s19 + $0x8d8] sm:$0xff] %v1537_v17  ;;  %vm981_vm4 = vcmp.eq.s32.totalorder %v403_v43, %v2508_v3  ;;  %v408_v52 = vld [vmem:[%s6029_s0 + $0x9a0] sm:$0xff]  ;;  %v409_v53 = vld [vmem:[%s6029_s0 + $0x9a8] sm:$0xff]  ;;  %v1554_v54 = vsel %vm978_vm1, 1.0, %v2480_v10  ;;  %v1555_v55 = vsel %vm979_vm2, 1.0, %v2480_v10  ;;  %vm982_vm5 = vcmp.eq.s32.totalorder %v404_v44, %v2508_v3 }
  0x9f   : > { %2115 = vst [vmem:[%s2575_s19 + $0x8e0] sm:$0xff] %v1538_v22  ;;  %2116 = vst [vmem:[%s2575_s19 + $0x8e8] sm:$0xff] %v1539_v23  ;;  %v1556_v56 = vsel %vm980_vm3, 1.0, %v2480_v10  ;;  %v1557_v57 = vsel %vm981_vm4, 1.0, %v2480_v10  ;;  %v410_v58 = vld [vmem:[%s6029_s0 + $0x9b0] sm:$0xff]  ;;  %v411_v59 = vld [vmem:[%s6029_s0 + $0x9b8] sm:$0xff]  ;;  %vm983_vm6 = vcmp.eq.s32.totalorder %v405_v45, %v2508_v3  ;;  %vm984_vm7 = vcmp.eq.s32.totalorder %v406_v50, %v2508_v3 }
  0xa0   : > { %2117 = vst [vmem:[%s2575_s19 + $0x8f0] sm:$0xff] %v1540_v24  ;;  %2118 = vst.msk [vmem:[%s2575_s19 + $0x8f8] sm:$0xff] %vm1838_vm0, %v1541_v25  ;;  %vm985_vm8 = vcmp.eq.s32.totalorder %v407_v51, %v2508_v3  ;;  %v412_v60 = vld [vmem:[%s6029_s0 + $0x9c0] sm:$0xff]  ;;  %v413_v61 = vld [vmem:[%s6029_s0 + $0x9c8] sm:$0xff]  ;;  %v1558_v62 = vsel %vm982_vm5, 1.0, %v2480_v10  ;;  %v1559_v63 = vsel %vm983_vm6, 1.0, %v2480_v10  ;;  %vm986_vm9 = vcmp.eq.s32.totalorder %v408_v52, %v2508_v3 }
  0xa1   : > { %2119 = vst [vmem:[%s2575_s19 + $0x900] sm:$0xff] %v1542_v30  ;;  %2120 = vst [vmem:[%s2575_s19 + $0x908] sm:$0xff] %v1543_v31  ;;  %v1560_v0 = vsel %vm984_vm7, 1.0, %v2480_v10  ;;  %v1561_v1 = vsel %vm985_vm8, 1.0, %v2480_v10  ;;  %v414_v2 = vld [vmem:[%s6029_s0 + $0x9d0] sm:$0xff]  ;;  %v415_v4 = vld [vmem:[%s6029_s0 + $0x9d8] sm:$0xff]  ;;  %vm987_vm10 = vcmp.eq.s32.totalorder %v409_v53, %v2508_v3  ;;  %vm988_vm11 = vcmp.eq.s32.totalorder %v410_v58, %v2508_v3 }
  0xa2   : > { %2121 = vst [vmem:[%s2575_s19 + $0x910] sm:$0xff] %v1544_v32  ;;  %2122 = vst [vmem:[%s2575_s19 + $0x918] sm:$0xff] %v1545_v33  ;;  %vm989_vm12 = vcmp.eq.s32.totalorder %v411_v59, %v2508_v3  ;;  %v416_v5 = vld [vmem:[%s6029_s0 + $0x9e0] sm:$0xff]  ;;  %v417_v6 = vld [vmem:[%s6029_s0 + $0x9e8] sm:$0xff]  ;;  %v1562_v7 = vsel %vm986_vm9, 1.0, %v2480_v10  ;;  %v1563_v8 = vsel %vm987_vm10, 1.0, %v2480_v10  ;;  %vm990_vm13 = vcmp.eq.s32.totalorder %v412_v60, %v2508_v3 }
  0xa3   : > { %2123 = vst [vmem:[%s2575_s19 + $0x920] sm:$0xff] %v1546_v38  ;;  %2124 = vst [vmem:[%s2575_s19 + $0x928] sm:$0xff] %v1547_v39  ;;  %v1564_v9 = vsel %vm988_vm11, 1.0, %v2480_v10  ;;  %v1565_v11 = vsel %vm989_vm12, 1.0, %v2480_v10  ;;  %v418_v12 = vld [vmem:[%s6029_s0 + $0x9f0] sm:$0xff]  ;;  %v419_v13 = vld [vmem:[%s6029_s0 + $0x9f8] sm:$0xff]  ;;  %vm991_vm14 = vcmp.eq.s32.totalorder %v413_v61, %v2508_v3  ;;  %vm992_vm15 = vcmp.eq.s32.totalorder %v414_v2, %v2508_v3 }
  0xa4   : > { %2125 = vst [vmem:[%s2575_s19 + $0x930] sm:$0xff] %v1548_v40  ;;  %2126 = vst [vmem:[%s2575_s19 + $0x938] sm:$0xff] %v1549_v41  ;;  %vm993_vm1 = vcmp.eq.s32.totalorder %v415_v4, %v2508_v3  ;;  %v420_v14 = vld [vmem:[%s6029_s0 + $0xa00] sm:$0xff]  ;;  %v421_v15 = vld [vmem:[%s6029_s0 + $0xa08] sm:$0xff]  ;;  %v1566_v16 = vsel %vm990_vm13, 1.0, %v2480_v10  ;;  %v1567_v17 = vsel %vm991_vm14, 1.0, %v2480_v10  ;;  %vm994_vm2 = vcmp.eq.s32.totalorder %v416_v5, %v2508_v3 }
  0xa5   : > { %2127 = vst.msk [vmem:[%s2575_s19 + $0x940] sm:$0xff] %vm1838_vm0, %v1550_v46  ;;  %2128 = vst [vmem:[%s2575_s19 + $0x948] sm:$0xff] %v1551_v47  ;;  %v1568_v18 = vsel %vm992_vm15, 1.0, %v2480_v10  ;;  %v1569_v19 = vsel %vm993_vm1, 1.0, %v2480_v10  ;;  %v422_v20 = vld [vmem:[%s6029_s0 + $0xa10] sm:$0xff]  ;;  %v423_v21 = vld [vmem:[%s6029_s0 + $0xa18] sm:$0xff]  ;;  %vm995_vm3 = vcmp.eq.s32.totalorder %v417_v6, %v2508_v3  ;;  %vm996_vm4 = vcmp.eq.s32.totalorder %v418_v12, %v2508_v3 }
  0xa6   : > { %2129 = vst [vmem:[%s2575_s19 + $0x950] sm:$0xff] %v1552_v48  ;;  %2130 = vst [vmem:[%s2575_s19 + $0x958] sm:$0xff] %v1553_v49  ;;  %vm997_vm5 = vcmp.eq.s32.totalorder %v419_v13, %v2508_v3  ;;  %v424_v22 = vld [vmem:[%s6029_s0 + $0xa20] sm:$0xff]  ;;  %v425_v23 = vld [vmem:[%s6029_s0 + $0xa28] sm:$0xff]  ;;  %v1570_v24 = vsel %vm994_vm2, 1.0, %v2480_v10  ;;  %v1571_v25 = vsel %vm995_vm3, 1.0, %v2480_v10  ;;  %vm998_vm6 = vcmp.eq.s32.totalorder %v420_v14, %v2508_v3 }
  0xa7   : > { %2131 = vst [vmem:[%s2575_s19 + $0x960] sm:$0xff] %v1554_v54  ;;  %2132 = vst [vmem:[%s2575_s19 + $0x968] sm:$0xff] %v1555_v55  ;;  %v1572_v26 = vsel %vm996_vm4, 1.0, %v2480_v10  ;;  %v1573_v27 = vsel %vm997_vm5, 1.0, %v2480_v10  ;;  %v426_v28 = vld [vmem:[%s6029_s0 + $0xa30] sm:$0xff]  ;;  %v427_v29 = vld [vmem:[%s6029_s0 + $0xa38] sm:$0xff]  ;;  %vm999_vm7 = vcmp.eq.s32.totalorder %v421_v15, %v2508_v3  ;;  %vm1000_vm8 = vcmp.eq.s32.totalorder %v422_v20, %v2508_v3 }
  0xa8   : > { %2133 = vst [vmem:[%s2575_s19 + $0x970] sm:$0xff] %v1556_v56  ;;  %2134 = vst [vmem:[%s2575_s19 + $0x978] sm:$0xff] %v1557_v57  ;;  %vm1001_vm9 = vcmp.eq.s32.totalorder %v423_v21, %v2508_v3  ;;  %v428_v30 = vld [vmem:[%s6029_s0 + $0xa40] sm:$0xff]  ;;  %v429_v31 = vld [vmem:[%s6029_s0 + $0xa48] sm:$0xff]  ;;  %v1574_v32 = vsel %vm998_vm6, 1.0, %v2480_v10  ;;  %v1575_v33 = vsel %vm999_vm7, 1.0, %v2480_v10  ;;  %vm1002_vm10 = vcmp.eq.s32.totalorder %v424_v22, %v2508_v3 }
  0xa9   : > { %2135 = vst [vmem:[%s2575_s19 + $0x980] sm:$0xff] %v1558_v62  ;;  %2136 = vst.msk [vmem:[%s2575_s19 + $0x988] sm:$0xff] %vm1838_vm0, %v1559_v63  ;;  %v1576_v34 = vsel %vm1000_vm8, 1.0, %v2480_v10  ;;  %v1577_v35 = vsel %vm1001_vm9, 1.0, %v2480_v10  ;;  %v430_v36 = vld [vmem:[%s6029_s0 + $0xa50] sm:$0xff]  ;;  %v431_v37 = vld [vmem:[%s6029_s0 + $0xa58] sm:$0xff]  ;;  %vm1003_vm11 = vcmp.eq.s32.totalorder %v425_v23, %v2508_v3  ;;  %vm1004_vm12 = vcmp.eq.s32.totalorder %v426_v28, %v2508_v3 }
  0xaa   : > { %2137 = vst [vmem:[%s2575_s19 + $0x990] sm:$0xff] %v1560_v0  ;;  %2138 = vst [vmem:[%s2575_s19 + $0x998] sm:$0xff] %v1561_v1  ;;  %vm1005_vm13 = vcmp.eq.s32.totalorder %v427_v29, %v2508_v3  ;;  %v432_v38 = vld [vmem:[%s6029_s0 + $0xa60] sm:$0xff]  ;;  %v433_v39 = vld [vmem:[%s6029_s0 + $0xa68] sm:$0xff]  ;;  %v1578_v40 = vsel %vm1002_vm10, 1.0, %v2480_v10  ;;  %v1579_v41 = vsel %vm1003_vm11, 1.0, %v2480_v10  ;;  %vm1006_vm14 = vcmp.eq.s32.totalorder %v428_v30, %v2508_v3 }
  0xab   : > { %2139 = vst [vmem:[%s2575_s19 + $0x9a0] sm:$0xff] %v1562_v7  ;;  %2140 = vst [vmem:[%s2575_s19 + $0x9a8] sm:$0xff] %v1563_v8  ;;  %v1580_v42 = vsel %vm1004_vm12, 1.0, %v2480_v10  ;;  %v1581_v43 = vsel %vm1005_vm13, 1.0, %v2480_v10  ;;  %v434_v44 = vld [vmem:[%s6029_s0 + $0xa70] sm:$0xff]  ;;  %v435_v45 = vld [vmem:[%s6029_s0 + $0xa78] sm:$0xff]  ;;  %vm1007_vm15 = vcmp.eq.s32.totalorder %v429_v31, %v2508_v3  ;;  %vm1008_vm1 = vcmp.eq.s32.totalorder %v430_v36, %v2508_v3 }
  0xac   : > { %2141 = vst [vmem:[%s2575_s19 + $0x9b0] sm:$0xff] %v1564_v9  ;;  %2142 = vst [vmem:[%s2575_s19 + $0x9b8] sm:$0xff] %v1565_v11  ;;  %vm1009_vm2 = vcmp.eq.s32.totalorder %v431_v37, %v2508_v3  ;;  %v436_v46 = vld [vmem:[%s6029_s0 + $0xa80] sm:$0xff]  ;;  %v437_v47 = vld [vmem:[%s6029_s0 + $0xa88] sm:$0xff]  ;;  %v1582_v48 = vsel %vm1006_vm14, 1.0, %v2480_v10  ;;  %v1583_v49 = vsel %vm1007_vm15, 1.0, %v2480_v10  ;;  %vm1010_vm3 = vcmp.eq.s32.totalorder %v432_v38, %v2508_v3 }
  0xad   : > { %2143 = vst [vmem:[%s2575_s19 + $0x9c0] sm:$0xff] %v1566_v16  ;;  %2144 = vst [vmem:[%s2575_s19 + $0x9c8] sm:$0xff] %v1567_v17  ;;  %v1584_v50 = vsel %vm1008_vm1, 1.0, %v2480_v10  ;;  %v1585_v51 = vsel %vm1009_vm2, 1.0, %v2480_v10  ;;  %v438_v52 = vld [vmem:[%s6029_s0 + $0xa90] sm:$0xff]  ;;  %v439_v53 = vld [vmem:[%s6029_s0 + $0xa98] sm:$0xff]  ;;  %vm1011_vm4 = vcmp.eq.s32.totalorder %v433_v39, %v2508_v3  ;;  %vm1012_vm5 = vcmp.eq.s32.totalorder %v434_v44, %v2508_v3 }
  0xae   : > { %2145 = vst.msk [vmem:[%s2575_s19 + $0x9d0] sm:$0xff] %vm1838_vm0, %v1568_v18  ;;  %2146 = vst [vmem:[%s2575_s19 + $0x9d8] sm:$0xff] %v1569_v19  ;;  %vm1013_vm6 = vcmp.eq.s32.totalorder %v435_v45, %v2508_v3  ;;  %v440_v54 = vld [vmem:[%s6029_s0 + $0xaa0] sm:$0xff]  ;;  %v441_v55 = vld [vmem:[%s6029_s0 + $0xaa8] sm:$0xff]  ;;  %v1586_v56 = vsel %vm1010_vm3, 1.0, %v2480_v10  ;;  %v1587_v57 = vsel %vm1011_vm4, 1.0, %v2480_v10  ;;  %vm1014_vm7 = vcmp.eq.s32.totalorder %v436_v46, %v2508_v3 }
  0xaf   : > { %2147 = vst [vmem:[%s2575_s19 + $0x9e0] sm:$0xff] %v1570_v24  ;;  %2148 = vst [vmem:[%s2575_s19 + $0x9e8] sm:$0xff] %v1571_v25  ;;  %v1588_v58 = vsel %vm1012_vm5, 1.0, %v2480_v10  ;;  %v1589_v59 = vsel %vm1013_vm6, 1.0, %v2480_v10  ;;  %v442_v60 = vld [vmem:[%s6029_s0 + $0xab0] sm:$0xff]  ;;  %v443_v61 = vld [vmem:[%s6029_s0 + $0xab8] sm:$0xff]  ;;  %vm1015_vm8 = vcmp.eq.s32.totalorder %v437_v47, %v2508_v3  ;;  %vm1016_vm9 = vcmp.eq.s32.totalorder %v438_v52, %v2508_v3 }
  0xb0   : > { %2149 = vst [vmem:[%s2575_s19 + $0x9f0] sm:$0xff] %v1572_v26  ;;  %2150 = vst [vmem:[%s2575_s19 + $0x9f8] sm:$0xff] %v1573_v27  ;;  %vm1017_vm10 = vcmp.eq.s32.totalorder %v439_v53, %v2508_v3  ;;  %v444_v62 = vld [vmem:[%s6029_s0 + $0xac0] sm:$0xff]  ;;  %v445_v63 = vld [vmem:[%s6029_s0 + $0xac8] sm:$0xff]  ;;  %v1590_v0 = vsel %vm1014_vm7, 1.0, %v2480_v10  ;;  %v1591_v1 = vsel %vm1015_vm8, 1.0, %v2480_v10  ;;  %vm1018_vm11 = vcmp.eq.s32.totalorder %v440_v54, %v2508_v3 }
  0xb1   : > { %2151 = vst [vmem:[%s2575_s19 + $0xa00] sm:$0xff] %v1574_v32  ;;  %2152 = vst [vmem:[%s2575_s19 + $0xa08] sm:$0xff] %v1575_v33  ;;  %v1592_v2 = vsel %vm1016_vm9, 1.0, %v2480_v10  ;;  %v1593_v4 = vsel %vm1017_vm10, 1.0, %v2480_v10  ;;  %v446_v5 = vld [vmem:[%s6029_s0 + $0xad0] sm:$0xff]  ;;  %v447_v6 = vld [vmem:[%s6029_s0 + $0xad8] sm:$0xff]  ;;  %vm1019_vm12 = vcmp.eq.s32.totalorder %v441_v55, %v2508_v3  ;;  %vm1020_vm13 = vcmp.eq.s32.totalorder %v442_v60, %v2508_v3 }
  0xb2   : > { %2153 = vst [vmem:[%s2575_s19 + $0xa10] sm:$0xff] %v1576_v34  ;;  %2154 = vst.msk [vmem:[%s2575_s19 + $0xa18] sm:$0xff] %vm1838_vm0, %v1577_v35  ;;  %vm1021_vm14 = vcmp.eq.s32.totalorder %v443_v61, %v2508_v3  ;;  %v448_v7 = vld [vmem:[%s6029_s0 + $0xae0] sm:$0xff]  ;;  %v449_v8 = vld [vmem:[%s6029_s0 + $0xae8] sm:$0xff]  ;;  %v1594_v9 = vsel %vm1018_vm11, 1.0, %v2480_v10  ;;  %v1595_v11 = vsel %vm1019_vm12, 1.0, %v2480_v10  ;;  %vm1022_vm15 = vcmp.eq.s32.totalorder %v444_v62, %v2508_v3 }
  0xb3   : > { %2155 = vst [vmem:[%s2575_s19 + $0xa20] sm:$0xff] %v1578_v40  ;;  %2156 = vst [vmem:[%s2575_s19 + $0xa28] sm:$0xff] %v1579_v41  ;;  %v1596_v12 = vsel %vm1020_vm13, 1.0, %v2480_v10  ;;  %v1597_v13 = vsel %vm1021_vm14, 1.0, %v2480_v10  ;;  %v450_v14 = vld [vmem:[%s6029_s0 + $0xaf0] sm:$0xff]  ;;  %v451_v15 = vld [vmem:[%s6029_s0 + $0xaf8] sm:$0xff]  ;;  %vm1023_vm1 = vcmp.eq.s32.totalorder %v445_v63, %v2508_v3  ;;  %vm1024_vm2 = vcmp.eq.s32.totalorder %v446_v5, %v2508_v3 }
  0xb4   : > { %2157 = vst [vmem:[%s2575_s19 + $0xa30] sm:$0xff] %v1580_v42  ;;  %2158 = vst [vmem:[%s2575_s19 + $0xa38] sm:$0xff] %v1581_v43  ;;  %vm1025_vm3 = vcmp.eq.s32.totalorder %v447_v6, %v2508_v3  ;;  %v452_v16 = vld [vmem:[%s6029_s0 + $0xb00] sm:$0xff]  ;;  %v453_v17 = vld [vmem:[%s6029_s0 + $0xb08] sm:$0xff]  ;;  %v1598_v18 = vsel %vm1022_vm15, 1.0, %v2480_v10  ;;  %v1599_v19 = vsel %vm1023_vm1, 1.0, %v2480_v10  ;;  %vm1026_vm4 = vcmp.eq.s32.totalorder %v448_v7, %v2508_v3 }
  0xb5   : > { %2159 = vst [vmem:[%s2575_s19 + $0xa40] sm:$0xff] %v1582_v48  ;;  %2160 = vst [vmem:[%s2575_s19 + $0xa48] sm:$0xff] %v1583_v49  ;;  %v1600_v20 = vsel %vm1024_vm2, 1.0, %v2480_v10  ;;  %v1601_v21 = vsel %vm1025_vm3, 1.0, %v2480_v10  ;;  %v454_v22 = vld [vmem:[%s6029_s0 + $0xb10] sm:$0xff]  ;;  %v455_v23 = vld [vmem:[%s6029_s0 + $0xb18] sm:$0xff]  ;;  %vm1027_vm5 = vcmp.eq.s32.totalorder %v449_v8, %v2508_v3  ;;  %vm1028_vm6 = vcmp.eq.s32.totalorder %v450_v14, %v2508_v3 }
  0xb6   : > { %2161 = vst [vmem:[%s2575_s19 + $0xa50] sm:$0xff] %v1584_v50  ;;  %2162 = vst [vmem:[%s2575_s19 + $0xa58] sm:$0xff] %v1585_v51  ;;  %vm1029_vm7 = vcmp.eq.s32.totalorder %v451_v15, %v2508_v3  ;;  %v456_v24 = vld [vmem:[%s6029_s0 + $0xb20] sm:$0xff]  ;;  %v457_v25 = vld [vmem:[%s6029_s0 + $0xb28] sm:$0xff]  ;;  %v1602_v26 = vsel %vm1026_vm4, 1.0, %v2480_v10  ;;  %v1603_v27 = vsel %vm1027_vm5, 1.0, %v2480_v10  ;;  %vm1030_vm8 = vcmp.eq.s32.totalorder %v452_v16, %v2508_v3 }
  0xb7   : > { %2163 = vst.msk [vmem:[%s2575_s19 + $0xa60] sm:$0xff] %vm1838_vm0, %v1586_v56  ;;  %2164 = vst [vmem:[%s2575_s19 + $0xa68] sm:$0xff] %v1587_v57  ;;  %v1604_v28 = vsel %vm1028_vm6, 1.0, %v2480_v10  ;;  %v1605_v29 = vsel %vm1029_vm7, 1.0, %v2480_v10  ;;  %v458_v30 = vld [vmem:[%s6029_s0 + $0xb30] sm:$0xff]  ;;  %v459_v31 = vld [vmem:[%s6029_s0 + $0xb38] sm:$0xff]  ;;  %vm1031_vm9 = vcmp.eq.s32.totalorder %v453_v17, %v2508_v3  ;;  %vm1032_vm10 = vcmp.eq.s32.totalorder %v454_v22, %v2508_v3 }
  0xb8   : > { %2165 = vst [vmem:[%s2575_s19 + $0xa70] sm:$0xff] %v1588_v58  ;;  %2166 = vst [vmem:[%s2575_s19 + $0xa78] sm:$0xff] %v1589_v59  ;;  %vm1033_vm11 = vcmp.eq.s32.totalorder %v455_v23, %v2508_v3  ;;  %v460_v32 = vld [vmem:[%s6029_s0 + $0xb40] sm:$0xff]  ;;  %v461_v33 = vld [vmem:[%s6029_s0 + $0xb48] sm:$0xff]  ;;  %v1606_v34 = vsel %vm1030_vm8, 1.0, %v2480_v10  ;;  %v1607_v35 = vsel %vm1031_vm9, 1.0, %v2480_v10  ;;  %vm1034_vm12 = vcmp.eq.s32.totalorder %v456_v24, %v2508_v3 }
  0xb9   : > { %2167 = vst [vmem:[%s2575_s19 + $0xa80] sm:$0xff] %v1590_v0  ;;  %2168 = vst [vmem:[%s2575_s19 + $0xa88] sm:$0xff] %v1591_v1  ;;  %v1608_v36 = vsel %vm1032_vm10, 1.0, %v2480_v10  ;;  %v1609_v37 = vsel %vm1033_vm11, 1.0, %v2480_v10  ;;  %v462_v38 = vld [vmem:[%s6029_s0 + $0xb50] sm:$0xff]  ;;  %v463_v39 = vld [vmem:[%s6029_s0 + $0xb58] sm:$0xff]  ;;  %vm1035_vm13 = vcmp.eq.s32.totalorder %v457_v25, %v2508_v3  ;;  %vm1036_vm14 = vcmp.eq.s32.totalorder %v458_v30, %v2508_v3 }
  0xba   : > { %2169 = vst [vmem:[%s2575_s19 + $0xa90] sm:$0xff] %v1592_v2  ;;  %2170 = vst [vmem:[%s2575_s19 + $0xa98] sm:$0xff] %v1593_v4  ;;  %vm1037_vm15 = vcmp.eq.s32.totalorder %v459_v31, %v2508_v3  ;;  %v464_v40 = vld [vmem:[%s6029_s0 + $0xb60] sm:$0xff]  ;;  %v465_v41 = vld [vmem:[%s6029_s0 + $0xb68] sm:$0xff]  ;;  %v1610_v42 = vsel %vm1034_vm12, 1.0, %v2480_v10  ;;  %v1611_v43 = vsel %vm1035_vm13, 1.0, %v2480_v10  ;;  %vm1038_vm1 = vcmp.eq.s32.totalorder %v460_v32, %v2508_v3 }
  0xbb   : > { %2171 = vst [vmem:[%s2575_s19 + $0xaa0] sm:$0xff] %v1594_v9  ;;  %2172 = vst.msk [vmem:[%s2575_s19 + $0xaa8] sm:$0xff] %vm1838_vm0, %v1595_v11  ;;  %v1612_v44 = vsel %vm1036_vm14, 1.0, %v2480_v10  ;;  %v1613_v45 = vsel %vm1037_vm15, 1.0, %v2480_v10  ;;  %v466_v46 = vld [vmem:[%s6029_s0 + $0xb70] sm:$0xff]  ;;  %v467_v47 = vld [vmem:[%s6029_s0 + $0xb78] sm:$0xff]  ;;  %vm1039_vm2 = vcmp.eq.s32.totalorder %v461_v33, %v2508_v3  ;;  %vm1040_vm3 = vcmp.eq.s32.totalorder %v462_v38, %v2508_v3 }
  0xbc   : > { %2173 = vst [vmem:[%s2575_s19 + $0xab0] sm:$0xff] %v1596_v12  ;;  %2174 = vst [vmem:[%s2575_s19 + $0xab8] sm:$0xff] %v1597_v13  ;;  %vm1041_vm4 = vcmp.eq.s32.totalorder %v463_v39, %v2508_v3  ;;  %v468_v48 = vld [vmem:[%s6029_s0 + $0xb80] sm:$0xff]  ;;  %v469_v49 = vld [vmem:[%s6029_s0 + $0xb88] sm:$0xff]  ;;  %v1614_v50 = vsel %vm1038_vm1, 1.0, %v2480_v10  ;;  %v1615_v51 = vsel %vm1039_vm2, 1.0, %v2480_v10  ;;  %vm1042_vm5 = vcmp.eq.s32.totalorder %v464_v40, %v2508_v3 }
  0xbd   : > { %2175 = vst [vmem:[%s2575_s19 + $0xac0] sm:$0xff] %v1598_v18  ;;  %2176 = vst [vmem:[%s2575_s19 + $0xac8] sm:$0xff] %v1599_v19  ;;  %v1616_v52 = vsel %vm1040_vm3, 1.0, %v2480_v10  ;;  %v1617_v53 = vsel %vm1041_vm4, 1.0, %v2480_v10  ;;  %v470_v54 = vld [vmem:[%s6029_s0 + $0xb90] sm:$0xff]  ;;  %v471_v55 = vld [vmem:[%s6029_s0 + $0xb98] sm:$0xff]  ;;  %vm1043_vm6 = vcmp.eq.s32.totalorder %v465_v41, %v2508_v3  ;;  %vm1044_vm7 = vcmp.eq.s32.totalorder %v466_v46, %v2508_v3 }
  0xbe   : > { %2177 = vst [vmem:[%s2575_s19 + $0xad0] sm:$0xff] %v1600_v20  ;;  %2178 = vst [vmem:[%s2575_s19 + $0xad8] sm:$0xff] %v1601_v21  ;;  %vm1045_vm8 = vcmp.eq.s32.totalorder %v467_v47, %v2508_v3  ;;  %v472_v56 = vld [vmem:[%s6029_s0 + $0xba0] sm:$0xff]  ;;  %v473_v57 = vld [vmem:[%s6029_s0 + $0xba8] sm:$0xff]  ;;  %v1618_v58 = vsel %vm1042_vm5, 1.0, %v2480_v10  ;;  %v1619_v59 = vsel %vm1043_vm6, 1.0, %v2480_v10  ;;  %vm1046_vm9 = vcmp.eq.s32.totalorder %v468_v48, %v2508_v3 }
  0xbf   : > { %2179 = vst [vmem:[%s2575_s19 + $0xae0] sm:$0xff] %v1602_v26  ;;  %2180 = vst [vmem:[%s2575_s19 + $0xae8] sm:$0xff] %v1603_v27  ;;  %v1620_v60 = vsel %vm1044_vm7, 1.0, %v2480_v10  ;;  %v1621_v61 = vsel %vm1045_vm8, 1.0, %v2480_v10  ;;  %v474_v62 = vld [vmem:[%s6029_s0 + $0xbb0] sm:$0xff]  ;;  %v475_v63 = vld [vmem:[%s6029_s0 + $0xbb8] sm:$0xff]  ;;  %vm1047_vm10 = vcmp.eq.s32.totalorder %v469_v49, %v2508_v3  ;;  %vm1048_vm11 = vcmp.eq.s32.totalorder %v470_v54, %v2508_v3 }
  0xc0   : > { %2181 = vst.msk [vmem:[%s2575_s19 + $0xaf0] sm:$0xff] %vm1838_vm0, %v1604_v28  ;;  %2182 = vst [vmem:[%s2575_s19 + $0xaf8] sm:$0xff] %v1605_v29  ;;  %vm1049_vm12 = vcmp.eq.s32.totalorder %v471_v55, %v2508_v3  ;;  %v476_v0 = vld [vmem:[%s6029_s0 + $0xbc0] sm:$0xff]  ;;  %v477_v1 = vld [vmem:[%s6029_s0 + $0xbc8] sm:$0xff]  ;;  %v1622_v2 = vsel %vm1046_vm9, 1.0, %v2480_v10  ;;  %v1623_v4 = vsel %vm1047_vm10, 1.0, %v2480_v10  ;;  %vm1050_vm13 = vcmp.eq.s32.totalorder %v472_v56, %v2508_v3 }
  0xc1   : > { %2183 = vst [vmem:[%s2575_s19 + $0xb00] sm:$0xff] %v1606_v34  ;;  %2184 = vst [vmem:[%s2575_s19 + $0xb08] sm:$0xff] %v1607_v35  ;;  %v1624_v5 = vsel %vm1048_vm11, 1.0, %v2480_v10  ;;  %v1625_v6 = vsel %vm1049_vm12, 1.0, %v2480_v10  ;;  %v478_v7 = vld [vmem:[%s6029_s0 + $0xbd0] sm:$0xff]  ;;  %v479_v8 = vld [vmem:[%s6029_s0 + $0xbd8] sm:$0xff]  ;;  %vm1051_vm14 = vcmp.eq.s32.totalorder %v473_v57, %v2508_v3  ;;  %vm1052_vm15 = vcmp.eq.s32.totalorder %v474_v62, %v2508_v3 }
  0xc2   : > { %2185 = vst [vmem:[%s2575_s19 + $0xb10] sm:$0xff] %v1608_v36  ;;  %2186 = vst [vmem:[%s2575_s19 + $0xb18] sm:$0xff] %v1609_v37  ;;  %vm1053_vm1 = vcmp.eq.s32.totalorder %v475_v63, %v2508_v3  ;;  %v480_v9 = vld [vmem:[%s6029_s0 + $0xbe0] sm:$0xff]  ;;  %v481_v11 = vld [vmem:[%s6029_s0 + $0xbe8] sm:$0xff]  ;;  %v1626_v12 = vsel %vm1050_vm13, 1.0, %v2480_v10  ;;  %v1627_v13 = vsel %vm1051_vm14, 1.0, %v2480_v10  ;;  %vm1054_vm2 = vcmp.eq.s32.totalorder %v476_v0, %v2508_v3 }
  0xc3   : > { %2187 = vst [vmem:[%s2575_s19 + $0xb20] sm:$0xff] %v1610_v42  ;;  %2188 = vst [vmem:[%s2575_s19 + $0xb28] sm:$0xff] %v1611_v43  ;;  %v1628_v14 = vsel %vm1052_vm15, 1.0, %v2480_v10  ;;  %v1629_v15 = vsel %vm1053_vm1, 1.0, %v2480_v10  ;;  %v482_v16 = vld [vmem:[%s6029_s0 + $0xbf0] sm:$0xff]  ;;  %v483_v17 = vld [vmem:[%s6029_s0 + $0xbf8] sm:$0xff]  ;;  %vm1055_vm3 = vcmp.eq.s32.totalorder %v477_v1, %v2508_v3  ;;  %vm1056_vm4 = vcmp.eq.s32.totalorder %v478_v7, %v2508_v3 }
  0xc4   : > { %2189 = vst [vmem:[%s2575_s19 + $0xb30] sm:$0xff] %v1612_v44  ;;  %2190 = vst.msk [vmem:[%s2575_s19 + $0xb38] sm:$0xff] %vm1838_vm0, %v1613_v45  ;;  %vm1057_vm5 = vcmp.eq.s32.totalorder %v479_v8, %v2508_v3  ;;  %v484_v18 = vld [vmem:[%s6029_s0 + $0xc00] sm:$0xff]  ;;  %v485_v19 = vld [vmem:[%s6029_s0 + $0xc08] sm:$0xff]  ;;  %v1630_v20 = vsel %vm1054_vm2, 1.0, %v2480_v10  ;;  %v1631_v21 = vsel %vm1055_vm3, 1.0, %v2480_v10  ;;  %vm1058_vm6 = vcmp.eq.s32.totalorder %v480_v9, %v2508_v3 }
  0xc5   : > { %2191 = vst [vmem:[%s2575_s19 + $0xb40] sm:$0xff] %v1614_v50  ;;  %2192 = vst [vmem:[%s2575_s19 + $0xb48] sm:$0xff] %v1615_v51  ;;  %v1632_v22 = vsel %vm1056_vm4, 1.0, %v2480_v10  ;;  %v1633_v23 = vsel %vm1057_vm5, 1.0, %v2480_v10  ;;  %v486_v24 = vld [vmem:[%s6029_s0 + $0xc10] sm:$0xff]  ;;  %v487_v25 = vld [vmem:[%s6029_s0 + $0xc18] sm:$0xff]  ;;  %vm1059_vm7 = vcmp.eq.s32.totalorder %v481_v11, %v2508_v3  ;;  %vm1060_vm8 = vcmp.eq.s32.totalorder %v482_v16, %v2508_v3 }
  0xc6   : > { %2193 = vst [vmem:[%s2575_s19 + $0xb50] sm:$0xff] %v1616_v52  ;;  %2194 = vst [vmem:[%s2575_s19 + $0xb58] sm:$0xff] %v1617_v53  ;;  %vm1061_vm9 = vcmp.eq.s32.totalorder %v483_v17, %v2508_v3  ;;  %v488_v26 = vld [vmem:[%s6029_s0 + $0xc20] sm:$0xff]  ;;  %v489_v27 = vld [vmem:[%s6029_s0 + $0xc28] sm:$0xff]  ;;  %v1634_v28 = vsel %vm1058_vm6, 1.0, %v2480_v10  ;;  %v1635_v29 = vsel %vm1059_vm7, 1.0, %v2480_v10  ;;  %vm1062_vm10 = vcmp.eq.s32.totalorder %v484_v18, %v2508_v3 }
  0xc7   : > { %2195 = vst [vmem:[%s2575_s19 + $0xb60] sm:$0xff] %v1618_v58  ;;  %2196 = vst [vmem:[%s2575_s19 + $0xb68] sm:$0xff] %v1619_v59  ;;  %v1636_v30 = vsel %vm1060_vm8, 1.0, %v2480_v10  ;;  %v1637_v31 = vsel %vm1061_vm9, 1.0, %v2480_v10  ;;  %v490_v32 = vld [vmem:[%s6029_s0 + $0xc30] sm:$0xff]  ;;  %v491_v33 = vld [vmem:[%s6029_s0 + $0xc38] sm:$0xff]  ;;  %vm1063_vm11 = vcmp.eq.s32.totalorder %v485_v19, %v2508_v3  ;;  %vm1064_vm12 = vcmp.eq.s32.totalorder %v486_v24, %v2508_v3 }
  0xc8   : > { %2197 = vst [vmem:[%s2575_s19 + $0xb70] sm:$0xff] %v1620_v60  ;;  %2198 = vst [vmem:[%s2575_s19 + $0xb78] sm:$0xff] %v1621_v61  ;;  %vm1065_vm13 = vcmp.eq.s32.totalorder %v487_v25, %v2508_v3  ;;  %v492_v34 = vld [vmem:[%s6029_s0 + $0xc40] sm:$0xff]  ;;  %v493_v35 = vld [vmem:[%s6029_s0 + $0xc48] sm:$0xff]  ;;  %v1638_v36 = vsel %vm1062_vm10, 1.0, %v2480_v10  ;;  %v1639_v37 = vsel %vm1063_vm11, 1.0, %v2480_v10  ;;  %vm1066_vm14 = vcmp.eq.s32.totalorder %v488_v26, %v2508_v3 }
  0xc9   : > { %2199 = vst.msk [vmem:[%s2575_s19 + $0xb80] sm:$0xff] %vm1838_vm0, %v1622_v2  ;;  %2200 = vst [vmem:[%s2575_s19 + $0xb88] sm:$0xff] %v1623_v4  ;;  %v1640_v38 = vsel %vm1064_vm12, 1.0, %v2480_v10  ;;  %v1641_v39 = vsel %vm1065_vm13, 1.0, %v2480_v10  ;;  %v494_v40 = vld [vmem:[%s6029_s0 + $0xc50] sm:$0xff]  ;;  %v495_v41 = vld [vmem:[%s6029_s0 + $0xc58] sm:$0xff]  ;;  %vm1067_vm15 = vcmp.eq.s32.totalorder %v489_v27, %v2508_v3  ;;  %vm1068_vm1 = vcmp.eq.s32.totalorder %v490_v32, %v2508_v3 }
  0xca   : > { %2201 = vst [vmem:[%s2575_s19 + $0xb90] sm:$0xff] %v1624_v5  ;;  %2202 = vst [vmem:[%s2575_s19 + $0xb98] sm:$0xff] %v1625_v6  ;;  %vm1069_vm2 = vcmp.eq.s32.totalorder %v491_v33, %v2508_v3  ;;  %v496_v42 = vld [vmem:[%s6029_s0 + $0xc60] sm:$0xff]  ;;  %v497_v43 = vld [vmem:[%s6029_s0 + $0xc68] sm:$0xff]  ;;  %v1642_v44 = vsel %vm1066_vm14, 1.0, %v2480_v10  ;;  %v1643_v45 = vsel %vm1067_vm15, 1.0, %v2480_v10  ;;  %vm1070_vm3 = vcmp.eq.s32.totalorder %v492_v34, %v2508_v3 }
  0xcb   : > { %2203 = vst [vmem:[%s2575_s19 + $0xba0] sm:$0xff] %v1626_v12  ;;  %2204 = vst [vmem:[%s2575_s19 + $0xba8] sm:$0xff] %v1627_v13  ;;  %v1644_v46 = vsel %vm1068_vm1, 1.0, %v2480_v10  ;;  %v1645_v47 = vsel %vm1069_vm2, 1.0, %v2480_v10  ;;  %v498_v48 = vld [vmem:[%s6029_s0 + $0xc70] sm:$0xff]  ;;  %v499_v49 = vld [vmem:[%s6029_s0 + $0xc78] sm:$0xff]  ;;  %vm1071_vm4 = vcmp.eq.s32.totalorder %v493_v35, %v2508_v3  ;;  %vm1072_vm5 = vcmp.eq.s32.totalorder %v494_v40, %v2508_v3 }
  0xcc   : > { %2205 = vst [vmem:[%s2575_s19 + $0xbb0] sm:$0xff] %v1628_v14  ;;  %2206 = vst [vmem:[%s2575_s19 + $0xbb8] sm:$0xff] %v1629_v15  ;;  %vm1073_vm6 = vcmp.eq.s32.totalorder %v495_v41, %v2508_v3  ;;  %v500_v50 = vld [vmem:[%s6029_s0 + $0xc80] sm:$0xff]  ;;  %v501_v51 = vld [vmem:[%s6029_s0 + $0xc88] sm:$0xff]  ;;  %v1646_v52 = vsel %vm1070_vm3, 1.0, %v2480_v10  ;;  %v1647_v53 = vsel %vm1071_vm4, 1.0, %v2480_v10  ;;  %vm1074_vm7 = vcmp.eq.s32.totalorder %v496_v42, %v2508_v3 }
  0xcd   : > { %2207 = vst [vmem:[%s2575_s19 + $0xbc0] sm:$0xff] %v1630_v20  ;;  %2208 = vst.msk [vmem:[%s2575_s19 + $0xbc8] sm:$0xff] %vm1838_vm0, %v1631_v21  ;;  %v1648_v54 = vsel %vm1072_vm5, 1.0, %v2480_v10  ;;  %v1649_v55 = vsel %vm1073_vm6, 1.0, %v2480_v10  ;;  %v502_v56 = vld [vmem:[%s6029_s0 + $0xc90] sm:$0xff]  ;;  %v503_v57 = vld [vmem:[%s6029_s0 + $0xc98] sm:$0xff]  ;;  %vm1075_vm8 = vcmp.eq.s32.totalorder %v497_v43, %v2508_v3  ;;  %vm1076_vm9 = vcmp.eq.s32.totalorder %v498_v48, %v2508_v3 }
  0xce   : > { %2209 = vst [vmem:[%s2575_s19 + $0xbd0] sm:$0xff] %v1632_v22  ;;  %2210 = vst [vmem:[%s2575_s19 + $0xbd8] sm:$0xff] %v1633_v23  ;;  %vm1077_vm10 = vcmp.eq.s32.totalorder %v499_v49, %v2508_v3  ;;  %v504_v58 = vld [vmem:[%s6029_s0 + $0xca0] sm:$0xff]  ;;  %v505_v59 = vld [vmem:[%s6029_s0 + $0xca8] sm:$0xff]  ;;  %v1650_v60 = vsel %vm1074_vm7, 1.0, %v2480_v10  ;;  %v1651_v61 = vsel %vm1075_vm8, 1.0, %v2480_v10  ;;  %vm1078_vm11 = vcmp.eq.s32.totalorder %v500_v50, %v2508_v3 }
  0xcf   : > { %2211 = vst [vmem:[%s2575_s19 + $0xbe0] sm:$0xff] %v1634_v28  ;;  %2212 = vst [vmem:[%s2575_s19 + $0xbe8] sm:$0xff] %v1635_v29  ;;  %v1652_v62 = vsel %vm1076_vm9, 1.0, %v2480_v10  ;;  %v1653_v63 = vsel %vm1077_vm10, 1.0, %v2480_v10  ;;  %v506_v0 = vld [vmem:[%s6029_s0 + $0xcb0] sm:$0xff]  ;;  %v507_v1 = vld [vmem:[%s6029_s0 + $0xcb8] sm:$0xff]  ;;  %vm1079_vm12 = vcmp.eq.s32.totalorder %v501_v51, %v2508_v3  ;;  %vm1080_vm13 = vcmp.eq.s32.totalorder %v502_v56, %v2508_v3 }
  0xd0   : > { %2213 = vst [vmem:[%s2575_s19 + $0xbf0] sm:$0xff] %v1636_v30  ;;  %2214 = vst [vmem:[%s2575_s19 + $0xbf8] sm:$0xff] %v1637_v31  ;;  %vm1081_vm14 = vcmp.eq.s32.totalorder %v503_v57, %v2508_v3  ;;  %v508_v2 = vld [vmem:[%s6029_s0 + $0xcc0] sm:$0xff]  ;;  %v509_v4 = vld [vmem:[%s6029_s0 + $0xcc8] sm:$0xff]  ;;  %v1654_v5 = vsel %vm1078_vm11, 1.0, %v2480_v10  ;;  %v1655_v6 = vsel %vm1079_vm12, 1.0, %v2480_v10  ;;  %vm1082_vm15 = vcmp.eq.s32.totalorder %v504_v58, %v2508_v3 }
  0xd1   : > { %2215 = vst [vmem:[%s2575_s19 + $0xc00] sm:$0xff] %v1638_v36  ;;  %2216 = vst [vmem:[%s2575_s19 + $0xc08] sm:$0xff] %v1639_v37  ;;  %v1656_v7 = vsel %vm1080_vm13, 1.0, %v2480_v10  ;;  %v1657_v8 = vsel %vm1081_vm14, 1.0, %v2480_v10  ;;  %v510_v9 = vld [vmem:[%s6029_s0 + $0xcd0] sm:$0xff]  ;;  %v511_v11 = vld [vmem:[%s6029_s0 + $0xcd8] sm:$0xff]  ;;  %vm1083_vm1 = vcmp.eq.s32.totalorder %v505_v59, %v2508_v3  ;;  %vm1084_vm2 = vcmp.eq.s32.totalorder %v506_v0, %v2508_v3 }
  0xd2   : > { %2217 = vst.msk [vmem:[%s2575_s19 + $0xc10] sm:$0xff] %vm1838_vm0, %v1640_v38  ;;  %2218 = vst [vmem:[%s2575_s19 + $0xc18] sm:$0xff] %v1641_v39  ;;  %vm1085_vm3 = vcmp.eq.s32.totalorder %v507_v1, %v2508_v3  ;;  %v512_v12 = vld [vmem:[%s6029_s0 + $0xce0] sm:$0xff]  ;;  %v513_v13 = vld [vmem:[%s6029_s0 + $0xce8] sm:$0xff]  ;;  %v1658_v14 = vsel %vm1082_vm15, 1.0, %v2480_v10  ;;  %v1659_v15 = vsel %vm1083_vm1, 1.0, %v2480_v10  ;;  %vm1086_vm4 = vcmp.eq.s32.totalorder %v508_v2, %v2508_v3 }
  0xd3   : > { %2219 = vst [vmem:[%s2575_s19 + $0xc20] sm:$0xff] %v1642_v44  ;;  %2220 = vst [vmem:[%s2575_s19 + $0xc28] sm:$0xff] %v1643_v45  ;;  %v1660_v16 = vsel %vm1084_vm2, 1.0, %v2480_v10  ;;  %v1661_v17 = vsel %vm1085_vm3, 1.0, %v2480_v10  ;;  %v514_v18 = vld [vmem:[%s6029_s0 + $0xcf0] sm:$0xff]  ;;  %v515_v19 = vld [vmem:[%s6029_s0 + $0xcf8] sm:$0xff]  ;;  %vm1087_vm5 = vcmp.eq.s32.totalorder %v509_v4, %v2508_v3  ;;  %vm1088_vm6 = vcmp.eq.s32.totalorder %v510_v9, %v2508_v3 }
  0xd4   : > { %2221 = vst [vmem:[%s2575_s19 + $0xc30] sm:$0xff] %v1644_v46  ;;  %2222 = vst [vmem:[%s2575_s19 + $0xc38] sm:$0xff] %v1645_v47  ;;  %vm1089_vm7 = vcmp.eq.s32.totalorder %v511_v11, %v2508_v3  ;;  %v516_v20 = vld [vmem:[%s6029_s0 + $0xd00] sm:$0xff]  ;;  %v517_v21 = vld [vmem:[%s6029_s0 + $0xd08] sm:$0xff]  ;;  %v1662_v22 = vsel %vm1086_vm4, 1.0, %v2480_v10  ;;  %v1663_v23 = vsel %vm1087_vm5, 1.0, %v2480_v10  ;;  %vm1090_vm8 = vcmp.eq.s32.totalorder %v512_v12, %v2508_v3 }
  0xd5   : > { %2223 = vst [vmem:[%s2575_s19 + $0xc40] sm:$0xff] %v1646_v52  ;;  %2224 = vst [vmem:[%s2575_s19 + $0xc48] sm:$0xff] %v1647_v53  ;;  %v1664_v24 = vsel %vm1088_vm6, 1.0, %v2480_v10  ;;  %v1665_v25 = vsel %vm1089_vm7, 1.0, %v2480_v10  ;;  %v518_v26 = vld [vmem:[%s6029_s0 + $0xd10] sm:$0xff]  ;;  %v519_v27 = vld [vmem:[%s6029_s0 + $0xd18] sm:$0xff]  ;;  %vm1091_vm9 = vcmp.eq.s32.totalorder %v513_v13, %v2508_v3  ;;  %vm1092_vm10 = vcmp.eq.s32.totalorder %v514_v18, %v2508_v3 }
  0xd6   : > { %2225 = vst [vmem:[%s2575_s19 + $0xc50] sm:$0xff] %v1648_v54  ;;  %2226 = vst.msk [vmem:[%s2575_s19 + $0xc58] sm:$0xff] %vm1838_vm0, %v1649_v55  ;;  %vm1093_vm11 = vcmp.eq.s32.totalorder %v515_v19, %v2508_v3  ;;  %v520_v28 = vld [vmem:[%s6029_s0 + $0xd20] sm:$0xff]  ;;  %v521_v29 = vld [vmem:[%s6029_s0 + $0xd28] sm:$0xff]  ;;  %v1666_v30 = vsel %vm1090_vm8, 1.0, %v2480_v10  ;;  %v1667_v31 = vsel %vm1091_vm9, 1.0, %v2480_v10  ;;  %vm1094_vm12 = vcmp.eq.s32.totalorder %v516_v20, %v2508_v3 }
  0xd7   : > { %2227 = vst [vmem:[%s2575_s19 + $0xc60] sm:$0xff] %v1650_v60  ;;  %2228 = vst [vmem:[%s2575_s19 + $0xc68] sm:$0xff] %v1651_v61  ;;  %v1668_v32 = vsel %vm1092_vm10, 1.0, %v2480_v10  ;;  %v1669_v33 = vsel %vm1093_vm11, 1.0, %v2480_v10  ;;  %v522_v34 = vld [vmem:[%s6029_s0 + $0xd30] sm:$0xff]  ;;  %v523_v35 = vld [vmem:[%s6029_s0 + $0xd38] sm:$0xff]  ;;  %vm1095_vm13 = vcmp.eq.s32.totalorder %v517_v21, %v2508_v3  ;;  %vm1096_vm14 = vcmp.eq.s32.totalorder %v518_v26, %v2508_v3 }
  0xd8   : > { %2229 = vst [vmem:[%s2575_s19 + $0xc70] sm:$0xff] %v1652_v62  ;;  %2230 = vst [vmem:[%s2575_s19 + $0xc78] sm:$0xff] %v1653_v63  ;;  %vm1097_vm15 = vcmp.eq.s32.totalorder %v519_v27, %v2508_v3  ;;  %v524_v36 = vld [vmem:[%s6029_s0 + $0xd40] sm:$0xff]  ;;  %v525_v37 = vld [vmem:[%s6029_s0 + $0xd48] sm:$0xff]  ;;  %v1670_v38 = vsel %vm1094_vm12, 1.0, %v2480_v10  ;;  %v1671_v39 = vsel %vm1095_vm13, 1.0, %v2480_v10  ;;  %vm1098_vm1 = vcmp.eq.s32.totalorder %v520_v28, %v2508_v3 }
  0xd9   : > { %2231 = vst [vmem:[%s2575_s19 + $0xc80] sm:$0xff] %v1654_v5  ;;  %2232 = vst [vmem:[%s2575_s19 + $0xc88] sm:$0xff] %v1655_v6  ;;  %v1672_v40 = vsel %vm1096_vm14, 1.0, %v2480_v10  ;;  %v1673_v41 = vsel %vm1097_vm15, 1.0, %v2480_v10  ;;  %v526_v42 = vld [vmem:[%s6029_s0 + $0xd50] sm:$0xff]  ;;  %v527_v43 = vld [vmem:[%s6029_s0 + $0xd58] sm:$0xff]  ;;  %vm1099_vm2 = vcmp.eq.s32.totalorder %v521_v29, %v2508_v3  ;;  %vm1100_vm3 = vcmp.eq.s32.totalorder %v522_v34, %v2508_v3 }
  0xda   : > { %2233 = vst [vmem:[%s2575_s19 + $0xc90] sm:$0xff] %v1656_v7  ;;  %2234 = vst [vmem:[%s2575_s19 + $0xc98] sm:$0xff] %v1657_v8  ;;  %vm1101_vm4 = vcmp.eq.s32.totalorder %v523_v35, %v2508_v3  ;;  %v528_v44 = vld [vmem:[%s6029_s0 + $0xd60] sm:$0xff]  ;;  %v529_v45 = vld [vmem:[%s6029_s0 + $0xd68] sm:$0xff]  ;;  %v1674_v46 = vsel %vm1098_vm1, 1.0, %v2480_v10  ;;  %v1675_v47 = vsel %vm1099_vm2, 1.0, %v2480_v10  ;;  %vm1102_vm5 = vcmp.eq.s32.totalorder %v524_v36, %v2508_v3 }
  0xdb   : > { %2235 = vst.msk [vmem:[%s2575_s19 + $0xca0] sm:$0xff] %vm1838_vm0, %v1658_v14  ;;  %2236 = vst [vmem:[%s2575_s19 + $0xca8] sm:$0xff] %v1659_v15  ;;  %v1676_v48 = vsel %vm1100_vm3, 1.0, %v2480_v10  ;;  %v1677_v49 = vsel %vm1101_vm4, 1.0, %v2480_v10  ;;  %v530_v50 = vld [vmem:[%s6029_s0 + $0xd70] sm:$0xff]  ;;  %v531_v51 = vld [vmem:[%s6029_s0 + $0xd78] sm:$0xff]  ;;  %vm1103_vm6 = vcmp.eq.s32.totalorder %v525_v37, %v2508_v3  ;;  %vm1104_vm7 = vcmp.eq.s32.totalorder %v526_v42, %v2508_v3 }
  0xdc   : > { %2237 = vst [vmem:[%s2575_s19 + $0xcb0] sm:$0xff] %v1660_v16  ;;  %2238 = vst [vmem:[%s2575_s19 + $0xcb8] sm:$0xff] %v1661_v17  ;;  %vm1105_vm8 = vcmp.eq.s32.totalorder %v527_v43, %v2508_v3  ;;  %v532_v52 = vld [vmem:[%s6029_s0 + $0xd80] sm:$0xff]  ;;  %v533_v53 = vld [vmem:[%s6029_s0 + $0xd88] sm:$0xff]  ;;  %v1678_v54 = vsel %vm1102_vm5, 1.0, %v2480_v10  ;;  %v1679_v55 = vsel %vm1103_vm6, 1.0, %v2480_v10  ;;  %vm1106_vm9 = vcmp.eq.s32.totalorder %v528_v44, %v2508_v3 }
  0xdd   : > { %2239 = vst [vmem:[%s2575_s19 + $0xcc0] sm:$0xff] %v1662_v22  ;;  %2240 = vst [vmem:[%s2575_s19 + $0xcc8] sm:$0xff] %v1663_v23  ;;  %v1680_v56 = vsel %vm1104_vm7, 1.0, %v2480_v10  ;;  %v1681_v57 = vsel %vm1105_vm8, 1.0, %v2480_v10  ;;  %v534_v58 = vld [vmem:[%s6029_s0 + $0xd90] sm:$0xff]  ;;  %v535_v59 = vld [vmem:[%s6029_s0 + $0xd98] sm:$0xff]  ;;  %vm1107_vm10 = vcmp.eq.s32.totalorder %v529_v45, %v2508_v3  ;;  %vm1108_vm11 = vcmp.eq.s32.totalorder %v530_v50, %v2508_v3 }
  0xde   : > { %2241 = vst [vmem:[%s2575_s19 + $0xcd0] sm:$0xff] %v1664_v24  ;;  %2242 = vst [vmem:[%s2575_s19 + $0xcd8] sm:$0xff] %v1665_v25  ;;  %vm1109_vm12 = vcmp.eq.s32.totalorder %v531_v51, %v2508_v3  ;;  %v536_v60 = vld [vmem:[%s6029_s0 + $0xda0] sm:$0xff]  ;;  %v537_v61 = vld [vmem:[%s6029_s0 + $0xda8] sm:$0xff]  ;;  %v1682_v62 = vsel %vm1106_vm9, 1.0, %v2480_v10  ;;  %v1683_v63 = vsel %vm1107_vm10, 1.0, %v2480_v10  ;;  %vm1110_vm13 = vcmp.eq.s32.totalorder %v532_v52, %v2508_v3 }
  0xdf   : > { %2243 = vst [vmem:[%s2575_s19 + $0xce0] sm:$0xff] %v1666_v30  ;;  %2244 = vst.msk [vmem:[%s2575_s19 + $0xce8] sm:$0xff] %vm1838_vm0, %v1667_v31  ;;  %v1684_v0 = vsel %vm1108_vm11, 1.0, %v2480_v10  ;;  %v1685_v1 = vsel %vm1109_vm12, 1.0, %v2480_v10  ;;  %v538_v2 = vld [vmem:[%s6029_s0 + $0xdb0] sm:$0xff]  ;;  %v539_v4 = vld [vmem:[%s6029_s0 + $0xdb8] sm:$0xff]  ;;  %vm1111_vm14 = vcmp.eq.s32.totalorder %v533_v53, %v2508_v3  ;;  %vm1112_vm15 = vcmp.eq.s32.totalorder %v534_v58, %v2508_v3 }
  0xe0   : > { %2245 = vst [vmem:[%s2575_s19 + $0xcf0] sm:$0xff] %v1668_v32  ;;  %2246 = vst [vmem:[%s2575_s19 + $0xcf8] sm:$0xff] %v1669_v33  ;;  %vm1113_vm1 = vcmp.eq.s32.totalorder %v535_v59, %v2508_v3  ;;  %v540_v5 = vld [vmem:[%s6029_s0 + $0xdc0] sm:$0xff]  ;;  %v541_v6 = vld [vmem:[%s6029_s0 + $0xdc8] sm:$0xff]  ;;  %v1686_v7 = vsel %vm1110_vm13, 1.0, %v2480_v10  ;;  %v1687_v8 = vsel %vm1111_vm14, 1.0, %v2480_v10  ;;  %vm1114_vm2 = vcmp.eq.s32.totalorder %v536_v60, %v2508_v3 }
  0xe1   : > { %2247 = vst [vmem:[%s2575_s19 + $0xd00] sm:$0xff] %v1670_v38  ;;  %2248 = vst [vmem:[%s2575_s19 + $0xd08] sm:$0xff] %v1671_v39  ;;  %v1688_v9 = vsel %vm1112_vm15, 1.0, %v2480_v10  ;;  %v1689_v11 = vsel %vm1113_vm1, 1.0, %v2480_v10  ;;  %v542_v12 = vld [vmem:[%s6029_s0 + $0xdd0] sm:$0xff]  ;;  %v543_v13 = vld [vmem:[%s6029_s0 + $0xdd8] sm:$0xff]  ;;  %vm1115_vm3 = vcmp.eq.s32.totalorder %v537_v61, %v2508_v3  ;;  %vm1116_vm4 = vcmp.eq.s32.totalorder %v538_v2, %v2508_v3 }
  0xe2   : > { %2249 = vst [vmem:[%s2575_s19 + $0xd10] sm:$0xff] %v1672_v40  ;;  %2250 = vst [vmem:[%s2575_s19 + $0xd18] sm:$0xff] %v1673_v41  ;;  %vm1117_vm5 = vcmp.eq.s32.totalorder %v539_v4, %v2508_v3  ;;  %v544_v14 = vld [vmem:[%s6029_s0 + $0xde0] sm:$0xff]  ;;  %v545_v15 = vld [vmem:[%s6029_s0 + $0xde8] sm:$0xff]  ;;  %v1690_v16 = vsel %vm1114_vm2, 1.0, %v2480_v10  ;;  %v1691_v17 = vsel %vm1115_vm3, 1.0, %v2480_v10  ;;  %vm1118_vm6 = vcmp.eq.s32.totalorder %v540_v5, %v2508_v3 }
  0xe3   : > { %2251 = vst [vmem:[%s2575_s19 + $0xd20] sm:$0xff] %v1674_v46  ;;  %2252 = vst [vmem:[%s2575_s19 + $0xd28] sm:$0xff] %v1675_v47  ;;  %v1692_v18 = vsel %vm1116_vm4, 1.0, %v2480_v10  ;;  %v1693_v19 = vsel %vm1117_vm5, 1.0, %v2480_v10  ;;  %v546_v20 = vld [vmem:[%s6029_s0 + $0xdf0] sm:$0xff]  ;;  %v547_v21 = vld [vmem:[%s6029_s0 + $0xdf8] sm:$0xff]  ;;  %vm1119_vm7 = vcmp.eq.s32.totalorder %v541_v6, %v2508_v3  ;;  %vm1120_vm8 = vcmp.eq.s32.totalorder %v542_v12, %v2508_v3 }
  0xe4   : > { %2253 = vst.msk [vmem:[%s2575_s19 + $0xd30] sm:$0xff] %vm1838_vm0, %v1676_v48  ;;  %2254 = vst [vmem:[%s2575_s19 + $0xd38] sm:$0xff] %v1677_v49  ;;  %vm1121_vm9 = vcmp.eq.s32.totalorder %v543_v13, %v2508_v3  ;;  %v548_v22 = vld [vmem:[%s6029_s0 + $0xe00] sm:$0xff]  ;;  %v549_v23 = vld [vmem:[%s6029_s0 + $0xe08] sm:$0xff]  ;;  %v1694_v24 = vsel %vm1118_vm6, 1.0, %v2480_v10  ;;  %v1695_v25 = vsel %vm1119_vm7, 1.0, %v2480_v10  ;;  %vm1122_vm10 = vcmp.eq.s32.totalorder %v544_v14, %v2508_v3 }
  0xe5   : > { %2255 = vst [vmem:[%s2575_s19 + $0xd40] sm:$0xff] %v1678_v54  ;;  %2256 = vst [vmem:[%s2575_s19 + $0xd48] sm:$0xff] %v1679_v55  ;;  %v1696_v26 = vsel %vm1120_vm8, 1.0, %v2480_v10  ;;  %v1697_v27 = vsel %vm1121_vm9, 1.0, %v2480_v10  ;;  %v550_v28 = vld [vmem:[%s6029_s0 + $0xe10] sm:$0xff]  ;;  %v551_v29 = vld [vmem:[%s6029_s0 + $0xe18] sm:$0xff]  ;;  %vm1123_vm11 = vcmp.eq.s32.totalorder %v545_v15, %v2508_v3  ;;  %vm1124_vm12 = vcmp.eq.s32.totalorder %v546_v20, %v2508_v3 }
  0xe6   : > { %2257 = vst [vmem:[%s2575_s19 + $0xd50] sm:$0xff] %v1680_v56  ;;  %2258 = vst [vmem:[%s2575_s19 + $0xd58] sm:$0xff] %v1681_v57  ;;  %vm1125_vm13 = vcmp.eq.s32.totalorder %v547_v21, %v2508_v3  ;;  %v552_v30 = vld [vmem:[%s6029_s0 + $0xe20] sm:$0xff]  ;;  %v553_v31 = vld [vmem:[%s6029_s0 + $0xe28] sm:$0xff]  ;;  %v1698_v32 = vsel %vm1122_vm10, 1.0, %v2480_v10  ;;  %v1699_v33 = vsel %vm1123_vm11, 1.0, %v2480_v10  ;;  %vm1126_vm14 = vcmp.eq.s32.totalorder %v548_v22, %v2508_v3 }
  0xe7   : > { %2259 = vst [vmem:[%s2575_s19 + $0xd60] sm:$0xff] %v1682_v62  ;;  %2260 = vst [vmem:[%s2575_s19 + $0xd68] sm:$0xff] %v1683_v63  ;;  %v1700_v34 = vsel %vm1124_vm12, 1.0, %v2480_v10  ;;  %v1701_v35 = vsel %vm1125_vm13, 1.0, %v2480_v10  ;;  %v554_v36 = vld [vmem:[%s6029_s0 + $0xe30] sm:$0xff]  ;;  %v555_v37 = vld [vmem:[%s6029_s0 + $0xe38] sm:$0xff]  ;;  %vm1127_vm15 = vcmp.eq.s32.totalorder %v549_v23, %v2508_v3  ;;  %vm1128_vm1 = vcmp.eq.s32.totalorder %v550_v28, %v2508_v3 }
  0xe8   : > { %2261 = vst [vmem:[%s2575_s19 + $0xd70] sm:$0xff] %v1684_v0  ;;  %2262 = vst.msk [vmem:[%s2575_s19 + $0xd78] sm:$0xff] %vm1838_vm0, %v1685_v1  ;;  %vm1129_vm2 = vcmp.eq.s32.totalorder %v551_v29, %v2508_v3  ;;  %v556_v38 = vld [vmem:[%s6029_s0 + $0xe40] sm:$0xff]  ;;  %v557_v39 = vld [vmem:[%s6029_s0 + $0xe48] sm:$0xff]  ;;  %v1702_v40 = vsel %vm1126_vm14, 1.0, %v2480_v10  ;;  %v1703_v41 = vsel %vm1127_vm15, 1.0, %v2480_v10  ;;  %vm1130_vm3 = vcmp.eq.s32.totalorder %v552_v30, %v2508_v3 }
  0xe9   : > { %2263 = vst [vmem:[%s2575_s19 + $0xd80] sm:$0xff] %v1686_v7  ;;  %2264 = vst [vmem:[%s2575_s19 + $0xd88] sm:$0xff] %v1687_v8  ;;  %v1704_v42 = vsel %vm1128_vm1, 1.0, %v2480_v10  ;;  %v1705_v43 = vsel %vm1129_vm2, 1.0, %v2480_v10  ;;  %v558_v44 = vld [vmem:[%s6029_s0 + $0xe50] sm:$0xff]  ;;  %v559_v45 = vld [vmem:[%s6029_s0 + $0xe58] sm:$0xff]  ;;  %vm1131_vm4 = vcmp.eq.s32.totalorder %v553_v31, %v2508_v3  ;;  %vm1132_vm5 = vcmp.eq.s32.totalorder %v554_v36, %v2508_v3 }
  0xea   : > { %2265 = vst [vmem:[%s2575_s19 + $0xd90] sm:$0xff] %v1688_v9  ;;  %2266 = vst [vmem:[%s2575_s19 + $0xd98] sm:$0xff] %v1689_v11  ;;  %vm1133_vm6 = vcmp.eq.s32.totalorder %v555_v37, %v2508_v3  ;;  %v560_v46 = vld [vmem:[%s6029_s0 + $0xe60] sm:$0xff]  ;;  %v561_v47 = vld [vmem:[%s6029_s0 + $0xe68] sm:$0xff]  ;;  %v1706_v48 = vsel %vm1130_vm3, 1.0, %v2480_v10  ;;  %v1707_v49 = vsel %vm1131_vm4, 1.0, %v2480_v10  ;;  %vm1134_vm7 = vcmp.eq.s32.totalorder %v556_v38, %v2508_v3 }
  0xeb   : > { %2267 = vst [vmem:[%s2575_s19 + $0xda0] sm:$0xff] %v1690_v16  ;;  %2268 = vst [vmem:[%s2575_s19 + $0xda8] sm:$0xff] %v1691_v17  ;;  %v1708_v50 = vsel %vm1132_vm5, 1.0, %v2480_v10  ;;  %v1709_v51 = vsel %vm1133_vm6, 1.0, %v2480_v10  ;;  %v562_v52 = vld [vmem:[%s6029_s0 + $0xe70] sm:$0xff]  ;;  %v563_v53 = vld [vmem:[%s6029_s0 + $0xe78] sm:$0xff]  ;;  %vm1135_vm8 = vcmp.eq.s32.totalorder %v557_v39, %v2508_v3  ;;  %vm1136_vm9 = vcmp.eq.s32.totalorder %v558_v44, %v2508_v3 }
  0xec   : > { %2269 = vst [vmem:[%s2575_s19 + $0xdb0] sm:$0xff] %v1692_v18  ;;  %2270 = vst [vmem:[%s2575_s19 + $0xdb8] sm:$0xff] %v1693_v19  ;;  %vm1137_vm10 = vcmp.eq.s32.totalorder %v559_v45, %v2508_v3  ;;  %v564_v54 = vld [vmem:[%s6029_s0 + $0xe80] sm:$0xff]  ;;  %v565_v55 = vld [vmem:[%s6029_s0 + $0xe88] sm:$0xff]  ;;  %v1710_v56 = vsel %vm1134_vm7, 1.0, %v2480_v10  ;;  %v1711_v57 = vsel %vm1135_vm8, 1.0, %v2480_v10  ;;  %vm1138_vm11 = vcmp.eq.s32.totalorder %v560_v46, %v2508_v3 }
  0xed   : > { %2271 = vst.msk [vmem:[%s2575_s19 + $0xdc0] sm:$0xff] %vm1838_vm0, %v1694_v24  ;;  %2272 = vst [vmem:[%s2575_s19 + $0xdc8] sm:$0xff] %v1695_v25  ;;  %v1712_v58 = vsel %vm1136_vm9, 1.0, %v2480_v10  ;;  %v1713_v59 = vsel %vm1137_vm10, 1.0, %v2480_v10  ;;  %v566_v60 = vld [vmem:[%s6029_s0 + $0xe90] sm:$0xff]  ;;  %v567_v61 = vld [vmem:[%s6029_s0 + $0xe98] sm:$0xff]  ;;  %vm1139_vm12 = vcmp.eq.s32.totalorder %v561_v47, %v2508_v3  ;;  %vm1140_vm13 = vcmp.eq.s32.totalorder %v562_v52, %v2508_v3 }
  0xee   : > { %2273 = vst [vmem:[%s2575_s19 + $0xdd0] sm:$0xff] %v1696_v26  ;;  %2274 = vst [vmem:[%s2575_s19 + $0xdd8] sm:$0xff] %v1697_v27  ;;  %vm1141_vm14 = vcmp.eq.s32.totalorder %v563_v53, %v2508_v3  ;;  %v568_v62 = vld [vmem:[%s6029_s0 + $0xea0] sm:$0xff]  ;;  %v569_v63 = vld [vmem:[%s6029_s0 + $0xea8] sm:$0xff]  ;;  %v1714_v0 = vsel %vm1138_vm11, 1.0, %v2480_v10  ;;  %v1715_v1 = vsel %vm1139_vm12, 1.0, %v2480_v10  ;;  %vm1142_vm15 = vcmp.eq.s32.totalorder %v564_v54, %v2508_v3 }
  0xef   : > { %2275 = vst [vmem:[%s2575_s19 + $0xde0] sm:$0xff] %v1698_v32  ;;  %2276 = vst [vmem:[%s2575_s19 + $0xde8] sm:$0xff] %v1699_v33  ;;  %v1716_v2 = vsel %vm1140_vm13, 1.0, %v2480_v10  ;;  %v1717_v4 = vsel %vm1141_vm14, 1.0, %v2480_v10  ;;  %v570_v5 = vld [vmem:[%s6029_s0 + $0xeb0] sm:$0xff]  ;;  %v571_v6 = vld [vmem:[%s6029_s0 + $0xeb8] sm:$0xff]  ;;  %vm1143_vm1 = vcmp.eq.s32.totalorder %v565_v55, %v2508_v3  ;;  %vm1144_vm2 = vcmp.eq.s32.totalorder %v566_v60, %v2508_v3 }
  0xf0   : > { %2277 = vst [vmem:[%s2575_s19 + $0xdf0] sm:$0xff] %v1700_v34  ;;  %2278 = vst [vmem:[%s2575_s19 + $0xdf8] sm:$0xff] %v1701_v35  ;;  %vm1145_vm3 = vcmp.eq.s32.totalorder %v567_v61, %v2508_v3  ;;  %v572_v7 = vld [vmem:[%s6029_s0 + $0xec0] sm:$0xff]  ;;  %v573_v8 = vld [vmem:[%s6029_s0 + $0xec8] sm:$0xff]  ;;  %v1718_v9 = vsel %vm1142_vm15, 1.0, %v2480_v10  ;;  %v1719_v11 = vsel %vm1143_vm1, 1.0, %v2480_v10  ;;  %vm1146_vm4 = vcmp.eq.s32.totalorder %v568_v62, %v2508_v3 }
  0xf1   : > { %2279 = vst [vmem:[%s2575_s19 + $0xe00] sm:$0xff] %v1702_v40  ;;  %2280 = vst.msk [vmem:[%s2575_s19 + $0xe08] sm:$0xff] %vm1838_vm0, %v1703_v41  ;;  %v1720_v12 = vsel %vm1144_vm2, 1.0, %v2480_v10  ;;  %v1721_v13 = vsel %vm1145_vm3, 1.0, %v2480_v10  ;;  %v574_v14 = vld [vmem:[%s6029_s0 + $0xed0] sm:$0xff]  ;;  %v575_v15 = vld [vmem:[%s6029_s0 + $0xed8] sm:$0xff]  ;;  %vm1147_vm5 = vcmp.eq.s32.totalorder %v569_v63, %v2508_v3  ;;  %vm1148_vm6 = vcmp.eq.s32.totalorder %v570_v5, %v2508_v3 }
  0xf2   : > { %2281 = vst [vmem:[%s2575_s19 + $0xe10] sm:$0xff] %v1704_v42  ;;  %2282 = vst [vmem:[%s2575_s19 + $0xe18] sm:$0xff] %v1705_v43  ;;  %vm1149_vm7 = vcmp.eq.s32.totalorder %v571_v6, %v2508_v3  ;;  %v576_v16 = vld [vmem:[%s6029_s0 + $0xee0] sm:$0xff]  ;;  %v577_v17 = vld [vmem:[%s6029_s0 + $0xee8] sm:$0xff]  ;;  %v1722_v18 = vsel %vm1146_vm4, 1.0, %v2480_v10  ;;  %v1723_v19 = vsel %vm1147_vm5, 1.0, %v2480_v10  ;;  %vm1150_vm8 = vcmp.eq.s32.totalorder %v572_v7, %v2508_v3 }
  0xf3   : > { %2283 = vst [vmem:[%s2575_s19 + $0xe20] sm:$0xff] %v1706_v48  ;;  %2284 = vst [vmem:[%s2575_s19 + $0xe28] sm:$0xff] %v1707_v49  ;;  %v1724_v20 = vsel %vm1148_vm6, 1.0, %v2480_v10  ;;  %v1725_v21 = vsel %vm1149_vm7, 1.0, %v2480_v10  ;;  %v578_v22 = vld [vmem:[%s6029_s0 + $0xef0] sm:$0xff]  ;;  %v579_v23 = vld [vmem:[%s6029_s0 + $0xef8] sm:$0xff]  ;;  %vm1151_vm9 = vcmp.eq.s32.totalorder %v573_v8, %v2508_v3  ;;  %vm1152_vm10 = vcmp.eq.s32.totalorder %v574_v14, %v2508_v3 }
  0xf4   : > { %2285 = vst [vmem:[%s2575_s19 + $0xe30] sm:$0xff] %v1708_v50  ;;  %2286 = vst [vmem:[%s2575_s19 + $0xe38] sm:$0xff] %v1709_v51  ;;  %vm1153_vm11 = vcmp.eq.s32.totalorder %v575_v15, %v2508_v3  ;;  %v580_v24 = vld [vmem:[%s6029_s0 + $0xf00] sm:$0xff]  ;;  %v581_v25 = vld [vmem:[%s6029_s0 + $0xf08] sm:$0xff]  ;;  %v1726_v26 = vsel %vm1150_vm8, 1.0, %v2480_v10  ;;  %v1727_v27 = vsel %vm1151_vm9, 1.0, %v2480_v10  ;;  %vm1154_vm12 = vcmp.eq.s32.totalorder %v576_v16, %v2508_v3 }
  0xf5   : > { %2287 = vst [vmem:[%s2575_s19 + $0xe40] sm:$0xff] %v1710_v56  ;;  %2288 = vst [vmem:[%s2575_s19 + $0xe48] sm:$0xff] %v1711_v57  ;;  %v1728_v28 = vsel %vm1152_vm10, 1.0, %v2480_v10  ;;  %v1729_v29 = vsel %vm1153_vm11, 1.0, %v2480_v10  ;;  %v582_v30 = vld [vmem:[%s6029_s0 + $0xf10] sm:$0xff]  ;;  %v583_v31 = vld [vmem:[%s6029_s0 + $0xf18] sm:$0xff]  ;;  %vm1155_vm13 = vcmp.eq.s32.totalorder %v577_v17, %v2508_v3  ;;  %vm1156_vm14 = vcmp.eq.s32.totalorder %v578_v22, %v2508_v3 }
  0xf6   : > { %2289 = vst.msk [vmem:[%s2575_s19 + $0xe50] sm:$0xff] %vm1838_vm0, %v1712_v58  ;;  %2290 = vst [vmem:[%s2575_s19 + $0xe58] sm:$0xff] %v1713_v59  ;;  %vm1157_vm15 = vcmp.eq.s32.totalorder %v579_v23, %v2508_v3  ;;  %v584_v32 = vld [vmem:[%s6029_s0 + $0xf20] sm:$0xff]  ;;  %v585_v33 = vld [vmem:[%s6029_s0 + $0xf28] sm:$0xff]  ;;  %v1730_v34 = vsel %vm1154_vm12, 1.0, %v2480_v10  ;;  %v1731_v35 = vsel %vm1155_vm13, 1.0, %v2480_v10  ;;  %vm1158_vm1 = vcmp.eq.s32.totalorder %v580_v24, %v2508_v3 }
  0xf7   : > { %2291 = vst [vmem:[%s2575_s19 + $0xe60] sm:$0xff] %v1714_v0  ;;  %2292 = vst [vmem:[%s2575_s19 + $0xe68] sm:$0xff] %v1715_v1  ;;  %v1732_v36 = vsel %vm1156_vm14, 1.0, %v2480_v10  ;;  %v1733_v37 = vsel %vm1157_vm15, 1.0, %v2480_v10  ;;  %v586_v38 = vld [vmem:[%s6029_s0 + $0xf30] sm:$0xff]  ;;  %v587_v39 = vld [vmem:[%s6029_s0 + $0xf38] sm:$0xff]  ;;  %vm1159_vm2 = vcmp.eq.s32.totalorder %v581_v25, %v2508_v3  ;;  %vm1160_vm3 = vcmp.eq.s32.totalorder %v582_v30, %v2508_v3 }
  0xf8   : > { %2293 = vst [vmem:[%s2575_s19 + $0xe70] sm:$0xff] %v1716_v2  ;;  %2294 = vst [vmem:[%s2575_s19 + $0xe78] sm:$0xff] %v1717_v4  ;;  %vm1161_vm4 = vcmp.eq.s32.totalorder %v583_v31, %v2508_v3  ;;  %v588_v40 = vld [vmem:[%s6029_s0 + $0xf40] sm:$0xff]  ;;  %v589_v41 = vld [vmem:[%s6029_s0 + $0xf48] sm:$0xff]  ;;  %v1734_v42 = vsel %vm1158_vm1, 1.0, %v2480_v10  ;;  %v1735_v43 = vsel %vm1159_vm2, 1.0, %v2480_v10  ;;  %vm1162_vm5 = vcmp.eq.s32.totalorder %v584_v32, %v2508_v3 }
  0xf9   : > { %2295 = vst [vmem:[%s2575_s19 + $0xe80] sm:$0xff] %v1718_v9  ;;  %2296 = vst [vmem:[%s2575_s19 + $0xe88] sm:$0xff] %v1719_v11  ;;  %v1736_v44 = vsel %vm1160_vm3, 1.0, %v2480_v10  ;;  %v1737_v45 = vsel %vm1161_vm4, 1.0, %v2480_v10  ;;  %v590_v46 = vld [vmem:[%s6029_s0 + $0xf50] sm:$0xff]  ;;  %v591_v47 = vld [vmem:[%s6029_s0 + $0xf58] sm:$0xff]  ;;  %vm1163_vm6 = vcmp.eq.s32.totalorder %v585_v33, %v2508_v3  ;;  %vm1164_vm7 = vcmp.eq.s32.totalorder %v586_v38, %v2508_v3 }
  0xfa   : > { %2297 = vst [vmem:[%s2575_s19 + $0xe90] sm:$0xff] %v1720_v12  ;;  %2298 = vst.msk [vmem:[%s2575_s19 + $0xe98] sm:$0xff] %vm1838_vm0, %v1721_v13  ;;  %vm1165_vm8 = vcmp.eq.s32.totalorder %v587_v39, %v2508_v3  ;;  %v592_v48 = vld [vmem:[%s6029_s0 + $0xf60] sm:$0xff]  ;;  %v593_v49 = vld [vmem:[%s6029_s0 + $0xf68] sm:$0xff]  ;;  %v1738_v50 = vsel %vm1162_vm5, 1.0, %v2480_v10  ;;  %v1739_v51 = vsel %vm1163_vm6, 1.0, %v2480_v10  ;;  %vm1166_vm9 = vcmp.eq.s32.totalorder %v588_v40, %v2508_v3 }
  0xfb   : > { %2299 = vst [vmem:[%s2575_s19 + $0xea0] sm:$0xff] %v1722_v18  ;;  %2300 = vst [vmem:[%s2575_s19 + $0xea8] sm:$0xff] %v1723_v19  ;;  %v1740_v52 = vsel %vm1164_vm7, 1.0, %v2480_v10  ;;  %v1741_v53 = vsel %vm1165_vm8, 1.0, %v2480_v10  ;;  %v594_v54 = vld [vmem:[%s6029_s0 + $0xf70] sm:$0xff]  ;;  %v595_v55 = vld [vmem:[%s6029_s0 + $0xf78] sm:$0xff]  ;;  %vm1167_vm10 = vcmp.eq.s32.totalorder %v589_v41, %v2508_v3  ;;  %vm1168_vm11 = vcmp.eq.s32.totalorder %v590_v46, %v2508_v3 }
  0xfc   : > { %2301 = vst [vmem:[%s2575_s19 + $0xeb0] sm:$0xff] %v1724_v20  ;;  %2302 = vst [vmem:[%s2575_s19 + $0xeb8] sm:$0xff] %v1725_v21  ;;  %vm1169_vm12 = vcmp.eq.s32.totalorder %v591_v47, %v2508_v3  ;;  %v596_v56 = vld [vmem:[%s6029_s0 + $0xf80] sm:$0xff]  ;;  %v597_v57 = vld [vmem:[%s6029_s0 + $0xf88] sm:$0xff]  ;;  %v1742_v58 = vsel %vm1166_vm9, 1.0, %v2480_v10  ;;  %v1743_v59 = vsel %vm1167_vm10, 1.0, %v2480_v10  ;;  %vm1170_vm13 = vcmp.eq.s32.totalorder %v592_v48, %v2508_v3 }
  0xfd   : > { %2303 = vst [vmem:[%s2575_s19 + $0xec0] sm:$0xff] %v1726_v26  ;;  %2304 = vst [vmem:[%s2575_s19 + $0xec8] sm:$0xff] %v1727_v27  ;;  %v1744_v60 = vsel %vm1168_vm11, 1.0, %v2480_v10  ;;  %v1745_v61 = vsel %vm1169_vm12, 1.0, %v2480_v10  ;;  %v598_v62 = vld [vmem:[%s6029_s0 + $0xf90] sm:$0xff]  ;;  %v599_v63 = vld [vmem:[%s6029_s0 + $0xf98] sm:$0xff]  ;;  %vm1171_vm14 = vcmp.eq.s32.totalorder %v593_v49, %v2508_v3  ;;  %vm1172_vm15 = vcmp.eq.s32.totalorder %v594_v54, %v2508_v3 }
  0xfe   : > { %2305 = vst [vmem:[%s2575_s19 + $0xed0] sm:$0xff] %v1728_v28  ;;  %2306 = vst [vmem:[%s2575_s19 + $0xed8] sm:$0xff] %v1729_v29  ;;  %vm1173_vm1 = vcmp.eq.s32.totalorder %v595_v55, %v2508_v3  ;;  %v600_v0 = vld [vmem:[%s6029_s0 + $0xfa0] sm:$0xff]  ;;  %v601_v1 = vld [vmem:[%s6029_s0 + $0xfa8] sm:$0xff]  ;;  %v1746_v2 = vsel %vm1170_vm13, 1.0, %v2480_v10  ;;  %v1747_v4 = vsel %vm1171_vm14, 1.0, %v2480_v10  ;;  %vm1174_vm2 = vcmp.eq.s32.totalorder %v596_v56, %v2508_v3 }
  0xff   : > { %2307 = vst.msk [vmem:[%s2575_s19 + $0xee0] sm:$0xff] %vm1838_vm0, %v1730_v34  ;;  %2308 = vst [vmem:[%s2575_s19 + $0xee8] sm:$0xff] %v1731_v35  ;;  %v1748_v5 = vsel %vm1172_vm15, 1.0, %v2480_v10  ;;  %v1749_v6 = vsel %vm1173_vm1, 1.0, %v2480_v10  ;;  %v602_v7 = vld [vmem:[%s6029_s0 + $0xfb0] sm:$0xff]  ;;  %v603_v8 = vld [vmem:[%s6029_s0 + $0xfb8] sm:$0xff]  ;;  %vm1175_vm3 = vcmp.eq.s32.totalorder %v597_v57, %v2508_v3  ;;  %vm1176_vm4 = vcmp.eq.s32.totalorder %v598_v62, %v2508_v3 }
 0x100   : > { %2309 = vst [vmem:[%s2575_s19 + $0xef0] sm:$0xff] %v1732_v36  ;;  %2310 = vst [vmem:[%s2575_s19 + $0xef8] sm:$0xff] %v1733_v37  ;;  %vm1177_vm5 = vcmp.eq.s32.totalorder %v599_v63, %v2508_v3  ;;  %v604_v9 = vld [vmem:[%s6029_s0 + $0xfc0] sm:$0xff]  ;;  %v605_v11 = vld [vmem:[%s6029_s0 + $0xfc8] sm:$0xff]  ;;  %v1750_v12 = vsel %vm1174_vm2, 1.0, %v2480_v10  ;;  %v1751_v13 = vsel %vm1175_vm3, 1.0, %v2480_v10  ;;  %vm1178_vm6 = vcmp.eq.s32.totalorder %v600_v0, %v2508_v3 }
 0x101   : > { %2311 = vst [vmem:[%s2575_s19 + $0xf00] sm:$0xff] %v1734_v42  ;;  %2312 = vst [vmem:[%s2575_s19 + $0xf08] sm:$0xff] %v1735_v43  ;;  %v1752_v14 = vsel %vm1176_vm4, 1.0, %v2480_v10  ;;  %v1753_v15 = vsel %vm1177_vm5, 1.0, %v2480_v10  ;;  %v606_v16 = vld [vmem:[%s6029_s0 + $0xfd0] sm:$0xff]  ;;  %v607_v17 = vld [vmem:[%s6029_s0 + $0xfd8] sm:$0xff]  ;;  %vm1179_vm7 = vcmp.eq.s32.totalorder %v601_v1, %v2508_v3  ;;  %vm1180_vm8 = vcmp.eq.s32.totalorder %v602_v7, %v2508_v3 }
 0x102   : > { %2313 = vst [vmem:[%s2575_s19 + $0xf10] sm:$0xff] %v1736_v44  ;;  %2314 = vst [vmem:[%s2575_s19 + $0xf18] sm:$0xff] %v1737_v45  ;;  %vm1181_vm9 = vcmp.eq.s32.totalorder %v603_v8, %v2508_v3  ;;  %v608_v18 = vld [vmem:[%s6029_s0 + $0xfe0] sm:$0xff]  ;;  %v609_v19 = vld [vmem:[%s6029_s0 + $0xfe8] sm:$0xff]  ;;  %v1754_v20 = vsel %vm1178_vm6, 1.0, %v2480_v10  ;;  %v1755_v21 = vsel %vm1179_vm7, 1.0, %v2480_v10  ;;  %vm1182_vm10 = vcmp.eq.s32.totalorder %v604_v9, %v2508_v3 }
 0x103   : > { %2315 = vst [vmem:[%s2575_s19 + $0xf20] sm:$0xff] %v1738_v50  ;;  %2316 = vst.msk [vmem:[%s2575_s19 + $0xf28] sm:$0xff] %vm1838_vm0, %v1739_v51  ;;  %v1756_v22 = vsel %vm1180_vm8, 1.0, %v2480_v10  ;;  %v1757_v23 = vsel %vm1181_vm9, 1.0, %v2480_v10  ;;  %v610_v24 = vld [vmem:[%s6029_s0 + $0xff0] sm:$0xff]  ;;  %v611_v25 = vld [vmem:[%s6029_s0 + $0xff8] sm:$0xff]  ;;  %vm1183_vm11 = vcmp.eq.s32.totalorder %v605_v11, %v2508_v3  ;;  %vm1184_vm12 = vcmp.eq.s32.totalorder %v606_v16, %v2508_v3 }
 0x104   : > { %2317 = vst [vmem:[%s2575_s19 + $0xf30] sm:$0xff] %v1740_v52  ;;  %2318 = vst [vmem:[%s2575_s19 + $0xf38] sm:$0xff] %v1741_v53  ;;  %vm1185_vm13 = vcmp.eq.s32.totalorder %v607_v17, %v2508_v3  ;;  %v612_v26 = vld [vmem:[%s6029_s0 + $0x1000] sm:$0xff]  ;;  %v613_v27 = vld [vmem:[%s6029_s0 + $0x1008] sm:$0xff]  ;;  %v1758_v28 = vsel %vm1182_vm10, 1.0, %v2480_v10  ;;  %v1759_v29 = vsel %vm1183_vm11, 1.0, %v2480_v10  ;;  %vm1186_vm14 = vcmp.eq.s32.totalorder %v608_v18, %v2508_v3 }
 0x105   : > { %2319 = vst [vmem:[%s2575_s19 + $0xf40] sm:$0xff] %v1742_v58  ;;  %2320 = vst [vmem:[%s2575_s19 + $0xf48] sm:$0xff] %v1743_v59  ;;  %v1760_v30 = vsel %vm1184_vm12, 1.0, %v2480_v10  ;;  %v1761_v31 = vsel %vm1185_vm13, 1.0, %v2480_v10  ;;  %v614_v32 = vld [vmem:[%s6029_s0 + $0x1010] sm:$0xff]  ;;  %v615_v33 = vld [vmem:[%s6029_s0 + $0x1018] sm:$0xff]  ;;  %vm1187_vm15 = vcmp.eq.s32.totalorder %v609_v19, %v2508_v3  ;;  %vm1188_vm1 = vcmp.eq.s32.totalorder %v610_v24, %v2508_v3 }
 0x106   : > { %2321 = vst [vmem:[%s2575_s19 + $0xf50] sm:$0xff] %v1744_v60  ;;  %2322 = vst [vmem:[%s2575_s19 + $0xf58] sm:$0xff] %v1745_v61  ;;  %vm1189_vm2 = vcmp.eq.s32.totalorder %v611_v25, %v2508_v3  ;;  %v616_v34 = vld [vmem:[%s6029_s0 + $0x1020] sm:$0xff]  ;;  %v617_v35 = vld [vmem:[%s6029_s0 + $0x1028] sm:$0xff]  ;;  %v1762_v36 = vsel %vm1186_vm14, 1.0, %v2480_v10  ;;  %v1763_v37 = vsel %vm1187_vm15, 1.0, %v2480_v10  ;;  %vm1190_vm3 = vcmp.eq.s32.totalorder %v612_v26, %v2508_v3 }
 0x107   : > { %2323 = vst [vmem:[%s2575_s19 + $0xf60] sm:$0xff] %v1746_v2  ;;  %2324 = vst [vmem:[%s2575_s19 + $0xf68] sm:$0xff] %v1747_v4  ;;  %v1764_v38 = vsel %vm1188_vm1, 1.0, %v2480_v10  ;;  %v1765_v39 = vsel %vm1189_vm2, 1.0, %v2480_v10  ;;  %v618_v40 = vld [vmem:[%s6029_s0 + $0x1030] sm:$0xff]  ;;  %v619_v41 = vld [vmem:[%s6029_s0 + $0x1038] sm:$0xff]  ;;  %vm1191_vm4 = vcmp.eq.s32.totalorder %v613_v27, %v2508_v3  ;;  %vm1192_vm5 = vcmp.eq.s32.totalorder %v614_v32, %v2508_v3 }
 0x108   : > { %2325 = vst.msk [vmem:[%s2575_s19 + $0xf70] sm:$0xff] %vm1838_vm0, %v1748_v5  ;;  %2326 = vst [vmem:[%s2575_s19 + $0xf78] sm:$0xff] %v1749_v6  ;;  %vm1193_vm6 = vcmp.eq.s32.totalorder %v615_v33, %v2508_v3  ;;  %v620_v42 = vld [vmem:[%s6029_s0 + $0x1040] sm:$0xff]  ;;  %v621_v43 = vld [vmem:[%s6029_s0 + $0x1048] sm:$0xff]  ;;  %v1766_v44 = vsel %vm1190_vm3, 1.0, %v2480_v10  ;;  %v1767_v45 = vsel %vm1191_vm4, 1.0, %v2480_v10  ;;  %vm1194_vm7 = vcmp.eq.s32.totalorder %v616_v34, %v2508_v3 }
 0x109   : > { %2327 = vst [vmem:[%s2575_s19 + $0xf80] sm:$0xff] %v1750_v12  ;;  %2328 = vst [vmem:[%s2575_s19 + $0xf88] sm:$0xff] %v1751_v13  ;;  %v1768_v46 = vsel %vm1192_vm5, 1.0, %v2480_v10  ;;  %v1769_v47 = vsel %vm1193_vm6, 1.0, %v2480_v10  ;;  %v622_v48 = vld [vmem:[%s6029_s0 + $0x1050] sm:$0xff]  ;;  %v623_v49 = vld [vmem:[%s6029_s0 + $0x1058] sm:$0xff]  ;;  %vm1195_vm8 = vcmp.eq.s32.totalorder %v617_v35, %v2508_v3  ;;  %vm1196_vm9 = vcmp.eq.s32.totalorder %v618_v40, %v2508_v3 }
 0x10a   : > { %2329 = vst [vmem:[%s2575_s19 + $0xf90] sm:$0xff] %v1752_v14  ;;  %2330 = vst [vmem:[%s2575_s19 + $0xf98] sm:$0xff] %v1753_v15  ;;  %vm1197_vm10 = vcmp.eq.s32.totalorder %v619_v41, %v2508_v3  ;;  %v624_v50 = vld [vmem:[%s6029_s0 + $0x1060] sm:$0xff]  ;;  %v625_v51 = vld [vmem:[%s6029_s0 + $0x1068] sm:$0xff]  ;;  %v1770_v52 = vsel %vm1194_vm7, 1.0, %v2480_v10  ;;  %v1771_v53 = vsel %vm1195_vm8, 1.0, %v2480_v10  ;;  %vm1198_vm11 = vcmp.eq.s32.totalorder %v620_v42, %v2508_v3 }
 0x10b   : > { %2331 = vst [vmem:[%s2575_s19 + $0xfa0] sm:$0xff] %v1754_v20  ;;  %2332 = vst [vmem:[%s2575_s19 + $0xfa8] sm:$0xff] %v1755_v21  ;;  %v1772_v54 = vsel %vm1196_vm9, 1.0, %v2480_v10  ;;  %v1773_v55 = vsel %vm1197_vm10, 1.0, %v2480_v10  ;;  %v626_v56 = vld [vmem:[%s6029_s0 + $0x1070] sm:$0xff]  ;;  %v627_v57 = vld [vmem:[%s6029_s0 + $0x1078] sm:$0xff]  ;;  %vm1199_vm12 = vcmp.eq.s32.totalorder %v621_v43, %v2508_v3  ;;  %vm1200_vm13 = vcmp.eq.s32.totalorder %v622_v48, %v2508_v3 }
 0x10c   : > { %2333 = vst [vmem:[%s2575_s19 + $0xfb0] sm:$0xff] %v1756_v22  ;;  %2334 = vst.msk [vmem:[%s2575_s19 + $0xfb8] sm:$0xff] %vm1838_vm0, %v1757_v23  ;;  %vm1201_vm14 = vcmp.eq.s32.totalorder %v623_v49, %v2508_v3  ;;  %v628_v58 = vld [vmem:[%s6029_s0 + $0x1080] sm:$0xff]  ;;  %v629_v59 = vld [vmem:[%s6029_s0 + $0x1088] sm:$0xff]  ;;  %v1774_v60 = vsel %vm1198_vm11, 1.0, %v2480_v10  ;;  %v1775_v61 = vsel %vm1199_vm12, 1.0, %v2480_v10  ;;  %vm1202_vm15 = vcmp.eq.s32.totalorder %v624_v50, %v2508_v3 }
 0x10d   : > { %2335 = vst [vmem:[%s2575_s19 + $0xfc0] sm:$0xff] %v1758_v28  ;;  %2336 = vst [vmem:[%s2575_s19 + $0xfc8] sm:$0xff] %v1759_v29  ;;  %v1776_v62 = vsel %vm1200_vm13, 1.0, %v2480_v10  ;;  %v1777_v63 = vsel %vm1201_vm14, 1.0, %v2480_v10  ;;  %v630_v0 = vld [vmem:[%s6029_s0 + $0x1090] sm:$0xff]  ;;  %v631_v1 = vld [vmem:[%s6029_s0 + $0x1098] sm:$0xff]  ;;  %vm1203_vm1 = vcmp.eq.s32.totalorder %v625_v51, %v2508_v3  ;;  %vm1204_vm2 = vcmp.eq.s32.totalorder %v626_v56, %v2508_v3 }
 0x10e   : > { %2337 = vst [vmem:[%s2575_s19 + $0xfd0] sm:$0xff] %v1760_v30  ;;  %2338 = vst [vmem:[%s2575_s19 + $0xfd8] sm:$0xff] %v1761_v31  ;;  %vm1205_vm3 = vcmp.eq.s32.totalorder %v627_v57, %v2508_v3  ;;  %v632_v2 = vld [vmem:[%s6029_s0 + $0x10a0] sm:$0xff]  ;;  %v633_v4 = vld [vmem:[%s6029_s0 + $0x10a8] sm:$0xff]  ;;  %v1778_v5 = vsel %vm1202_vm15, 1.0, %v2480_v10  ;;  %v1779_v6 = vsel %vm1203_vm1, 1.0, %v2480_v10  ;;  %vm1206_vm4 = vcmp.eq.s32.totalorder %v628_v58, %v2508_v3 }
 0x10f   : > { %2339 = vst [vmem:[%s2575_s19 + $0xfe0] sm:$0xff] %v1762_v36  ;;  %2340 = vst [vmem:[%s2575_s19 + $0xfe8] sm:$0xff] %v1763_v37  ;;  %v1780_v7 = vsel %vm1204_vm2, 1.0, %v2480_v10  ;;  %v1781_v8 = vsel %vm1205_vm3, 1.0, %v2480_v10  ;;  %v634_v9 = vld [vmem:[%s6029_s0 + $0x10b0] sm:$0xff]  ;;  %v635_v11 = vld [vmem:[%s6029_s0 + $0x10b8] sm:$0xff]  ;;  %vm1207_vm5 = vcmp.eq.s32.totalorder %v629_v59, %v2508_v3  ;;  %vm1208_vm6 = vcmp.eq.s32.totalorder %v630_v0, %v2508_v3 }
 0x110   : > { %2341 = vst [vmem:[%s2575_s19 + $0xff0] sm:$0xff] %v1764_v38  ;;  %2342 = vst [vmem:[%s2575_s19 + $0xff8] sm:$0xff] %v1765_v39  ;;  %vm1209_vm7 = vcmp.eq.s32.totalorder %v631_v1, %v2508_v3  ;;  %v636_v12 = vld [vmem:[%s6029_s0 + $0x10c0] sm:$0xff]  ;;  %v637_v13 = vld [vmem:[%s6029_s0 + $0x10c8] sm:$0xff]  ;;  %v1782_v14 = vsel %vm1206_vm4, 1.0, %v2480_v10  ;;  %v1783_v15 = vsel %vm1207_vm5, 1.0, %v2480_v10  ;;  %vm1210_vm8 = vcmp.eq.s32.totalorder %v632_v2, %v2508_v3 }
 0x111   : > { %2343 = vst.msk [vmem:[%s2575_s19 + $0x1000] sm:$0xff] %vm1838_vm0, %v1766_v44  ;;  %2344 = vst [vmem:[%s2575_s19 + $0x1008] sm:$0xff] %v1767_v45  ;;  %v1784_v16 = vsel %vm1208_vm6, 1.0, %v2480_v10  ;;  %v1785_v17 = vsel %vm1209_vm7, 1.0, %v2480_v10  ;;  %v638_v18 = vld [vmem:[%s6029_s0 + $0x10d0] sm:$0xff]  ;;  %v639_v19 = vld [vmem:[%s6029_s0 + $0x10d8] sm:$0xff]  ;;  %vm1211_vm9 = vcmp.eq.s32.totalorder %v633_v4, %v2508_v3  ;;  %vm1212_vm10 = vcmp.eq.s32.totalorder %v634_v9, %v2508_v3 }
 0x112   : > { %2345 = vst [vmem:[%s2575_s19 + $0x1010] sm:$0xff] %v1768_v46  ;;  %2346 = vst [vmem:[%s2575_s19 + $0x1018] sm:$0xff] %v1769_v47  ;;  %vm1213_vm11 = vcmp.eq.s32.totalorder %v635_v11, %v2508_v3  ;;  %v640_v20 = vld [vmem:[%s6029_s0 + $0x10e0] sm:$0xff]  ;;  %v641_v21 = vld [vmem:[%s6029_s0 + $0x10e8] sm:$0xff]  ;;  %v1786_v22 = vsel %vm1210_vm8, 1.0, %v2480_v10  ;;  %v1787_v23 = vsel %vm1211_vm9, 1.0, %v2480_v10  ;;  %vm1214_vm12 = vcmp.eq.s32.totalorder %v636_v12, %v2508_v3 }
 0x113   : > { %2347 = vst [vmem:[%s2575_s19 + $0x1020] sm:$0xff] %v1770_v52  ;;  %2348 = vst [vmem:[%s2575_s19 + $0x1028] sm:$0xff] %v1771_v53  ;;  %v1788_v24 = vsel %vm1212_vm10, 1.0, %v2480_v10  ;;  %v1789_v25 = vsel %vm1213_vm11, 1.0, %v2480_v10  ;;  %v642_v26 = vld [vmem:[%s6029_s0 + $0x10f0] sm:$0xff]  ;;  %v643_v27 = vld [vmem:[%s6029_s0 + $0x10f8] sm:$0xff]  ;;  %vm1215_vm13 = vcmp.eq.s32.totalorder %v637_v13, %v2508_v3  ;;  %vm1216_vm14 = vcmp.eq.s32.totalorder %v638_v18, %v2508_v3 }
 0x114   : > { %2349 = vst [vmem:[%s2575_s19 + $0x1030] sm:$0xff] %v1772_v54  ;;  %2350 = vst [vmem:[%s2575_s19 + $0x1038] sm:$0xff] %v1773_v55  ;;  %vm1217_vm15 = vcmp.eq.s32.totalorder %v639_v19, %v2508_v3  ;;  %v644_v28 = vld [vmem:[%s6029_s0 + $0x1100] sm:$0xff]  ;;  %v645_v29 = vld [vmem:[%s6029_s0 + $0x1108] sm:$0xff]  ;;  %v1790_v30 = vsel %vm1214_vm12, 1.0, %v2480_v10  ;;  %v1791_v31 = vsel %vm1215_vm13, 1.0, %v2480_v10  ;;  %vm1218_vm1 = vcmp.eq.s32.totalorder %v640_v20, %v2508_v3 }
 0x115   : > { %2351 = vst [vmem:[%s2575_s19 + $0x1040] sm:$0xff] %v1774_v60  ;;  %2352 = vst.msk [vmem:[%s2575_s19 + $0x1048] sm:$0xff] %vm1838_vm0, %v1775_v61  ;;  %v1792_v32 = vsel %vm1216_vm14, 1.0, %v2480_v10  ;;  %v1793_v33 = vsel %vm1217_vm15, 1.0, %v2480_v10  ;;  %v646_v34 = vld [vmem:[%s6029_s0 + $0x1110] sm:$0xff]  ;;  %v647_v35 = vld [vmem:[%s6029_s0 + $0x1118] sm:$0xff]  ;;  %vm1219_vm2 = vcmp.eq.s32.totalorder %v641_v21, %v2508_v3  ;;  %vm1220_vm3 = vcmp.eq.s32.totalorder %v642_v26, %v2508_v3 }
 0x116   : > { %2353 = vst [vmem:[%s2575_s19 + $0x1050] sm:$0xff] %v1776_v62  ;;  %2354 = vst [vmem:[%s2575_s19 + $0x1058] sm:$0xff] %v1777_v63  ;;  %vm1221_vm4 = vcmp.eq.s32.totalorder %v643_v27, %v2508_v3  ;;  %v648_v36 = vld [vmem:[%s6029_s0 + $0x1120] sm:$0xff]  ;;  %v649_v37 = vld [vmem:[%s6029_s0 + $0x1128] sm:$0xff]  ;;  %v1794_v38 = vsel %vm1218_vm1, 1.0, %v2480_v10  ;;  %v1795_v39 = vsel %vm1219_vm2, 1.0, %v2480_v10  ;;  %vm1222_vm5 = vcmp.eq.s32.totalorder %v644_v28, %v2508_v3 }
 0x117   : > { %2355 = vst [vmem:[%s2575_s19 + $0x1060] sm:$0xff] %v1778_v5  ;;  %2356 = vst [vmem:[%s2575_s19 + $0x1068] sm:$0xff] %v1779_v6  ;;  %v1796_v40 = vsel %vm1220_vm3, 1.0, %v2480_v10  ;;  %v1797_v41 = vsel %vm1221_vm4, 1.0, %v2480_v10  ;;  %v650_v42 = vld [vmem:[%s6029_s0 + $0x1130] sm:$0xff]  ;;  %v651_v43 = vld [vmem:[%s6029_s0 + $0x1138] sm:$0xff]  ;;  %vm1223_vm6 = vcmp.eq.s32.totalorder %v645_v29, %v2508_v3  ;;  %vm1224_vm7 = vcmp.eq.s32.totalorder %v646_v34, %v2508_v3 }
 0x118   : > { %2357 = vst [vmem:[%s2575_s19 + $0x1070] sm:$0xff] %v1780_v7  ;;  %2358 = vst [vmem:[%s2575_s19 + $0x1078] sm:$0xff] %v1781_v8  ;;  %vm1225_vm8 = vcmp.eq.s32.totalorder %v647_v35, %v2508_v3  ;;  %v652_v44 = vld [vmem:[%s6029_s0 + $0x1140] sm:$0xff]  ;;  %v653_v45 = vld [vmem:[%s6029_s0 + $0x1148] sm:$0xff]  ;;  %v1798_v46 = vsel %vm1222_vm5, 1.0, %v2480_v10  ;;  %v1799_v47 = vsel %vm1223_vm6, 1.0, %v2480_v10  ;;  %vm1226_vm9 = vcmp.eq.s32.totalorder %v648_v36, %v2508_v3 }
 0x119   : > { %2359 = vst [vmem:[%s2575_s19 + $0x1080] sm:$0xff] %v1782_v14  ;;  %2360 = vst [vmem:[%s2575_s19 + $0x1088] sm:$0xff] %v1783_v15  ;;  %v1800_v48 = vsel %vm1224_vm7, 1.0, %v2480_v10  ;;  %v1801_v49 = vsel %vm1225_vm8, 1.0, %v2480_v10  ;;  %v654_v50 = vld [vmem:[%s6029_s0 + $0x1150] sm:$0xff]  ;;  %v655_v51 = vld [vmem:[%s6029_s0 + $0x1158] sm:$0xff]  ;;  %vm1227_vm10 = vcmp.eq.s32.totalorder %v649_v37, %v2508_v3  ;;  %vm1228_vm11 = vcmp.eq.s32.totalorder %v650_v42, %v2508_v3 }
 0x11a   : > { %2361 = vst.msk [vmem:[%s2575_s19 + $0x1090] sm:$0xff] %vm1838_vm0, %v1784_v16  ;;  %2362 = vst [vmem:[%s2575_s19 + $0x1098] sm:$0xff] %v1785_v17  ;;  %vm1229_vm12 = vcmp.eq.s32.totalorder %v651_v43, %v2508_v3  ;;  %v656_v52 = vld [vmem:[%s6029_s0 + $0x1160] sm:$0xff]  ;;  %v657_v53 = vld [vmem:[%s6029_s0 + $0x1168] sm:$0xff]  ;;  %v1802_v54 = vsel %vm1226_vm9, 1.0, %v2480_v10  ;;  %v1803_v55 = vsel %vm1227_vm10, 1.0, %v2480_v10  ;;  %vm1230_vm13 = vcmp.eq.s32.totalorder %v652_v44, %v2508_v3 }
 0x11b   : > { %2363 = vst [vmem:[%s2575_s19 + $0x10a0] sm:$0xff] %v1786_v22  ;;  %2364 = vst [vmem:[%s2575_s19 + $0x10a8] sm:$0xff] %v1787_v23  ;;  %v1804_v56 = vsel %vm1228_vm11, 1.0, %v2480_v10  ;;  %v1805_v57 = vsel %vm1229_vm12, 1.0, %v2480_v10  ;;  %v658_v58 = vld [vmem:[%s6029_s0 + $0x1170] sm:$0xff]  ;;  %v659_v59 = vld [vmem:[%s6029_s0 + $0x1178] sm:$0xff]  ;;  %vm1231_vm14 = vcmp.eq.s32.totalorder %v653_v45, %v2508_v3  ;;  %vm1232_vm15 = vcmp.eq.s32.totalorder %v654_v50, %v2508_v3 }
 0x11c   : > { %2365 = vst [vmem:[%s2575_s19 + $0x10b0] sm:$0xff] %v1788_v24  ;;  %2366 = vst [vmem:[%s2575_s19 + $0x10b8] sm:$0xff] %v1789_v25  ;;  %vm1233_vm1 = vcmp.eq.s32.totalorder %v655_v51, %v2508_v3  ;;  %v660_v60 = vld [vmem:[%s6029_s0 + $0x1180] sm:$0xff]  ;;  %v661_v61 = vld [vmem:[%s6029_s0 + $0x1188] sm:$0xff]  ;;  %v1806_v62 = vsel %vm1230_vm13, 1.0, %v2480_v10  ;;  %v1807_v63 = vsel %vm1231_vm14, 1.0, %v2480_v10  ;;  %vm1234_vm2 = vcmp.eq.s32.totalorder %v656_v52, %v2508_v3 }
 0x11d   : > { %2367 = vst [vmem:[%s2575_s19 + $0x10c0] sm:$0xff] %v1790_v30  ;;  %2368 = vst [vmem:[%s2575_s19 + $0x10c8] sm:$0xff] %v1791_v31  ;;  %v1808_v0 = vsel %vm1232_vm15, 1.0, %v2480_v10  ;;  %v1809_v1 = vsel %vm1233_vm1, 1.0, %v2480_v10  ;;  %v662_v2 = vld [vmem:[%s6029_s0 + $0x1190] sm:$0xff]  ;;  %v663_v4 = vld [vmem:[%s6029_s0 + $0x1198] sm:$0xff]  ;;  %vm1235_vm3 = vcmp.eq.s32.totalorder %v657_v53, %v2508_v3  ;;  %vm1236_vm4 = vcmp.eq.s32.totalorder %v658_v58, %v2508_v3 }
 0x11e   : > { %2369 = vst [vmem:[%s2575_s19 + $0x10d0] sm:$0xff] %v1792_v32  ;;  %2370 = vst.msk [vmem:[%s2575_s19 + $0x10d8] sm:$0xff] %vm1838_vm0, %v1793_v33  ;;  %vm1237_vm5 = vcmp.eq.s32.totalorder %v659_v59, %v2508_v3  ;;  %v664_v5 = vld [vmem:[%s6029_s0 + $0x11a0] sm:$0xff]  ;;  %v665_v6 = vld [vmem:[%s6029_s0 + $0x11a8] sm:$0xff]  ;;  %v1810_v7 = vsel %vm1234_vm2, 1.0, %v2480_v10  ;;  %v1811_v8 = vsel %vm1235_vm3, 1.0, %v2480_v10  ;;  %vm1238_vm6 = vcmp.eq.s32.totalorder %v660_v60, %v2508_v3 }
 0x11f   : > { %2371 = vst [vmem:[%s2575_s19 + $0x10e0] sm:$0xff] %v1794_v38  ;;  %2372 = vst [vmem:[%s2575_s19 + $0x10e8] sm:$0xff] %v1795_v39  ;;  %v1812_v9 = vsel %vm1236_vm4, 1.0, %v2480_v10  ;;  %v1813_v11 = vsel %vm1237_vm5, 1.0, %v2480_v10  ;;  %v666_v12 = vld [vmem:[%s6029_s0 + $0x11b0] sm:$0xff]  ;;  %v667_v13 = vld [vmem:[%s6029_s0 + $0x11b8] sm:$0xff]  ;;  %vm1239_vm7 = vcmp.eq.s32.totalorder %v661_v61, %v2508_v3  ;;  %vm1240_vm8 = vcmp.eq.s32.totalorder %v662_v2, %v2508_v3 }
 0x120   : > { %2373 = vst [vmem:[%s2575_s19 + $0x10f0] sm:$0xff] %v1796_v40  ;;  %2374 = vst [vmem:[%s2575_s19 + $0x10f8] sm:$0xff] %v1797_v41  ;;  %vm1241_vm9 = vcmp.eq.s32.totalorder %v663_v4, %v2508_v3  ;;  %v668_v14 = vld [vmem:[%s6029_s0 + $0x11c0] sm:$0xff]  ;;  %v669_v15 = vld [vmem:[%s6029_s0 + $0x11c8] sm:$0xff]  ;;  %v1814_v16 = vsel %vm1238_vm6, 1.0, %v2480_v10  ;;  %v1815_v17 = vsel %vm1239_vm7, 1.0, %v2480_v10  ;;  %vm1242_vm10 = vcmp.eq.s32.totalorder %v664_v5, %v2508_v3 }
 0x121   : > { %2375 = vst [vmem:[%s2575_s19 + $0x1100] sm:$0xff] %v1798_v46  ;;  %2376 = vst [vmem:[%s2575_s19 + $0x1108] sm:$0xff] %v1799_v47  ;;  %v1816_v18 = vsel %vm1240_vm8, 1.0, %v2480_v10  ;;  %v1817_v19 = vsel %vm1241_vm9, 1.0, %v2480_v10  ;;  %v670_v20 = vld [vmem:[%s6029_s0 + $0x11d0] sm:$0xff]  ;;  %v671_v21 = vld [vmem:[%s6029_s0 + $0x11d8] sm:$0xff]  ;;  %vm1243_vm11 = vcmp.eq.s32.totalorder %v665_v6, %v2508_v3  ;;  %vm1244_vm12 = vcmp.eq.s32.totalorder %v666_v12, %v2508_v3 }
 0x122   : > { %2377 = vst [vmem:[%s2575_s19 + $0x1110] sm:$0xff] %v1800_v48  ;;  %2378 = vst [vmem:[%s2575_s19 + $0x1118] sm:$0xff] %v1801_v49  ;;  %vm1245_vm13 = vcmp.eq.s32.totalorder %v667_v13, %v2508_v3  ;;  %v672_v22 = vld [vmem:[%s6029_s0 + $0x11e0] sm:$0xff]  ;;  %v673_v23 = vld [vmem:[%s6029_s0 + $0x11e8] sm:$0xff]  ;;  %v1818_v24 = vsel %vm1242_vm10, 1.0, %v2480_v10  ;;  %v1819_v25 = vsel %vm1243_vm11, 1.0, %v2480_v10  ;;  %vm1246_vm14 = vcmp.eq.s32.totalorder %v668_v14, %v2508_v3 }
 0x123   : > { %2379 = vst.msk [vmem:[%s2575_s19 + $0x1120] sm:$0xff] %vm1838_vm0, %v1802_v54  ;;  %2380 = vst [vmem:[%s2575_s19 + $0x1128] sm:$0xff] %v1803_v55  ;;  %v1820_v26 = vsel %vm1244_vm12, 1.0, %v2480_v10  ;;  %v1821_v27 = vsel %vm1245_vm13, 1.0, %v2480_v10  ;;  %v674_v28 = vld [vmem:[%s6029_s0 + $0x11f0] sm:$0xff]  ;;  %v675_v29 = vld [vmem:[%s6029_s0 + $0x11f8] sm:$0xff]  ;;  %vm1247_vm15 = vcmp.eq.s32.totalorder %v669_v15, %v2508_v3  ;;  %vm1248_vm1 = vcmp.eq.s32.totalorder %v670_v20, %v2508_v3 }
 0x124   : > { %2381 = vst [vmem:[%s2575_s19 + $0x1130] sm:$0xff] %v1804_v56  ;;  %2382 = vst [vmem:[%s2575_s19 + $0x1138] sm:$0xff] %v1805_v57  ;;  %vm1249_vm2 = vcmp.eq.s32.totalorder %v671_v21, %v2508_v3  ;;  %v1822_v30 = vsel %vm1246_vm14, 1.0, %v2480_v10  ;;  %v1823_v31 = vsel %vm1247_vm15, 1.0, %v2480_v10  ;;  %v1824_v32 = vsel %vm1248_vm1, 1.0, %v2480_v10 }
 0x125   : > { %2383 = vst [vmem:[%s2575_s19 + $0x1140] sm:$0xff] %v1806_v62  ;;  %2384 = vst [vmem:[%s2575_s19 + $0x1148] sm:$0xff] %v1807_v63  ;;  %v1825_v33 = vsel %vm1249_vm2, 1.0, %v2480_v10  ;;  %vm1250_vm3 = vcmp.eq.s32.totalorder %v672_v22, %v2508_v3  ;;  %vm1251_vm4 = vcmp.eq.s32.totalorder %v673_v23, %v2508_v3  ;;  %vm1252_vm5 = vcmp.eq.s32.totalorder %v674_v28, %v2508_v3 }
 0x126   : > { %2385 = vst [vmem:[%s2575_s19 + $0x1150] sm:$0xff] %v1808_v0  ;;  %2386 = vst [vmem:[%s2575_s19 + $0x1158] sm:$0xff] %v1809_v1  ;;  %vm1253_vm6 = vcmp.eq.s32.totalorder %v675_v29, %v2508_v3  ;;  %v1826_v34 = vsel %vm1250_vm3, 1.0, %v2480_v10  ;;  %v1827_v35 = vsel %vm1251_vm4, 1.0, %v2480_v10  ;;  %v1828_v36 = vsel %vm1252_vm5, 1.0, %v2480_v10 }
 0x127   : > { %2387 = vst [vmem:[%s2575_s19 + $0x1160] sm:$0xff] %v1810_v7  ;;  %2388 = vst.msk [vmem:[%s2575_s19 + $0x1168] sm:$0xff] %vm1838_vm0, %v1811_v8  ;;  %v1829_v37 = vsel %vm1253_vm6, 1.0, %v2480_v10 }
 0x128   : > { %2389 = vst [vmem:[%s2575_s19 + $0x1170] sm:$0xff] %v1812_v9  ;;  %2390 = vst [vmem:[%s2575_s19 + $0x1178] sm:$0xff] %v1813_v11 }
 0x129   : > { %2391 = vst [vmem:[%s2575_s19 + $0x1180] sm:$0xff] %v1814_v16  ;;  %2392 = vst [vmem:[%s2575_s19 + $0x1188] sm:$0xff] %v1815_v17 }
 0x12a   : > { %2393 = vst [vmem:[%s2575_s19 + $0x1190] sm:$0xff] %v1816_v18  ;;  %2394 = vst [vmem:[%s2575_s19 + $0x1198] sm:$0xff] %v1817_v19 }
 0x12b   : > { %2395 = vst [vmem:[%s2575_s19 + $0x11a0] sm:$0xff] %v1818_v24  ;;  %2396 = vst [vmem:[%s2575_s19 + $0x11a8] sm:$0xff] %v1819_v25 }
 0x12c   : > { %2397 = vst.msk [vmem:[%s2575_s19 + $0x11b0] sm:$0xff] %vm1838_vm0, %v1820_v26  ;;  %2398 = vst [vmem:[%s2575_s19 + $0x11b8] sm:$0xff] %v1821_v27 }
 0x12d   : > { %2399 = vst [vmem:[%s2575_s19 + $0x11c0] sm:$0xff] %v1822_v30  ;;  %2400 = vst [vmem:[%s2575_s19 + $0x11c8] sm:$0xff] %v1823_v31 }
 0x12e   : > { %2401 = vst [vmem:[%s2575_s19 + $0x11d0] sm:$0xff] %v1824_v32  ;;  %2402 = vst [vmem:[%s2575_s19 + $0x11d8] sm:$0xff] %v1825_v33 }
 0x12f   : > { %2403 = vst [vmem:[%s2575_s19 + $0x11e0] sm:$0xff] %v1826_v34  ;;  %2404 = vst [vmem:[%s2575_s19 + $0x11e8] sm:$0xff] %v1827_v35 }
 0x130   : > { %2405 = vst [vmem:[%s2575_s19 + $0x11f0] sm:$0xff] %v1828_v36  ;;  %2406 = vst.msk [vmem:[%s2575_s19 + $0x11f8] sm:$0xff] %vm1838_vm0, %v1829_v37 }
 0x131 PF: > { %s11_s6 = sadd.s32 1, %s2478_s6  }
 0x132   : > { %p8_p4 = scmp.ge.s32.totalorder %s11_s6, 4  }
 0x134   :  { %10 = sbr.rel (!%p8_p4) target bundleno = 1 (0x1), region = 51 }

</bundles_post_ra>
